<compile_context>
chip_gen: v6e
topology: v6e:2x2x1
jax: 0.10.0
libtpu: 0.0.40
codegen_flags: <defaults>
</compile_context>

<pallas_src>
import math
from functools import partial

import jax
import jax.numpy as jnp
from jax import lax
from jax.experimental import pallas as pl
from jax.experimental.pallas import tpu as pltpu

EPS = 1e-5  # PyTorch LayerNorm default eps


# ----------------------------- in-kernel helpers -----------------------------
def _ln(x, g, b):
    # LayerNorm over the last dim in f32 (matches the fp16-safe LayerNorm subclass).
    mu = jnp.mean(x, axis=-1, keepdims=True)
    var = jnp.mean((x - mu) ** 2, axis=-1, keepdims=True)
    return (x - mu) * lax.rsqrt(var + EPS) * g + b


def _quick_gelu(x):
    return x * jax.nn.sigmoid(1.702 * x)


# (row/col parity, offset) into the padded stride-2 phase image for conv tap dy/dx.
_PHASE_SEL = ((1, 0), (0, 1), (1, 1))


def _resblock(x, w, n_head):
    """x: (L, C) f32.  w: 12 weight refs.  Returns (L, C) f32."""
    (wqkv, bqkv, woh, bo, g1, b1, g2, b2, wfc, bfc, wpr, bpr) = w
    L, C = x.shape
    hd = C // n_head
    scale = 1.0 / math.sqrt(hd)

    # --- attention branch: x + out_proj(softmax(q k^T) v) of ln_1(x) ---
    h = _ln(x, g1[...], b1[...]).astype(jnp.bfloat16)
    qkv = jnp.dot(h, wqkv[...], preferred_element_type=jnp.float32) + bqkv[...]
    q = qkv[:, :C] * scale
    k = qkv[:, C:2 * C]
    v = qkv[:, 2 * C:]

    # head-major (n_head, L, hd) operands so all heads ride one batched matmul.
    def heads(t):
        return jnp.stack([t[:, i * hd:(i + 1) * hd] for i in range(n_head)],
                         axis=0).astype(jnp.bfloat16)

    qh, kh, vh = heads(q), heads(k), heads(v)

    s = lax.dot_general(qh, kh, (((2,), (2,)), ((0,), (0,))),
                        preferred_element_type=jnp.float32)        # (H, L, L) f32
    s = s - jnp.max(s, axis=-1, keepdims=True)
    e = jnp.exp(s)
    p = e * pl.reciprocal(jnp.sum(e, axis=-1, keepdims=True), approx=True)
    o = lax.dot_general(p.astype(jnp.bfloat16), vh, (((2,), (1,)), ((0,), (0,))),
                        preferred_element_type=jnp.float32)        # (H, L, hd)
    # out-projection per head (batched) then sum over heads -> no transpose/concat.
    ao = lax.dot_general(o.astype(jnp.bfloat16), woh[...], (((2,), (1,)), ((0,), (0,))),
                         preferred_element_type=jnp.float32)       # (H, L, C)
    x = x + jnp.sum(ao, axis=0) + bo[...]

    # --- mlp branch: x + c_proj(QuickGELU(c_fc(ln_2(x)))) ---
    h2 = _ln(x, g2[...], b2[...]).astype(jnp.bfloat16)
    m = jnp.dot(h2, wfc[...], preferred_element_type=jnp.float32) + bfc[...]
    m = _quick_gelu(m).astype(jnp.bfloat16)
    m = jnp.dot(m, wpr[...], preferred_element_type=jnp.float32) + bpr[...]
    return x + m


# ------------------------- fused per-layer kernel -----------------------------
def _layer_kernel(*refs, n_head, Ho, Wo):
    cls_ref, ph_ref = refs[0], refs[1]
    (cw_ref, cb_ref, dg1_ref, db1_ref,
     dmw_ref, dmb_ref, dmg_ref, dmb2_ref) = refs[2:10]
    res1_w = refs[10:22]
    res2_w = refs[22:34]
    o_ref = refs[34]

    # ---- PosCNN: depthwise 3x3 / stride-2 conv from the 4 padded phase images ----
    ph = ph_ref[0].astype(jnp.float32)            # (4*(Ho+1), Wo+1, C)
    cw = cw_ref[...].astype(jnp.float32)          # (9, C) tap-major (dy, dx)
    C = cw.shape[-1]
    acc = jnp.zeros((Ho, Wo, C), jnp.float32)
    tap_idx = 0
    for dy in range(3):
        rp, r0 = _PHASE_SEL[dy]
        for dx in range(3):
            cp, c0 = _PHASE_SEL[dx]
            base = (2 * rp + cp) * (Ho + 1) + r0
            tap = ph[base:base + Ho, c0:c0 + Wo, :]            # (Ho, Wo, C) static slice
            acc = acc + tap * cw[tap_idx:tap_idx + 1, :]       # depthwise MAC (VPU)
            tap_idx += 1
    # (Ho, Wo, C) -> (Ho*Wo, C) via row concat (avoids an in-kernel reshape).
    conv = jnp.concatenate([acc[i] for i in range(Ho)], axis=0) + cb_ref[...]

    t = _ln(conv, dg1_ref[...], db1_ref[...])                  # ln_1
    att = jnp.mean(t, axis=-1, keepdims=True)                  # tokens_attention gate
    ta = (t * jax.nn.sigmoid(att)).astype(jnp.bfloat16)
    hmlp = jnp.dot(ta, dmw_ref[...], preferred_element_type=jnp.float32) + dmb_ref[...]
    hmlp = _ln(_quick_gelu(hmlp), dmg_ref[...], dmb2_ref[...])
    tokens = t + hmlp                                          # (Np, C)

    # cls token + tokens, then the two ResidualAttentionBlocks, all in VMEM.
    x = jnp.concatenate([cls_ref[0].astype(jnp.float32), tokens], axis=0)
    x = _resblock(x, res1_w, n_head)
    x = _resblock(x, res2_w, n_head)
    o_ref[0] = x.astype(o_ref.dtype)


# --------------------------------- wrappers ----------------------------------
def _w_spec(arr):
    nd = arr.ndim
    return pl.BlockSpec(arr.shape, lambda b, _nd=nd: (0,) * _nd)


_DOWN_KEYS = ('conv_w', 'conv_b', 'ln1_g', 'ln1_b', 'mlp_w', 'mlp_b', 'mlp_ln_g', 'mlp_ln_b')
_RES_KEYS = ('wqkv', 'bqkv', 'wo_h', 'bo', 'ln1_g', 'ln1_b', 'ln2_g', 'ln2_b',
             'wfc', 'bfc', 'wpr', 'bpr')


def layer_forward(xb, p_down, p_res1, p_res2, n_head):
    """One pyramid layer (PosCNN + 2 ResidualAttentionBlocks) as ONE pallas_call.
    xb: (B, L, C) batch-major, first token is the cls token."""
    B, L, C = xb.shape
    N = L - 1
    H = W = math.isqrt(N)
    assert H * W == N and H % 2 == 0  # TODO(synk): odd spatial sizes need an extra pad phase
    Ho = (H - 1) // 2 + 1
    Wo = (W - 1) // 2 + 1
    Lp = 1 + Ho * Wo

    cls_tok = xb[:, :1, :]                                     # (B, 1, C)
    img = xb[:, 1:, :].reshape(B, H, W, C)

    # 4 stride-2 phase images (even/odd row x even/odd col), zero-padded by one
    # row on top and one col on the left so every 3x3/stride-2 conv tap becomes
    # a contiguous unstrided slice inside the kernel.  Same bytes as the padded
    # image -> ~9x less HBM traffic than materializing im2col patches.
    phases = jnp.stack([img[:, 0::2, 0::2, :], img[:, 0::2, 1::2, :],
                        img[:, 1::2, 0::2, :], img[:, 1::2, 1::2, :]], axis=1)
    phases = jnp.pad(phases, ((0, 0), (0, 0), (1, 0), (1, 0), (0, 0)))
    phases = phases.reshape(B, 4 * (Ho + 1), Wo + 1, C)

    weights = ([p_down[k] for k in _DOWN_KEYS]
               + [p_res1[k] for k in _RES_KEYS]
               + [p_res2[k] for k in _RES_KEYS])

    return pl.pallas_call(
        partial(_layer_kernel, n_head=n_head, Ho=Ho, Wo=Wo),
        out_shape=jax.ShapeDtypeStruct((B, Lp, C), xb.dtype),
        grid=(B,),
        in_specs=[pl.BlockSpec((1, 1, C), lambda b: (b, 0, 0)),
                  pl.BlockSpec((1, 4 * (Ho + 1), Wo + 1, C), lambda b: (b, 0, 0, 0))]
                 + [_w_spec(w) for w in weights],
        out_specs=pl.BlockSpec((1, Lp, C), lambda b: (b, 0, 0)),
        compiler_params=pltpu.CompilerParams(dimension_semantics=("parallel",)),
    )(cls_tok, phases, *weights)


def pyramid_transformer_forward(x, params, *, layers, heads):
    # x: (L, B, C) sequence-first (PyTorch convention).  The tiny entry/exit
    # transposes fuse with the adjacent phase-prep / slicing XLA ops under jit.
    xb = jnp.transpose(x, (1, 0, 2))                           # (B, L, C)
    for i in range(layers):
        # NOTE: reproduces the original module's indexing exactly
        # (resblocks[i] and resblocks[i+1], not 2*i / 2*i+1).
        xb = layer_forward(xb, params['down'][i], params['res'][i],
                           params['res'][i + 1], heads)
    return jnp.transpose(xb, (1, 0, 2))                        # (L', B, C)


# ----------------------------- deterministic init -----------------------------
def init_params(key, width, heads, layers):
    C = width
    hd = C // heads
    bf16 = jnp.bfloat16

    def nrm(k, shape, scale=0.05, dtype=jnp.float32):
        return (scale * jax.random.normal(k, shape)).astype(dtype)

    keys = iter(jax.random.split(key, 4096))
    down, res = [], []
    for _ in range(layers):
        down.append(dict(
            # PyTorch Conv2d(C, C, 3, stride=2, pad=1, groups=C).weight is (C,1,3,3);
            # kernel layout here is (kh*kw, C), dy-major / dx-minor.
            conv_w=nrm(next(keys), (9, C)),
            conv_b=nrm(next(keys), (1, C)),
            ln1_g=1.0 + nrm(next(keys), (1, C)),
            ln1_b=nrm(next(keys), (1, C)),
            mlp_w=nrm(next(keys), (C, C), dtype=bf16),       # Linear.weight.T (bf16 for MXU)
            mlp_b=nrm(next(keys), (1, C)),
            mlp_ln_g=1.0 + nrm(next(keys), (1, C)),
            mlp_ln_b=nrm(next(keys), (1, C)),
        ))
    for _ in range(2 * layers):
        res.append(dict(
            wqkv=nrm(next(keys), (C, 3 * C), dtype=bf16),    # in_proj_weight.T
            bqkv=nrm(next(keys), (1, 3 * C)),
            # out_proj.weight.T reshaped head-major: (C, C) -> (heads, hd, C)
            wo_h=nrm(next(keys), (heads, hd, C), dtype=bf16),
            bo=nrm(next(keys), (1, C)),
            ln1_g=1.0 + nrm(next(keys), (1, C)),
            ln1_b=nrm(next(keys), (1, C)),
            ln2_g=1.0 + nrm(next(keys), (1, C)),
            ln2_b=nrm(next(keys), (1, C)),
            wfc=nrm(next(keys), (C, 4 * C), dtype=bf16),     # c_fc.weight.T
            bfc=nrm(next(keys), (1, 4 * C)),
            wpr=nrm(next(keys), (4 * C, C), dtype=bf16),     # c_proj.weight.T
            bpr=nrm(next(keys), (1, C)),
        ))
    return dict(down=down, res=res)


# ------------------------------------ main ------------------------------------
if __name__ == "__main__":
    B, width, heads, layers = 2, 32, 4, 2
    H = W = 8                                    # spatial grid of tokens
    L = 1 + H * W                                # cls token + H*W tokens

    key = jax.random.PRNGKey(0)
    kx, kp = jax.random.split(key)
    x = jax.random.normal(kx, (L, B, width), jnp.float32)     # (L, B, C)
    params = init_params(kp, width, heads, layers)

    fwd = jax.jit(partial(pyramid_transformer_forward, layers=layers, heads=heads))
    out = jax.block_until_ready(fwd(x, params))

    # each PosCNN halves H and W: 8 -> 4 -> 2, so final L = 1 + 2*2 = 5
    assert out.shape == (1 + (H // 4) ** 2, B, width), out.shape
    assert bool(jnp.all(jnp.isfinite(out)))
    print("KERNEL_OK")
</pallas_src>

<mosaic_0001>
module attributes {stable_mosaic.version = 11 : i64} {
  func.func @_layer_kernel(%arg0: i32, %arg1: memref<1x1x32xf32, #tpu.memory_space<vmem>>, %arg2: memref<1x20x5x32xf32, #tpu.memory_space<vmem>>, %arg3: memref<9x32xf32, #tpu.memory_space<vmem>>, %arg4: memref<1x32xf32, #tpu.memory_space<vmem>>, %arg5: memref<1x32xf32, #tpu.memory_space<vmem>>, %arg6: memref<1x32xf32, #tpu.memory_space<vmem>>, %arg7: memref<32x32xbf16, #tpu.memory_space<vmem>>, %arg8: memref<1x32xf32, #tpu.memory_space<vmem>>, %arg9: memref<1x32xf32, #tpu.memory_space<vmem>>, %arg10: memref<1x32xf32, #tpu.memory_space<vmem>>, %arg11: memref<32x96xbf16, #tpu.memory_space<vmem>>, %arg12: memref<1x96xf32, #tpu.memory_space<vmem>>, %arg13: memref<4x8x32xbf16, #tpu.memory_space<vmem>>, %arg14: memref<1x32xf32, #tpu.memory_space<vmem>>, %arg15: memref<1x32xf32, #tpu.memory_space<vmem>>, %arg16: memref<1x32xf32, #tpu.memory_space<vmem>>, %arg17: memref<1x32xf32, #tpu.memory_space<vmem>>, %arg18: memref<1x32xf32, #tpu.memory_space<vmem>>, %arg19: memref<32x128xbf16, #tpu.memory_space<vmem>>, %arg20: memref<1x128xf32, #tpu.memory_space<vmem>>, %arg21: memref<128x32xbf16, #tpu.memory_space<vmem>>, %arg22: memref<1x32xf32, #tpu.memory_space<vmem>>, %arg23: memref<32x96xbf16, #tpu.memory_space<vmem>>, %arg24: memref<1x96xf32, #tpu.memory_space<vmem>>, %arg25: memref<4x8x32xbf16, #tpu.memory_space<vmem>>, %arg26: memref<1x32xf32, #tpu.memory_space<vmem>>, %arg27: memref<1x32xf32, #tpu.memory_space<vmem>>, %arg28: memref<1x32xf32, #tpu.memory_space<vmem>>, %arg29: memref<1x32xf32, #tpu.memory_space<vmem>>, %arg30: memref<1x32xf32, #tpu.memory_space<vmem>>, %arg31: memref<32x128xbf16, #tpu.memory_space<vmem>>, %arg32: memref<1x128xf32, #tpu.memory_space<vmem>>, %arg33: memref<128x32xbf16, #tpu.memory_space<vmem>>, %arg34: memref<1x32xf32, #tpu.memory_space<vmem>>, %arg35: memref<1x17x32xf32, #tpu.memory_space<vmem>>) attributes {dimension_semantics = [#tpu.dimension_semantics<parallel>], iteration_bounds = array<i64: 2>, scalar_prefetch = 0 : i64, scratch_operands = 0 : i64, tpu.core_type = #tpu.core_type<tc>, window_params = [{transform_indices = @transform_0, window_bounds = array<i64: 1, 1, 32>}, {transform_indices = @transform_1, window_bounds = array<i64: 1, 20, 5, 32>}, {pipeline_mode = #tpu.pipeline_mode<synchronous>, transform_indices = @transform_2, window_bounds = array<i64: 9, 32>}, {pipeline_mode = #tpu.pipeline_mode<synchronous>, transform_indices = @transform_3, window_bounds = array<i64: 1, 32>}, {pipeline_mode = #tpu.pipeline_mode<synchronous>, transform_indices = @transform_4, window_bounds = array<i64: 1, 32>}, {pipeline_mode = #tpu.pipeline_mode<synchronous>, transform_indices = @transform_5, window_bounds = array<i64: 1, 32>}, {pipeline_mode = #tpu.pipeline_mode<synchronous>, transform_indices = @transform_6, window_bounds = array<i64: 32, 32>}, {pipeline_mode = #tpu.pipeline_mode<synchronous>, transform_indices = @transform_7, window_bounds = array<i64: 1, 32>}, {pipeline_mode = #tpu.pipeline_mode<synchronous>, transform_indices = @transform_8, window_bounds = array<i64: 1, 32>}, {pipeline_mode = #tpu.pipeline_mode<synchronous>, transform_indices = @transform_9, window_bounds = array<i64: 1, 32>}, {pipeline_mode = #tpu.pipeline_mode<synchronous>, transform_indices = @transform_10, window_bounds = array<i64: 32, 96>}, {pipeline_mode = #tpu.pipeline_mode<synchronous>, transform_indices = @transform_11, window_bounds = array<i64: 1, 96>}, {pipeline_mode = #tpu.pipeline_mode<synchronous>, transform_indices = @transform_12, window_bounds = array<i64: 4, 8, 32>}, {pipeline_mode = #tpu.pipeline_mode<synchronous>, transform_indices = @transform_13, window_bounds = array<i64: 1, 32>}, {pipeline_mode = #tpu.pipeline_mode<synchronous>, transform_indices = @transform_14, window_bounds = array<i64: 1, 32>}, {pipeline_mode = #tpu.pipeline_mode<synchronous>, transform_indices = @transform_15, window_bounds = array<i64: 1, 32>}, {pipeline_mode = #tpu.pipeline_mode<synchronous>, transform_indices = @transform_16, window_bounds = array<i64: 1, 32>}, {pipeline_mode = #tpu.pipeline_mode<synchronous>, transform_indices = @transform_17, window_bounds = array<i64: 1, 32>}, {pipeline_mode = #tpu.pipeline_mode<synchronous>, transform_indices = @transform_18, window_bounds = array<i64: 32, 128>}, {pipeline_mode = #tpu.pipeline_mode<synchronous>, transform_indices = @transform_19, window_bounds = array<i64: 1, 128>}, {pipeline_mode = #tpu.pipeline_mode<synchronous>, transform_indices = @transform_20, window_bounds = array<i64: 128, 32>}, {pipeline_mode = #tpu.pipeline_mode<synchronous>, transform_indices = @transform_21, window_bounds = array<i64: 1, 32>}, {pipeline_mode = #tpu.pipeline_mode<synchronous>, transform_indices = @transform_22, window_bounds = array<i64: 32, 96>}, {pipeline_mode = #tpu.pipeline_mode<synchronous>, transform_indices = @transform_23, window_bounds = array<i64: 1, 96>}, {pipeline_mode = #tpu.pipeline_mode<synchronous>, transform_indices = @transform_24, window_bounds = array<i64: 4, 8, 32>}, {pipeline_mode = #tpu.pipeline_mode<synchronous>, transform_indices = @transform_25, window_bounds = array<i64: 1, 32>}, {pipeline_mode = #tpu.pipeline_mode<synchronous>, transform_indices = @transform_26, window_bounds = array<i64: 1, 32>}, {pipeline_mode = #tpu.pipeline_mode<synchronous>, transform_indices = @transform_27, window_bounds = array<i64: 1, 32>}, {pipeline_mode = #tpu.pipeline_mode<synchronous>, transform_indices = @transform_28, window_bounds = array<i64: 1, 32>}, {pipeline_mode = #tpu.pipeline_mode<synchronous>, transform_indices = @transform_29, window_bounds = array<i64: 1, 32>}, {pipeline_mode = #tpu.pipeline_mode<synchronous>, transform_indices = @transform_30, window_bounds = array<i64: 32, 128>}, {pipeline_mode = #tpu.pipeline_mode<synchronous>, transform_indices = @transform_31, window_bounds = array<i64: 1, 128>}, {pipeline_mode = #tpu.pipeline_mode<synchronous>, transform_indices = @transform_32, window_bounds = array<i64: 128, 32>}, {pipeline_mode = #tpu.pipeline_mode<synchronous>, transform_indices = @transform_33, window_bounds = array<i64: 1, 32>}, {transform_indices = @transform_34, window_bounds = array<i64: 1, 17, 32>}]} {
    %c0 = arith.constant 0 : index
    %c0_0 = arith.constant 0 : index
    %c0_1 = arith.constant 0 : index
    %c0_2 = arith.constant 0 : index
    %0 = vector.load %arg2[%c0, %c0_0, %c0_1, %c0_2] : memref<1x20x5x32xf32, #tpu.memory_space<vmem>>, vector<1x20x5x32xf32>
    %1 = vector.shape_cast %0 : vector<1x20x5x32xf32> to vector<20x5x32xf32>
    %c0_3 = arith.constant 0 : index
    %c0_4 = arith.constant 0 : index
    %2 = vector.load %arg3[%c0_3, %c0_4] : memref<9x32xf32, #tpu.memory_space<vmem>>, vector<9x32xf32>
    %cst = arith.constant 0.000000e+00 : f32
    %3 = vector.broadcast %cst : f32 to vector<4x4x32xf32>
    %4 = vector.extract_strided_slice %1 {offsets = [15, 0, 0], sizes = [4, 4, 32], strides = [1, 1, 1]} : vector<20x5x32xf32> to vector<4x4x32xf32>
    %5 = vector.extract_strided_slice %2 {offsets = [0, 0], sizes = [1, 32], strides = [1, 1]} : vector<9x32xf32> to vector<1x32xf32>
    %6 = vector.shape_cast %5 : vector<1x32xf32> to vector<1x1x32xf32>
    %7 = vector.broadcast %6 : vector<1x1x32xf32> to vector<4x4x32xf32>
    %8 = arith.mulf %4, %7 : vector<4x4x32xf32>
    %9 = arith.addf %3, %8 : vector<4x4x32xf32>
    %10 = vector.extract_strided_slice %1 {offsets = [10, 1, 0], sizes = [4, 4, 32], strides = [1, 1, 1]} : vector<20x5x32xf32> to vector<4x4x32xf32>
    %11 = vector.extract_strided_slice %2 {offsets = [1, 0], sizes = [1, 32], strides = [1, 1]} : vector<9x32xf32> to vector<1x32xf32>
    %12 = vector.shape_cast %11 : vector<1x32xf32> to vector<1x1x32xf32>
    %13 = vector.broadcast %12 : vector<1x1x32xf32> to vector<4x4x32xf32>
    %14 = arith.mulf %10, %13 : vector<4x4x32xf32>
    %15 = arith.addf %9, %14 : vector<4x4x32xf32>
    %16 = vector.extract_strided_slice %1 {offsets = [15, 1, 0], sizes = [4, 4, 32], strides = [1, 1, 1]} : vector<20x5x32xf32> to vector<4x4x32xf32>
    %17 = vector.extract_strided_slice %2 {offsets = [2, 0], sizes = [1, 32], strides = [1, 1]} : vector<9x32xf32> to vector<1x32xf32>
    %18 = vector.shape_cast %17 : vector<1x32xf32> to vector<1x1x32xf32>
    %19 = vector.broadcast %18 : vector<1x1x32xf32> to vector<4x4x32xf32>
    %20 = arith.mulf %16, %19 : vector<4x4x32xf32>
    %21 = arith.addf %15, %20 : vector<4x4x32xf32>
    %22 = vector.extract_strided_slice %1 {offsets = [6, 0, 0], sizes = [4, 4, 32], strides = [1, 1, 1]} : vector<20x5x32xf32> to vector<4x4x32xf32>
    %23 = vector.extract_strided_slice %2 {offsets = [3, 0], sizes = [1, 32], strides = [1, 1]} : vector<9x32xf32> to vector<1x32xf32>
    %24 = vector.shape_cast %23 : vector<1x32xf32> to vector<1x1x32xf32>
    %25 = vector.broadcast %24 : vector<1x1x32xf32> to vector<4x4x32xf32>
    %26 = arith.mulf %22, %25 : vector<4x4x32xf32>
    %27 = arith.addf %21, %26 : vector<4x4x32xf32>
    %28 = vector.extract_strided_slice %1 {offsets = [1, 1, 0], sizes = [4, 4, 32], strides = [1, 1, 1]} : vector<20x5x32xf32> to vector<4x4x32xf32>
    %29 = vector.extract_strided_slice %2 {offsets = [4, 0], sizes = [1, 32], strides = [1, 1]} : vector<9x32xf32> to vector<1x32xf32>
    %30 = vector.shape_cast %29 : vector<1x32xf32> to vector<1x1x32xf32>
    %31 = vector.broadcast %30 : vector<1x1x32xf32> to vector<4x4x32xf32>
    %32 = arith.mulf %28, %31 : vector<4x4x32xf32>
    %33 = arith.addf %27, %32 : vector<4x4x32xf32>
    %34 = vector.extract_strided_slice %1 {offsets = [6, 1, 0], sizes = [4, 4, 32], strides = [1, 1, 1]} : vector<20x5x32xf32> to vector<4x4x32xf32>
    %35 = vector.extract_strided_slice %2 {offsets = [5, 0], sizes = [1, 32], strides = [1, 1]} : vector<9x32xf32> to vector<1x32xf32>
    %36 = vector.shape_cast %35 : vector<1x32xf32> to vector<1x1x32xf32>
    %37 = vector.broadcast %36 : vector<1x1x32xf32> to vector<4x4x32xf32>
    %38 = arith.mulf %34, %37 : vector<4x4x32xf32>
    %39 = arith.addf %33, %38 : vector<4x4x32xf32>
    %40 = vector.extract_strided_slice %1 {offsets = [16, 0, 0], sizes = [4, 4, 32], strides = [1, 1, 1]} : vector<20x5x32xf32> to vector<4x4x32xf32>
    %41 = vector.extract_strided_slice %2 {offsets = [6, 0], sizes = [1, 32], strides = [1, 1]} : vector<9x32xf32> to vector<1x32xf32>
    %42 = vector.shape_cast %41 : vector<1x32xf32> to vector<1x1x32xf32>
    %43 = vector.broadcast %42 : vector<1x1x32xf32> to vector<4x4x32xf32>
    %44 = arith.mulf %40, %43 : vector<4x4x32xf32>
    %45 = arith.addf %39, %44 : vector<4x4x32xf32>
    %46 = vector.extract_strided_slice %1 {offsets = [11, 1, 0], sizes = [4, 4, 32], strides = [1, 1, 1]} : vector<20x5x32xf32> to vector<4x4x32xf32>
    %47 = vector.extract_strided_slice %2 {offsets = [7, 0], sizes = [1, 32], strides = [1, 1]} : vector<9x32xf32> to vector<1x32xf32>
    %48 = vector.shape_cast %47 : vector<1x32xf32> to vector<1x1x32xf32>
    %49 = vector.broadcast %48 : vector<1x1x32xf32> to vector<4x4x32xf32>
    %50 = arith.mulf %46, %49 : vector<4x4x32xf32>
    %51 = arith.addf %45, %50 : vector<4x4x32xf32>
    %52 = vector.extract_strided_slice %1 {offsets = [16, 1, 0], sizes = [4, 4, 32], strides = [1, 1, 1]} : vector<20x5x32xf32> to vector<4x4x32xf32>
    %53 = vector.extract_strided_slice %2 {offsets = [8, 0], sizes = [1, 32], strides = [1, 1]} : vector<9x32xf32> to vector<1x32xf32>
    %54 = vector.shape_cast %53 : vector<1x32xf32> to vector<1x1x32xf32>
    %55 = vector.broadcast %54 : vector<1x1x32xf32> to vector<4x4x32xf32>
    %56 = arith.mulf %52, %55 : vector<4x4x32xf32>
    %57 = arith.addf %51, %56 : vector<4x4x32xf32>
    %58 = vector.extract_strided_slice %57 {offsets = [0, 0, 0], sizes = [1, 4, 32], strides = [1, 1, 1]} : vector<4x4x32xf32> to vector<1x4x32xf32>
    %59 = vector.shape_cast %58 : vector<1x4x32xf32> to vector<4x32xf32>
    %60 = vector.extract_strided_slice %57 {offsets = [1, 0, 0], sizes = [1, 4, 32], strides = [1, 1, 1]} : vector<4x4x32xf32> to vector<1x4x32xf32>
    %61 = vector.shape_cast %60 : vector<1x4x32xf32> to vector<4x32xf32>
    %62 = vector.extract_strided_slice %57 {offsets = [2, 0, 0], sizes = [1, 4, 32], strides = [1, 1, 1]} : vector<4x4x32xf32> to vector<1x4x32xf32>
    %63 = vector.shape_cast %62 : vector<1x4x32xf32> to vector<4x32xf32>
    %64 = vector.extract_strided_slice %57 {offsets = [3, 0, 0], sizes = [1, 4, 32], strides = [1, 1, 1]} : vector<4x4x32xf32> to vector<1x4x32xf32>
    %65 = vector.shape_cast %64 : vector<1x4x32xf32> to vector<4x32xf32>
    %66 = tpu.concatenate %59, %61, %63, %65 in 0 : vector<4x32xf32>, vector<4x32xf32>, vector<4x32xf32>, vector<4x32xf32> -> vector<16x32xf32>
    %c0_5 = arith.constant 0 : index
    %c0_6 = arith.constant 0 : index
    %67 = vector.load %arg4[%c0_5, %c0_6] : memref<1x32xf32, #tpu.memory_space<vmem>>, vector<1x32xf32>
    %68 = vector.broadcast %67 : vector<1x32xf32> to vector<16x32xf32>
    %69 = arith.addf %66, %68 : vector<16x32xf32>
    %c0_7 = arith.constant 0 : index
    %c0_8 = arith.constant 0 : index
    %70 = vector.load %arg5[%c0_7, %c0_8] : memref<1x32xf32, #tpu.memory_space<vmem>>, vector<1x32xf32>
    %c0_9 = arith.constant 0 : index
    %c0_10 = arith.constant 0 : index
    %71 = vector.load %arg6[%c0_9, %c0_10] : memref<1x32xf32, #tpu.memory_space<vmem>>, vector<1x32xf32>
    %cst_11 = arith.constant dense<0.000000e+00> : vector<16xf32>
    %72 = vector.multi_reduction <add>, %69, %cst_11 [1] : vector<16x32xf32> to vector<16xf32>
    %73 = vector.shape_cast %72 : vector<16xf32> to vector<16x1xf32>
    %cst_12 = arith.constant 3.200000e+01 : f32
    %74 = vector.broadcast %cst_12 : f32 to vector<16x1xf32>
    %75 = arith.divf %73, %74 : vector<16x1xf32>
    %76 = vector.broadcast %75 : vector<16x1xf32> to vector<16x32xf32>
    %77 = arith.subf %69, %76 : vector<16x32xf32>
    %78 = arith.mulf %77, %77 : vector<16x32xf32>
    %cst_13 = arith.constant dense<0.000000e+00> : vector<16xf32>
    %79 = vector.multi_reduction <add>, %78, %cst_13 [1] : vector<16x32xf32> to vector<16xf32>
    %80 = vector.shape_cast %79 : vector<16xf32> to vector<16x1xf32>
    %cst_14 = arith.constant 3.200000e+01 : f32
    %81 = vector.broadcast %cst_14 : f32 to vector<16x1xf32>
    %82 = arith.divf %80, %81 : vector<16x1xf32>
    %83 = vector.broadcast %75 : vector<16x1xf32> to vector<16x32xf32>
    %84 = arith.subf %69, %83 : vector<16x32xf32>
    %cst_15 = arith.constant 9.99999974E-6 : f32
    %85 = vector.broadcast %cst_15 : f32 to vector<16x1xf32>
    %86 = arith.addf %82, %85 : vector<16x1xf32>
    %87 = math.rsqrt %86 : vector<16x1xf32>
    %88 = vector.broadcast %87 : vector<16x1xf32> to vector<16x32xf32>
    %89 = arith.mulf %84, %88 : vector<16x32xf32>
    %90 = vector.broadcast %70 : vector<1x32xf32> to vector<16x32xf32>
    %91 = arith.mulf %89, %90 : vector<16x32xf32>
    %92 = vector.broadcast %71 : vector<1x32xf32> to vector<16x32xf32>
    %93 = arith.addf %91, %92 : vector<16x32xf32>
    %cst_16 = arith.constant dense<0.000000e+00> : vector<16xf32>
    %94 = vector.multi_reduction <add>, %93, %cst_16 [1] : vector<16x32xf32> to vector<16xf32>
    %95 = vector.shape_cast %94 : vector<16xf32> to vector<16x1xf32>
    %cst_17 = arith.constant 3.200000e+01 : f32
    %96 = vector.broadcast %cst_17 : f32 to vector<16x1xf32>
    %97 = arith.divf %95, %96 : vector<16x1xf32>
    %98 = arith.negf %97 : vector<16x1xf32>
    %99 = math.exp %98 : vector<16x1xf32>
    %cst_18 = arith.constant 1.000000e+00 : f32
    %100 = vector.broadcast %cst_18 : f32 to vector<16x1xf32>
    %101 = arith.addf %100, %99 : vector<16x1xf32>
    %102 = arith.divf %100, %101 : vector<16x1xf32>
    %103 = vector.broadcast %102 : vector<16x1xf32> to vector<16x32xf32>
    %104 = arith.mulf %93, %103 : vector<16x32xf32>
    %105 = arith.truncf %104 : vector<16x32xf32> to vector<16x32xbf16>
    %c0_19 = arith.constant 0 : index
    %c0_20 = arith.constant 0 : index
    %106 = vector.load %arg7[%c0_19, %c0_20] : memref<32x32xbf16, #tpu.memory_space<vmem>>, vector<32x32xbf16>
    %cst_21 = arith.constant dense<0.000000e+00> : vector<16x32xf32>
    %107 = tpu.matmul %105, %106, %cst_21 {dimension_numbers = #tpu.dot_dimension_numbers<[1], [0], [0], [1], [0, 0, 1, 1], [], []>} : vector<16x32xbf16>, vector<32x32xbf16>, vector<16x32xf32> -> vector<16x32xf32>
    %c0_22 = arith.constant 0 : index
    %c0_23 = arith.constant 0 : index
    %108 = vector.load %arg8[%c0_22, %c0_23] : memref<1x32xf32, #tpu.memory_space<vmem>>, vector<1x32xf32>
    %109 = vector.broadcast %108 : vector<1x32xf32> to vector<16x32xf32>
    %110 = arith.addf %107, %109 : vector<16x32xf32>
    %cst_24 = arith.constant 1.702000e+00 : f32
    %111 = vector.broadcast %cst_24 : f32 to vector<16x32xf32>
    %112 = arith.mulf %111, %110 : vector<16x32xf32>
    %113 = arith.negf %112 : vector<16x32xf32>
    %114 = math.exp %113 : vector<16x32xf32>
    %cst_25 = arith.constant 1.000000e+00 : f32
    %115 = vector.broadcast %cst_25 : f32 to vector<16x32xf32>
    %116 = arith.addf %115, %114 : vector<16x32xf32>
    %117 = arith.divf %115, %116 : vector<16x32xf32>
    %118 = arith.mulf %110, %117 : vector<16x32xf32>
    %c0_26 = arith.constant 0 : index
    %c0_27 = arith.constant 0 : index
    %119 = vector.load %arg9[%c0_26, %c0_27] : memref<1x32xf32, #tpu.memory_space<vmem>>, vector<1x32xf32>
    %c0_28 = arith.constant 0 : index
    %c0_29 = arith.constant 0 : index
    %120 = vector.load %arg10[%c0_28, %c0_29] : memref<1x32xf32, #tpu.memory_space<vmem>>, vector<1x32xf32>
    %cst_30 = arith.constant dense<0.000000e+00> : vector<16xf32>
    %121 = vector.multi_reduction <add>, %118, %cst_30 [1] : vector<16x32xf32> to vector<16xf32>
    %122 = vector.shape_cast %121 : vector<16xf32> to vector<16x1xf32>
    %cst_31 = arith.constant 3.200000e+01 : f32
    %123 = vector.broadcast %cst_31 : f32 to vector<16x1xf32>
    %124 = arith.divf %122, %123 : vector<16x1xf32>
    %125 = vector.broadcast %124 : vector<16x1xf32> to vector<16x32xf32>
    %126 = arith.subf %118, %125 : vector<16x32xf32>
    %127 = arith.mulf %126, %126 : vector<16x32xf32>
    %cst_32 = arith.constant dense<0.000000e+00> : vector<16xf32>
    %128 = vector.multi_reduction <add>, %127, %cst_32 [1] : vector<16x32xf32> to vector<16xf32>
    %129 = vector.shape_cast %128 : vector<16xf32> to vector<16x1xf32>
    %cst_33 = arith.constant 3.200000e+01 : f32
    %130 = vector.broadcast %cst_33 : f32 to vector<16x1xf32>
    %131 = arith.divf %129, %130 : vector<16x1xf32>
    %132 = vector.broadcast %124 : vector<16x1xf32> to vector<16x32xf32>
    %133 = arith.subf %118, %132 : vector<16x32xf32>
    %cst_34 = arith.constant 9.99999974E-6 : f32
    %134 = vector.broadcast %cst_34 : f32 to vector<16x1xf32>
    %135 = arith.addf %131, %134 : vector<16x1xf32>
    %136 = math.rsqrt %135 : vector<16x1xf32>
    %137 = vector.broadcast %136 : vector<16x1xf32> to vector<16x32xf32>
    %138 = arith.mulf %133, %137 : vector<16x32xf32>
    %139 = vector.broadcast %119 : vector<1x32xf32> to vector<16x32xf32>
    %140 = arith.mulf %138, %139 : vector<16x32xf32>
    %141 = vector.broadcast %120 : vector<1x32xf32> to vector<16x32xf32>
    %142 = arith.addf %140, %141 : vector<16x32xf32>
    %143 = arith.addf %93, %142 : vector<16x32xf32>
    %c0_35 = arith.constant 0 : index
    %c0_36 = arith.constant 0 : index
    %c0_37 = arith.constant 0 : index
    %144 = vector.load %arg1[%c0_35, %c0_36, %c0_37] : memref<1x1x32xf32, #tpu.memory_space<vmem>>, vector<1x1x32xf32>
    %145 = vector.shape_cast %144 : vector<1x1x32xf32> to vector<1x32xf32>
    %146 = tpu.concatenate %145, %143 in 0 : vector<1x32xf32>, vector<16x32xf32> -> vector<17x32xf32>
    %c0_38 = arith.constant 0 : index
    %c0_39 = arith.constant 0 : index
    %147 = vector.load %arg15[%c0_38, %c0_39] : memref<1x32xf32, #tpu.memory_space<vmem>>, vector<1x32xf32>
    %c0_40 = arith.constant 0 : index
    %c0_41 = arith.constant 0 : index
    %148 = vector.load %arg16[%c0_40, %c0_41] : memref<1x32xf32, #tpu.memory_space<vmem>>, vector<1x32xf32>
    %cst_42 = arith.constant dense<0.000000e+00> : vector<17xf32>
    %149 = vector.multi_reduction <add>, %146, %cst_42 [1] : vector<17x32xf32> to vector<17xf32>
    %150 = vector.shape_cast %149 : vector<17xf32> to vector<17x1xf32>
    %cst_43 = arith.constant 3.200000e+01 : f32
    %151 = vector.broadcast %cst_43 : f32 to vector<17x1xf32>
    %152 = arith.divf %150, %151 : vector<17x1xf32>
    %153 = vector.broadcast %152 : vector<17x1xf32> to vector<17x32xf32>
    %154 = arith.subf %146, %153 : vector<17x32xf32>
    %155 = arith.mulf %154, %154 : vector<17x32xf32>
    %cst_44 = arith.constant dense<0.000000e+00> : vector<17xf32>
    %156 = vector.multi_reduction <add>, %155, %cst_44 [1] : vector<17x32xf32> to vector<17xf32>
    %157 = vector.shape_cast %156 : vector<17xf32> to vector<17x1xf32>
    %cst_45 = arith.constant 3.200000e+01 : f32
    %158 = vector.broadcast %cst_45 : f32 to vector<17x1xf32>
    %159 = arith.divf %157, %158 : vector<17x1xf32>
    %160 = vector.broadcast %152 : vector<17x1xf32> to vector<17x32xf32>
    %161 = arith.subf %146, %160 : vector<17x32xf32>
    %cst_46 = arith.constant 9.99999974E-6 : f32
    %162 = vector.broadcast %cst_46 : f32 to vector<17x1xf32>
    %163 = arith.addf %159, %162 : vector<17x1xf32>
    %164 = math.rsqrt %163 : vector<17x1xf32>
    %165 = vector.broadcast %164 : vector<17x1xf32> to vector<17x32xf32>
    %166 = arith.mulf %161, %165 : vector<17x32xf32>
    %167 = vector.broadcast %147 : vector<1x32xf32> to vector<17x32xf32>
    %168 = arith.mulf %166, %167 : vector<17x32xf32>
    %169 = vector.broadcast %148 : vector<1x32xf32> to vector<17x32xf32>
    %170 = arith.addf %168, %169 : vector<17x32xf32>
    %171 = arith.truncf %170 : vector<17x32xf32> to vector<17x32xbf16>
    %c0_47 = arith.constant 0 : index
    %c0_48 = arith.constant 0 : index
    %172 = vector.load %arg11[%c0_47, %c0_48] : memref<32x96xbf16, #tpu.memory_space<vmem>>, vector<32x96xbf16>
    %cst_49 = arith.constant dense<0.000000e+00> : vector<17x96xf32>
    %173 = tpu.matmul %171, %172, %cst_49 {dimension_numbers = #tpu.dot_dimension_numbers<[1], [0], [0], [1], [0, 0, 1, 1], [], []>} : vector<17x32xbf16>, vector<32x96xbf16>, vector<17x96xf32> -> vector<17x96xf32>
    %c0_50 = arith.constant 0 : index
    %c0_51 = arith.constant 0 : index
    %174 = vector.load %arg12[%c0_50, %c0_51] : memref<1x96xf32, #tpu.memory_space<vmem>>, vector<1x96xf32>
    %175 = vector.broadcast %174 : vector<1x96xf32> to vector<17x96xf32>
    %176 = arith.addf %173, %175 : vector<17x96xf32>
    %177 = vector.extract_strided_slice %176 {offsets = [0, 0], sizes = [17, 32], strides = [1, 1]} : vector<17x96xf32> to vector<17x32xf32>
    %cst_52 = arith.constant 0.353553385 : f32
    %178 = vector.broadcast %cst_52 : f32 to vector<17x32xf32>
    %179 = arith.mulf %177, %178 : vector<17x32xf32>
    %180 = vector.extract_strided_slice %176 {offsets = [0, 32], sizes = [17, 32], strides = [1, 1]} : vector<17x96xf32> to vector<17x32xf32>
    %181 = vector.extract_strided_slice %176 {offsets = [0, 64], sizes = [17, 32], strides = [1, 1]} : vector<17x96xf32> to vector<17x32xf32>
    %182 = vector.extract_strided_slice %179 {offsets = [0, 0], sizes = [17, 8], strides = [1, 1]} : vector<17x32xf32> to vector<17x8xf32>
    %183 = vector.extract_strided_slice %179 {offsets = [0, 8], sizes = [17, 8], strides = [1, 1]} : vector<17x32xf32> to vector<17x8xf32>
    %184 = vector.extract_strided_slice %179 {offsets = [0, 16], sizes = [17, 8], strides = [1, 1]} : vector<17x32xf32> to vector<17x8xf32>
    %185 = vector.extract_strided_slice %179 {offsets = [0, 24], sizes = [17, 8], strides = [1, 1]} : vector<17x32xf32> to vector<17x8xf32>
    %186 = vector.shape_cast %182 : vector<17x8xf32> to vector<1x17x8xf32>
    %187 = vector.shape_cast %183 : vector<17x8xf32> to vector<1x17x8xf32>
    %188 = vector.shape_cast %184 : vector<17x8xf32> to vector<1x17x8xf32>
    %189 = vector.shape_cast %185 : vector<17x8xf32> to vector<1x17x8xf32>
    %190 = tpu.concatenate %186, %187, %188, %189 in 0 : vector<1x17x8xf32>, vector<1x17x8xf32>, vector<1x17x8xf32>, vector<1x17x8xf32> -> vector<4x17x8xf32>
    %191 = arith.truncf %190 : vector<4x17x8xf32> to vector<4x17x8xbf16>
    %192 = vector.extract_strided_slice %180 {offsets = [0, 0], sizes = [17, 8], strides = [1, 1]} : vector<17x32xf32> to vector<17x8xf32>
    %193 = vector.extract_strided_slice %180 {offsets = [0, 8], sizes = [17, 8], strides = [1, 1]} : vector<17x32xf32> to vector<17x8xf32>
    %194 = vector.extract_strided_slice %180 {offsets = [0, 16], sizes = [17, 8], strides = [1, 1]} : vector<17x32xf32> to vector<17x8xf32>
    %195 = vector.extract_strided_slice %180 {offsets = [0, 24], sizes = [17, 8], strides = [1, 1]} : vector<17x32xf32> to vector<17x8xf32>
    %196 = vector.shape_cast %192 : vector<17x8xf32> to vector<1x17x8xf32>
    %197 = vector.shape_cast %193 : vector<17x8xf32> to vector<1x17x8xf32>
    %198 = vector.shape_cast %194 : vector<17x8xf32> to vector<1x17x8xf32>
    %199 = vector.shape_cast %195 : vector<17x8xf32> to vector<1x17x8xf32>
    %200 = tpu.concatenate %196, %197, %198, %199 in 0 : vector<1x17x8xf32>, vector<1x17x8xf32>, vector<1x17x8xf32>, vector<1x17x8xf32> -> vector<4x17x8xf32>
    %201 = arith.truncf %200 : vector<4x17x8xf32> to vector<4x17x8xbf16>
    %202 = vector.extract_strided_slice %181 {offsets = [0, 0], sizes = [17, 8], strides = [1, 1]} : vector<17x32xf32> to vector<17x8xf32>
    %203 = vector.extract_strided_slice %181 {offsets = [0, 8], sizes = [17, 8], strides = [1, 1]} : vector<17x32xf32> to vector<17x8xf32>
    %204 = vector.extract_strided_slice %181 {offsets = [0, 16], sizes = [17, 8], strides = [1, 1]} : vector<17x32xf32> to vector<17x8xf32>
    %205 = vector.extract_strided_slice %181 {offsets = [0, 24], sizes = [17, 8], strides = [1, 1]} : vector<17x32xf32> to vector<17x8xf32>
    %206 = vector.shape_cast %202 : vector<17x8xf32> to vector<1x17x8xf32>
    %207 = vector.shape_cast %203 : vector<17x8xf32> to vector<1x17x8xf32>
    %208 = vector.shape_cast %204 : vector<17x8xf32> to vector<1x17x8xf32>
    %209 = vector.shape_cast %205 : vector<17x8xf32> to vector<1x17x8xf32>
    %210 = tpu.concatenate %206, %207, %208, %209 in 0 : vector<1x17x8xf32>, vector<1x17x8xf32>, vector<1x17x8xf32>, vector<1x17x8xf32> -> vector<4x17x8xf32>
    %211 = arith.truncf %210 : vector<4x17x8xf32> to vector<4x17x8xbf16>
    %cst_53 = arith.constant dense<0.000000e+00> : vector<4x17x17xf32>
    %212 = tpu.matmul %191, %201, %cst_53 {dimension_numbers = #tpu.dot_dimension_numbers<[2], [2], [1], [1], [0, 0, 0, 1, 1, 1], [0], [0]>} : vector<4x17x8xbf16>, vector<4x17x8xbf16>, vector<4x17x17xf32> -> vector<4x17x17xf32>
    %cst_54 = arith.constant dense<0xFF800000> : vector<4x17xf32>
    %213 = vector.multi_reduction <maximumf>, %212, %cst_54 [2] : vector<4x17x17xf32> to vector<4x17xf32>
    %214 = vector.shape_cast %213 : vector<4x17xf32> to vector<4x17x1xf32>
    %215 = vector.broadcast %214 : vector<4x17x1xf32> to vector<4x17x17xf32>
    %216 = arith.subf %212, %215 : vector<4x17x17xf32>
    %217 = math.exp %216 : vector<4x17x17xf32>
    %cst_55 = arith.constant dense<0.000000e+00> : vector<4x17xf32>
    %218 = vector.multi_reduction <add>, %217, %cst_55 [2] : vector<4x17x17xf32> to vector<4x17xf32>
    %219 = vector.shape_cast %218 : vector<4x17xf32> to vector<4x17x1xf32>
    %220 = tpu.reciprocal %219 {approx = true} : vector<4x17x1xf32> -> vector<4x17x1xf32>
    %221 = vector.broadcast %220 : vector<4x17x1xf32> to vector<4x17x17xf32>
    %222 = arith.mulf %217, %221 : vector<4x17x17xf32>
    %223 = arith.truncf %222 : vector<4x17x17xf32> to vector<4x17x17xbf16>
    %cst_56 = arith.constant dense<0.000000e+00> : vector<4x17x8xf32>
    %224 = tpu.matmul %223, %211, %cst_56 {dimension_numbers = #tpu.dot_dimension_numbers<[2], [1], [1], [2], [0, 0, 0, 1, 1, 2], [0], [0]>} : vector<4x17x17xbf16>, vector<4x17x8xbf16>, vector<4x17x8xf32> -> vector<4x17x8xf32>
    %225 = arith.truncf %224 : vector<4x17x8xf32> to vector<4x17x8xbf16>
    %c0_57 = arith.constant 0 : index
    %c0_58 = arith.constant 0 : index
    %c0_59 = arith.constant 0 : index
    %226 = vector.load %arg13[%c0_57, %c0_58, %c0_59] : memref<4x8x32xbf16, #tpu.memory_space<vmem>>, vector<4x8x32xbf16>
    %cst_60 = arith.constant dense<0.000000e+00> : vector<4x17x32xf32>
    %227 = tpu.matmul %225, %226, %cst_60 {dimension_numbers = #tpu.dot_dimension_numbers<[2], [1], [1], [2], [0, 0, 0, 1, 1, 2], [0], [0]>} : vector<4x17x8xbf16>, vector<4x8x32xbf16>, vector<4x17x32xf32> -> vector<4x17x32xf32>
    %cst_61 = arith.constant dense<0.000000e+00> : vector<17x32xf32>
    %228 = vector.multi_reduction <add>, %227, %cst_61 [0] : vector<4x17x32xf32> to vector<17x32xf32>
    %229 = arith.addf %146, %228 : vector<17x32xf32>
    %c0_62 = arith.constant 0 : index
    %c0_63 = arith.constant 0 : index
    %230 = vector.load %arg14[%c0_62, %c0_63] : memref<1x32xf32, #tpu.memory_space<vmem>>, vector<1x32xf32>
    %231 = vector.broadcast %230 : vector<1x32xf32> to vector<17x32xf32>
    %232 = arith.addf %229, %231 : vector<17x32xf32>
    %c0_64 = arith.constant 0 : index
    %c0_65 = arith.constant 0 : index
    %233 = vector.load %arg17[%c0_64, %c0_65] : memref<1x32xf32, #tpu.memory_space<vmem>>, vector<1x32xf32>
    %c0_66 = arith.constant 0 : index
    %c0_67 = arith.constant 0 : index
    %234 = vector.load %arg18[%c0_66, %c0_67] : memref<1x32xf32, #tpu.memory_space<vmem>>, vector<1x32xf32>
    %cst_68 = arith.constant dense<0.000000e+00> : vector<17xf32>
    %235 = vector.multi_reduction <add>, %232, %cst_68 [1] : vector<17x32xf32> to vector<17xf32>
    %236 = vector.shape_cast %235 : vector<17xf32> to vector<17x1xf32>
    %cst_69 = arith.constant 3.200000e+01 : f32
    %237 = vector.broadcast %cst_69 : f32 to vector<17x1xf32>
    %238 = arith.divf %236, %237 : vector<17x1xf32>
    %239 = vector.broadcast %238 : vector<17x1xf32> to vector<17x32xf32>
    %240 = arith.subf %232, %239 : vector<17x32xf32>
    %241 = arith.mulf %240, %240 : vector<17x32xf32>
    %cst_70 = arith.constant dense<0.000000e+00> : vector<17xf32>
    %242 = vector.multi_reduction <add>, %241, %cst_70 [1] : vector<17x32xf32> to vector<17xf32>
    %243 = vector.shape_cast %242 : vector<17xf32> to vector<17x1xf32>
    %cst_71 = arith.constant 3.200000e+01 : f32
    %244 = vector.broadcast %cst_71 : f32 to vector<17x1xf32>
    %245 = arith.divf %243, %244 : vector<17x1xf32>
    %246 = vector.broadcast %238 : vector<17x1xf32> to vector<17x32xf32>
    %247 = arith.subf %232, %246 : vector<17x32xf32>
    %cst_72 = arith.constant 9.99999974E-6 : f32
    %248 = vector.broadcast %cst_72 : f32 to vector<17x1xf32>
    %249 = arith.addf %245, %248 : vector<17x1xf32>
    %250 = math.rsqrt %249 : vector<17x1xf32>
    %251 = vector.broadcast %250 : vector<17x1xf32> to vector<17x32xf32>
    %252 = arith.mulf %247, %251 : vector<17x32xf32>
    %253 = vector.broadcast %233 : vector<1x32xf32> to vector<17x32xf32>
    %254 = arith.mulf %252, %253 : vector<17x32xf32>
    %255 = vector.broadcast %234 : vector<1x32xf32> to vector<17x32xf32>
    %256 = arith.addf %254, %255 : vector<17x32xf32>
    %257 = arith.truncf %256 : vector<17x32xf32> to vector<17x32xbf16>
    %c0_73 = arith.constant 0 : index
    %c0_74 = arith.constant 0 : index
    %258 = vector.load %arg19[%c0_73, %c0_74] : memref<32x128xbf16, #tpu.memory_space<vmem>>, vector<32x128xbf16>
    %cst_75 = arith.constant dense<0.000000e+00> : vector<17x128xf32>
    %259 = tpu.matmul %257, %258, %cst_75 {dimension_numbers = #tpu.dot_dimension_numbers<[1], [0], [0], [1], [0, 0, 1, 1], [], []>} : vector<17x32xbf16>, vector<32x128xbf16>, vector<17x128xf32> -> vector<17x128xf32>
    %c0_76 = arith.constant 0 : index
    %c0_77 = arith.constant 0 : index
    %260 = vector.load %arg20[%c0_76, %c0_77] : memref<1x128xf32, #tpu.memory_space<vmem>>, vector<1x128xf32>
    %261 = vector.broadcast %260 : vector<1x128xf32> to vector<17x128xf32>
    %262 = arith.addf %259, %261 : vector<17x128xf32>
    %cst_78 = arith.constant 1.702000e+00 : f32
    %263 = vector.broadcast %cst_78 : f32 to vector<17x128xf32>
    %264 = arith.mulf %263, %262 : vector<17x128xf32>
    %265 = arith.negf %264 : vector<17x128xf32>
    %266 = math.exp %265 : vector<17x128xf32>
    %cst_79 = arith.constant 1.000000e+00 : f32
    %267 = vector.broadcast %cst_79 : f32 to vector<17x128xf32>
    %268 = arith.addf %267, %266 : vector<17x128xf32>
    %269 = arith.divf %267, %268 : vector<17x128xf32>
    %270 = arith.mulf %262, %269 : vector<17x128xf32>
    %271 = arith.truncf %270 : vector<17x128xf32> to vector<17x128xbf16>
    %c0_80 = arith.constant 0 : index
    %c0_81 = arith.constant 0 : index
    %272 = vector.load %arg21[%c0_80, %c0_81] : memref<128x32xbf16, #tpu.memory_space<vmem>>, vector<128x32xbf16>
    %cst_82 = arith.constant dense<0.000000e+00> : vector<17x32xf32>
    %273 = tpu.matmul %271, %272, %cst_82 {dimension_numbers = #tpu.dot_dimension_numbers<[1], [0], [0], [1], [0, 0, 1, 1], [], []>} : vector<17x128xbf16>, vector<128x32xbf16>, vector<17x32xf32> -> vector<17x32xf32>
    %c0_83 = arith.constant 0 : index
    %c0_84 = arith.constant 0 : index
    %274 = vector.load %arg22[%c0_83, %c0_84] : memref<1x32xf32, #tpu.memory_space<vmem>>, vector<1x32xf32>
    %275 = vector.broadcast %274 : vector<1x32xf32> to vector<17x32xf32>
    %276 = arith.addf %273, %275 : vector<17x32xf32>
    %277 = arith.addf %232, %276 : vector<17x32xf32>
    %c0_85 = arith.constant 0 : index
    %c0_86 = arith.constant 0 : index
    %278 = vector.load %arg27[%c0_85, %c0_86] : memref<1x32xf32, #tpu.memory_space<vmem>>, vector<1x32xf32>
    %c0_87 = arith.constant 0 : index
    %c0_88 = arith.constant 0 : index
    %279 = vector.load %arg28[%c0_87, %c0_88] : memref<1x32xf32, #tpu.memory_space<vmem>>, vector<1x32xf32>
    %cst_89 = arith.constant dense<0.000000e+00> : vector<17xf32>
    %280 = vector.multi_reduction <add>, %277, %cst_89 [1] : vector<17x32xf32> to vector<17xf32>
    %281 = vector.shape_cast %280 : vector<17xf32> to vector<17x1xf32>
    %cst_90 = arith.constant 3.200000e+01 : f32
    %282 = vector.broadcast %cst_90 : f32 to vector<17x1xf32>
    %283 = arith.divf %281, %282 : vector<17x1xf32>
    %284 = vector.broadcast %283 : vector<17x1xf32> to vector<17x32xf32>
    %285 = arith.subf %277, %284 : vector<17x32xf32>
    %286 = arith.mulf %285, %285 : vector<17x32xf32>
    %cst_91 = arith.constant dense<0.000000e+00> : vector<17xf32>
    %287 = vector.multi_reduction <add>, %286, %cst_91 [1] : vector<17x32xf32> to vector<17xf32>
    %288 = vector.shape_cast %287 : vector<17xf32> to vector<17x1xf32>
    %cst_92 = arith.constant 3.200000e+01 : f32
    %289 = vector.broadcast %cst_92 : f32 to vector<17x1xf32>
    %290 = arith.divf %288, %289 : vector<17x1xf32>
    %291 = vector.broadcast %283 : vector<17x1xf32> to vector<17x32xf32>
    %292 = arith.subf %277, %291 : vector<17x32xf32>
    %cst_93 = arith.constant 9.99999974E-6 : f32
    %293 = vector.broadcast %cst_93 : f32 to vector<17x1xf32>
    %294 = arith.addf %290, %293 : vector<17x1xf32>
    %295 = math.rsqrt %294 : vector<17x1xf32>
    %296 = vector.broadcast %295 : vector<17x1xf32> to vector<17x32xf32>
    %297 = arith.mulf %292, %296 : vector<17x32xf32>
    %298 = vector.broadcast %278 : vector<1x32xf32> to vector<17x32xf32>
    %299 = arith.mulf %297, %298 : vector<17x32xf32>
    %300 = vector.broadcast %279 : vector<1x32xf32> to vector<17x32xf32>
    %301 = arith.addf %299, %300 : vector<17x32xf32>
    %302 = arith.truncf %301 : vector<17x32xf32> to vector<17x32xbf16>
    %c0_94 = arith.constant 0 : index
    %c0_95 = arith.constant 0 : index
    %303 = vector.load %arg23[%c0_94, %c0_95] : memref<32x96xbf16, #tpu.memory_space<vmem>>, vector<32x96xbf16>
    %cst_96 = arith.constant dense<0.000000e+00> : vector<17x96xf32>
    %304 = tpu.matmul %302, %303, %cst_96 {dimension_numbers = #tpu.dot_dimension_numbers<[1], [0], [0], [1], [0, 0, 1, 1], [], []>} : vector<17x32xbf16>, vector<32x96xbf16>, vector<17x96xf32> -> vector<17x96xf32>
    %c0_97 = arith.constant 0 : index
    %c0_98 = arith.constant 0 : index
    %305 = vector.load %arg24[%c0_97, %c0_98] : memref<1x96xf32, #tpu.memory_space<vmem>>, vector<1x96xf32>
    %306 = vector.broadcast %305 : vector<1x96xf32> to vector<17x96xf32>
    %307 = arith.addf %304, %306 : vector<17x96xf32>
    %308 = vector.extract_strided_slice %307 {offsets = [0, 0], sizes = [17, 32], strides = [1, 1]} : vector<17x96xf32> to vector<17x32xf32>
    %cst_99 = arith.constant 0.353553385 : f32
    %309 = vector.broadcast %cst_99 : f32 to vector<17x32xf32>
    %310 = arith.mulf %308, %309 : vector<17x32xf32>
    %311 = vector.extract_strided_slice %307 {offsets = [0, 32], sizes = [17, 32], strides = [1, 1]} : vector<17x96xf32> to vector<17x32xf32>
    %312 = vector.extract_strided_slice %307 {offsets = [0, 64], sizes = [17, 32], strides = [1, 1]} : vector<17x96xf32> to vector<17x32xf32>
    %313 = vector.extract_strided_slice %310 {offsets = [0, 0], sizes = [17, 8], strides = [1, 1]} : vector<17x32xf32> to vector<17x8xf32>
    %314 = vector.extract_strided_slice %310 {offsets = [0, 8], sizes = [17, 8], strides = [1, 1]} : vector<17x32xf32> to vector<17x8xf32>
    %315 = vector.extract_strided_slice %310 {offsets = [0, 16], sizes = [17, 8], strides = [1, 1]} : vector<17x32xf32> to vector<17x8xf32>
    %316 = vector.extract_strided_slice %310 {offsets = [0, 24], sizes = [17, 8], strides = [1, 1]} : vector<17x32xf32> to vector<17x8xf32>
    %317 = vector.shape_cast %313 : vector<17x8xf32> to vector<1x17x8xf32>
    %318 = vector.shape_cast %314 : vector<17x8xf32> to vector<1x17x8xf32>
    %319 = vector.shape_cast %315 : vector<17x8xf32> to vector<1x17x8xf32>
    %320 = vector.shape_cast %316 : vector<17x8xf32> to vector<1x17x8xf32>
    %321 = tpu.concatenate %317, %318, %319, %320 in 0 : vector<1x17x8xf32>, vector<1x17x8xf32>, vector<1x17x8xf32>, vector<1x17x8xf32> -> vector<4x17x8xf32>
    %322 = arith.truncf %321 : vector<4x17x8xf32> to vector<4x17x8xbf16>
    %323 = vector.extract_strided_slice %311 {offsets = [0, 0], sizes = [17, 8], strides = [1, 1]} : vector<17x32xf32> to vector<17x8xf32>
    %324 = vector.extract_strided_slice %311 {offsets = [0, 8], sizes = [17, 8], strides = [1, 1]} : vector<17x32xf32> to vector<17x8xf32>
    %325 = vector.extract_strided_slice %311 {offsets = [0, 16], sizes = [17, 8], strides = [1, 1]} : vector<17x32xf32> to vector<17x8xf32>
    %326 = vector.extract_strided_slice %311 {offsets = [0, 24], sizes = [17, 8], strides = [1, 1]} : vector<17x32xf32> to vector<17x8xf32>
    %327 = vector.shape_cast %323 : vector<17x8xf32> to vector<1x17x8xf32>
    %328 = vector.shape_cast %324 : vector<17x8xf32> to vector<1x17x8xf32>
    %329 = vector.shape_cast %325 : vector<17x8xf32> to vector<1x17x8xf32>
    %330 = vector.shape_cast %326 : vector<17x8xf32> to vector<1x17x8xf32>
    %331 = tpu.concatenate %327, %328, %329, %330 in 0 : vector<1x17x8xf32>, vector<1x17x8xf32>, vector<1x17x8xf32>, vector<1x17x8xf32> -> vector<4x17x8xf32>
    %332 = arith.truncf %331 : vector<4x17x8xf32> to vector<4x17x8xbf16>
    %333 = vector.extract_strided_slice %312 {offsets = [0, 0], sizes = [17, 8], strides = [1, 1]} : vector<17x32xf32> to vector<17x8xf32>
    %334 = vector.extract_strided_slice %312 {offsets = [0, 8], sizes = [17, 8], strides = [1, 1]} : vector<17x32xf32> to vector<17x8xf32>
    %335 = vector.extract_strided_slice %312 {offsets = [0, 16], sizes = [17, 8], strides = [1, 1]} : vector<17x32xf32> to vector<17x8xf32>
    %336 = vector.extract_strided_slice %312 {offsets = [0, 24], sizes = [17, 8], strides = [1, 1]} : vector<17x32xf32> to vector<17x8xf32>
    %337 = vector.shape_cast %333 : vector<17x8xf32> to vector<1x17x8xf32>
    %338 = vector.shape_cast %334 : vector<17x8xf32> to vector<1x17x8xf32>
    %339 = vector.shape_cast %335 : vector<17x8xf32> to vector<1x17x8xf32>
    %340 = vector.shape_cast %336 : vector<17x8xf32> to vector<1x17x8xf32>
    %341 = tpu.concatenate %337, %338, %339, %340 in 0 : vector<1x17x8xf32>, vector<1x17x8xf32>, vector<1x17x8xf32>, vector<1x17x8xf32> -> vector<4x17x8xf32>
    %342 = arith.truncf %341 : vector<4x17x8xf32> to vector<4x17x8xbf16>
    %cst_100 = arith.constant dense<0.000000e+00> : vector<4x17x17xf32>
    %343 = tpu.matmul %322, %332, %cst_100 {dimension_numbers = #tpu.dot_dimension_numbers<[2], [2], [1], [1], [0, 0, 0, 1, 1, 1], [0], [0]>} : vector<4x17x8xbf16>, vector<4x17x8xbf16>, vector<4x17x17xf32> -> vector<4x17x17xf32>
    %cst_101 = arith.constant dense<0xFF800000> : vector<4x17xf32>
    %344 = vector.multi_reduction <maximumf>, %343, %cst_101 [2] : vector<4x17x17xf32> to vector<4x17xf32>
    %345 = vector.shape_cast %344 : vector<4x17xf32> to vector<4x17x1xf32>
    %346 = vector.broadcast %345 : vector<4x17x1xf32> to vector<4x17x17xf32>
    %347 = arith.subf %343, %346 : vector<4x17x17xf32>
    %348 = math.exp %347 : vector<4x17x17xf32>
    %cst_102 = arith.constant dense<0.000000e+00> : vector<4x17xf32>
    %349 = vector.multi_reduction <add>, %348, %cst_102 [2] : vector<4x17x17xf32> to vector<4x17xf32>
    %350 = vector.shape_cast %349 : vector<4x17xf32> to vector<4x17x1xf32>
    %351 = tpu.reciprocal %350 {approx = true} : vector<4x17x1xf32> -> vector<4x17x1xf32>
    %352 = vector.broadcast %351 : vector<4x17x1xf32> to vector<4x17x17xf32>
    %353 = arith.mulf %348, %352 : vector<4x17x17xf32>
    %354 = arith.truncf %353 : vector<4x17x17xf32> to vector<4x17x17xbf16>
    %cst_103 = arith.constant dense<0.000000e+00> : vector<4x17x8xf32>
    %355 = tpu.matmul %354, %342, %cst_103 {dimension_numbers = #tpu.dot_dimension_numbers<[2], [1], [1], [2], [0, 0, 0, 1, 1, 2], [0], [0]>} : vector<4x17x17xbf16>, vector<4x17x8xbf16>, vector<4x17x8xf32> -> vector<4x17x8xf32>
    %356 = arith.truncf %355 : vector<4x17x8xf32> to vector<4x17x8xbf16>
    %c0_104 = arith.constant 0 : index
    %c0_105 = arith.constant 0 : index
    %c0_106 = arith.constant 0 : index
    %357 = vector.load %arg25[%c0_104, %c0_105, %c0_106] : memref<4x8x32xbf16, #tpu.memory_space<vmem>>, vector<4x8x32xbf16>
    %cst_107 = arith.constant dense<0.000000e+00> : vector<4x17x32xf32>
    %358 = tpu.matmul %356, %357, %cst_107 {dimension_numbers = #tpu.dot_dimension_numbers<[2], [1], [1], [2], [0, 0, 0, 1, 1, 2], [0], [0]>} : vector<4x17x8xbf16>, vector<4x8x32xbf16>, vector<4x17x32xf32> -> vector<4x17x32xf32>
    %cst_108 = arith.constant dense<0.000000e+00> : vector<17x32xf32>
    %359 = vector.multi_reduction <add>, %358, %cst_108 [0] : vector<4x17x32xf32> to vector<17x32xf32>
    %360 = arith.addf %277, %359 : vector<17x32xf32>
    %c0_109 = arith.constant 0 : index
    %c0_110 = arith.constant 0 : index
    %361 = vector.load %arg26[%c0_109, %c0_110] : memref<1x32xf32, #tpu.memory_space<vmem>>, vector<1x32xf32>
    %362 = vector.broadcast %361 : vector<1x32xf32> to vector<17x32xf32>
    %363 = arith.addf %360, %362 : vector<17x32xf32>
    %c0_111 = arith.constant 0 : index
    %c0_112 = arith.constant 0 : index
    %364 = vector.load %arg29[%c0_111, %c0_112] : memref<1x32xf32, #tpu.memory_space<vmem>>, vector<1x32xf32>
    %c0_113 = arith.constant 0 : index
    %c0_114 = arith.constant 0 : index
    %365 = vector.load %arg30[%c0_113, %c0_114] : memref<1x32xf32, #tpu.memory_space<vmem>>, vector<1x32xf32>
    %cst_115 = arith.constant dense<0.000000e+00> : vector<17xf32>
    %366 = vector.multi_reduction <add>, %363, %cst_115 [1] : vector<17x32xf32> to vector<17xf32>
    %367 = vector.shape_cast %366 : vector<17xf32> to vector<17x1xf32>
    %cst_116 = arith.constant 3.200000e+01 : f32
    %368 = vector.broadcast %cst_116 : f32 to vector<17x1xf32>
    %369 = arith.divf %367, %368 : vector<17x1xf32>
    %370 = vector.broadcast %369 : vector<17x1xf32> to vector<17x32xf32>
    %371 = arith.subf %363, %370 : vector<17x32xf32>
    %372 = arith.mulf %371, %371 : vector<17x32xf32>
    %cst_117 = arith.constant dense<0.000000e+00> : vector<17xf32>
    %373 = vector.multi_reduction <add>, %372, %cst_117 [1] : vector<17x32xf32> to vector<17xf32>
    %374 = vector.shape_cast %373 : vector<17xf32> to vector<17x1xf32>
    %cst_118 = arith.constant 3.200000e+01 : f32
    %375 = vector.broadcast %cst_118 : f32 to vector<17x1xf32>
    %376 = arith.divf %374, %375 : vector<17x1xf32>
    %377 = vector.broadcast %369 : vector<17x1xf32> to vector<17x32xf32>
    %378 = arith.subf %363, %377 : vector<17x32xf32>
    %cst_119 = arith.constant 9.99999974E-6 : f32
    %379 = vector.broadcast %cst_119 : f32 to vector<17x1xf32>
    %380 = arith.addf %376, %379 : vector<17x1xf32>
    %381 = math.rsqrt %380 : vector<17x1xf32>
    %382 = vector.broadcast %381 : vector<17x1xf32> to vector<17x32xf32>
    %383 = arith.mulf %378, %382 : vector<17x32xf32>
    %384 = vector.broadcast %364 : vector<1x32xf32> to vector<17x32xf32>
    %385 = arith.mulf %383, %384 : vector<17x32xf32>
    %386 = vector.broadcast %365 : vector<1x32xf32> to vector<17x32xf32>
    %387 = arith.addf %385, %386 : vector<17x32xf32>
    %388 = arith.truncf %387 : vector<17x32xf32> to vector<17x32xbf16>
    %c0_120 = arith.constant 0 : index
    %c0_121 = arith.constant 0 : index
    %389 = vector.load %arg31[%c0_120, %c0_121] : memref<32x128xbf16, #tpu.memory_space<vmem>>, vector<32x128xbf16>
    %cst_122 = arith.constant dense<0.000000e+00> : vector<17x128xf32>
    %390 = tpu.matmul %388, %389, %cst_122 {dimension_numbers = #tpu.dot_dimension_numbers<[1], [0], [0], [1], [0, 0, 1, 1], [], []>} : vector<17x32xbf16>, vector<32x128xbf16>, vector<17x128xf32> -> vector<17x128xf32>
    %c0_123 = arith.constant 0 : index
    %c0_124 = arith.constant 0 : index
    %391 = vector.load %arg32[%c0_123, %c0_124] : memref<1x128xf32, #tpu.memory_space<vmem>>, vector<1x128xf32>
    %392 = vector.broadcast %391 : vector<1x128xf32> to vector<17x128xf32>
    %393 = arith.addf %390, %392 : vector<17x128xf32>
    %cst_125 = arith.constant 1.702000e+00 : f32
    %394 = vector.broadcast %cst_125 : f32 to vector<17x128xf32>
    %395 = arith.mulf %394, %393 : vector<17x128xf32>
    %396 = arith.negf %395 : vector<17x128xf32>
    %397 = math.exp %396 : vector<17x128xf32>
    %cst_126 = arith.constant 1.000000e+00 : f32
    %398 = vector.broadcast %cst_126 : f32 to vector<17x128xf32>
    %399 = arith.addf %398, %397 : vector<17x128xf32>
    %400 = arith.divf %398, %399 : vector<17x128xf32>
    %401 = arith.mulf %393, %400 : vector<17x128xf32>
    %402 = arith.truncf %401 : vector<17x128xf32> to vector<17x128xbf16>
    %c0_127 = arith.constant 0 : index
    %c0_128 = arith.constant 0 : index
    %403 = vector.load %arg33[%c0_127, %c0_128] : memref<128x32xbf16, #tpu.memory_space<vmem>>, vector<128x32xbf16>
    %cst_129 = arith.constant dense<0.000000e+00> : vector<17x32xf32>
    %404 = tpu.matmul %402, %403, %cst_129 {dimension_numbers = #tpu.dot_dimension_numbers<[1], [0], [0], [1], [0, 0, 1, 1], [], []>} : vector<17x128xbf16>, vector<128x32xbf16>, vector<17x32xf32> -> vector<17x32xf32>
    %c0_130 = arith.constant 0 : index
    %c0_131 = arith.constant 0 : index
    %405 = vector.load %arg34[%c0_130, %c0_131] : memref<1x32xf32, #tpu.memory_space<vmem>>, vector<1x32xf32>
    %406 = vector.broadcast %405 : vector<1x32xf32> to vector<17x32xf32>
    %407 = arith.addf %404, %406 : vector<17x32xf32>
    %408 = arith.addf %363, %407 : vector<17x32xf32>
    %c0_132 = arith.constant 0 : index
    %c0_133 = arith.constant 0 : index
    %c0_134 = arith.constant 0 : index
    %409 = vector.load %arg35[%c0_132, %c0_133, %c0_134] : memref<1x17x32xf32, #tpu.memory_space<vmem>>, vector<1x17x32xf32>
    %410 = vector.shape_cast %409 : vector<1x17x32xf32> to vector<17x32xf32>
    %411 = vector.shape_cast %408 : vector<17x32xf32> to vector<1x17x32xf32>
    tpu.vector_store %arg35[%c0_132, %c0_133, %c0_134], %411 {strides = array<i32>} : memref<1x17x32xf32, #tpu.memory_space<vmem>>, vector<1x17x32xf32>,
    return
  }
  func.func @transform_0(%arg0: i32) -> (i32, i32, i32) {
    %c0_i32 = arith.constant 0 : i32
    %c0_i32_0 = arith.constant 0 : i32
    %c0_i32_1 = arith.constant 0 : i32
    return %arg0, %c0_i32, %c0_i32_0 : i32, i32, i32
  }
  func.func @transform_1(%arg0: i32) -> (i32, i32, i32, i32) {
    %c0_i32 = arith.constant 0 : i32
    %c0_i32_0 = arith.constant 0 : i32
    %c0_i32_1 = arith.constant 0 : i32
    %c0_i32_2 = arith.constant 0 : i32
    return %arg0, %c0_i32, %c0_i32_0, %c0_i32_1 : i32, i32, i32, i32
  }
  func.func @transform_2(%arg0: i32) -> (i32, i32) {
    %c0_i32 = arith.constant 0 : i32
    %c0_i32_0 = arith.constant 0 : i32
    %c0_i32_1 = arith.constant 0 : i32
    return %c0_i32, %c0_i32_0 : i32, i32
  }
  func.func @transform_3(%arg0: i32) -> (i32, i32) {
    %c0_i32 = arith.constant 0 : i32
    %c0_i32_0 = arith.constant 0 : i32
    %c0_i32_1 = arith.constant 0 : i32
    return %c0_i32, %c0_i32_0 : i32, i32
  }
  func.func @transform_4(%arg0: i32) -> (i32, i32) {
    %c0_i32 = arith.constant 0 : i32
    %c0_i32_0 = arith.constant 0 : i32
    %c0_i32_1 = arith.constant 0 : i32
    return %c0_i32, %c0_i32_0 : i32, i32
  }
  func.func @transform_5(%arg0: i32) -> (i32, i32) {
    %c0_i32 = arith.constant 0 : i32
    %c0_i32_0 = arith.constant 0 : i32
    %c0_i32_1 = arith.constant 0 : i32
    return %c0_i32, %c0_i32_0 : i32, i32
  }
  func.func @transform_6(%arg0: i32) -> (i32, i32) {
    %c0_i32 = arith.constant 0 : i32
    %c0_i32_0 = arith.constant 0 : i32
    %c0_i32_1 = arith.constant 0 : i32
    return %c0_i32, %c0_i32_0 : i32, i32
  }
  func.func @transform_7(%arg0: i32) -> (i32, i32) {
    %c0_i32 = arith.constant 0 : i32
    %c0_i32_0 = arith.constant 0 : i32
    %c0_i32_1 = arith.constant 0 : i32
    return %c0_i32, %c0_i32_0 : i32, i32
  }
  func.func @transform_8(%arg0: i32) -> (i32, i32) {
    %c0_i32 = arith.constant 0 : i32
    %c0_i32_0 = arith.constant 0 : i32
    %c0_i32_1 = arith.constant 0 : i32
    return %c0_i32, %c0_i32_0 : i32, i32
  }
  func.func @transform_9(%arg0: i32) -> (i32, i32) {
    %c0_i32 = arith.constant 0 : i32
    %c0_i32_0 = arith.constant 0 : i32
    %c0_i32_1 = arith.constant 0 : i32
    return %c0_i32, %c0_i32_0 : i32, i32
  }
  func.func @transform_10(%arg0: i32) -> (i32, i32) {
    %c0_i32 = arith.constant 0 : i32
    %c0_i32_0 = arith.constant 0 : i32
    %c0_i32_1 = arith.constant 0 : i32
    return %c0_i32, %c0_i32_0 : i32, i32
  }
  func.func @transform_11(%arg0: i32) -> (i32, i32) {
    %c0_i32 = arith.constant 0 : i32
    %c0_i32_0 = arith.constant 0 : i32
    %c0_i32_1 = arith.constant 0 : i32
    return %c0_i32, %c0_i32_0 : i32, i32
  }
  func.func @transform_12(%arg0: i32) -> (i32, i32, i32) {
    %c0_i32 = arith.constant 0 : i32
    %c0_i32_0 = arith.constant 0 : i32
    %c0_i32_1 = arith.constant 0 : i32
    %c0_i32_2 = arith.constant 0 : i32
    return %c0_i32, %c0_i32_0, %c0_i32_1 : i32, i32, i32
  }
  func.func @transform_13(%arg0: i32) -> (i32, i32) {
    %c0_i32 = arith.constant 0 : i32
    %c0_i32_0 = arith.constant 0 : i32
    %c0_i32_1 = arith.constant 0 : i32
    return %c0_i32, %c0_i32_0 : i32, i32
  }
  func.func @transform_14(%arg0: i32) -> (i32, i32) {
    %c0_i32 = arith.constant 0 : i32
    %c0_i32_0 = arith.constant 0 : i32
    %c0_i32_1 = arith.constant 0 : i32
    return %c0_i32, %c0_i32_0 : i32, i32
  }
  func.func @transform_15(%arg0: i32) -> (i32, i32) {
    %c0_i32 = arith.constant 0 : i32
    %c0_i32_0 = arith.constant 0 : i32
    %c0_i32_1 = arith.constant 0 : i32
    return %c0_i32, %c0_i32_0 : i32, i32
  }
  func.func @transform_16(%arg0: i32) -> (i32, i32) {
    %c0_i32 = arith.constant 0 : i32
    %c0_i32_0 = arith.constant 0 : i32
    %c0_i32_1 = arith.constant 0 : i32
    return %c0_i32, %c0_i32_0 : i32, i32
  }
  func.func @transform_17(%arg0: i32) -> (i32, i32) {
    %c0_i32 = arith.constant 0 : i32
    %c0_i32_0 = arith.constant 0 : i32
    %c0_i32_1 = arith.constant 0 : i32
    return %c0_i32, %c0_i32_0 : i32, i32
  }
  func.func @transform_18(%arg0: i32) -> (i32, i32) {
    %c0_i32 = arith.constant 0 : i32
    %c0_i32_0 = arith.constant 0 : i32
    %c0_i32_1 = arith.constant 0 : i32
    return %c0_i32, %c0_i32_0 : i32, i32
  }
  func.func @transform_19(%arg0: i32) -> (i32, i32) {
    %c0_i32 = arith.constant 0 : i32
    %c0_i32_0 = arith.constant 0 : i32
    %c0_i32_1 = arith.constant 0 : i32
    return %c0_i32, %c0_i32_0 : i32, i32
  }
  func.func @transform_20(%arg0: i32) -> (i32, i32) {
    %c0_i32 = arith.constant 0 : i32
    %c0_i32_0 = arith.constant 0 : i32
    %c0_i32_1 = arith.constant 0 : i32
    return %c0_i32, %c0_i32_0 : i32, i32
  }
  func.func @transform_21(%arg0: i32) -> (i32, i32) {
    %c0_i32 = arith.constant 0 : i32
    %c0_i32_0 = arith.constant 0 : i32
    %c0_i32_1 = arith.constant 0 : i32
    return %c0_i32, %c0_i32_0 : i32, i32
  }
  func.func @transform_22(%arg0: i32) -> (i32, i32) {
    %c0_i32 = arith.constant 0 : i32
    %c0_i32_0 = arith.constant 0 : i32
    %c0_i32_1 = arith.constant 0 : i32
    return %c0_i32, %c0_i32_0 : i32, i32
  }
  func.func @transform_23(%arg0: i32) -> (i32, i32) {
    %c0_i32 = arith.constant 0 : i32
    %c0_i32_0 = arith.constant 0 : i32
    %c0_i32_1 = arith.constant 0 : i32
    return %c0_i32, %c0_i32_0 : i32, i32
  }
  func.func @transform_24(%arg0: i32) -> (i32, i32, i32) {
    %c0_i32 = arith.constant 0 : i32
    %c0_i32_0 = arith.constant 0 : i32
    %c0_i32_1 = arith.constant 0 : i32
    %c0_i32_2 = arith.constant 0 : i32
    return %c0_i32, %c0_i32_0, %c0_i32_1 : i32, i32, i32
  }
  func.func @transform_25(%arg0: i32) -> (i32, i32) {
    %c0_i32 = arith.constant 0 : i32
    %c0_i32_0 = arith.constant 0 : i32
    %c0_i32_1 = arith.constant 0 : i32
    return %c0_i32, %c0_i32_0 : i32, i32
  }
  func.func @transform_26(%arg0: i32) -> (i32, i32) {
    %c0_i32 = arith.constant 0 : i32
    %c0_i32_0 = arith.constant 0 : i32
    %c0_i32_1 = arith.constant 0 : i32
    return %c0_i32, %c0_i32_0 : i32, i32
  }
  func.func @transform_27(%arg0: i32) -> (i32, i32) {
    %c0_i32 = arith.constant 0 : i32
    %c0_i32_0 = arith.constant 0 : i32
    %c0_i32_1 = arith.constant 0 : i32
    return %c0_i32, %c0_i32_0 : i32, i32
  }
  func.func @transform_28(%arg0: i32) -> (i32, i32) {
    %c0_i32 = arith.constant 0 : i32
    %c0_i32_0 = arith.constant 0 : i32
    %c0_i32_1 = arith.constant 0 : i32
    return %c0_i32, %c0_i32_0 : i32, i32
  }
  func.func @transform_29(%arg0: i32) -> (i32, i32) {
    %c0_i32 = arith.constant 0 : i32
    %c0_i32_0 = arith.constant 0 : i32
    %c0_i32_1 = arith.constant 0 : i32
    return %c0_i32, %c0_i32_0 : i32, i32
  }
  func.func @transform_30(%arg0: i32) -> (i32, i32) {
    %c0_i32 = arith.constant 0 : i32
    %c0_i32_0 = arith.constant 0 : i32
    %c0_i32_1 = arith.constant 0 : i32
    return %c0_i32, %c0_i32_0 : i32, i32
  }
  func.func @transform_31(%arg0: i32) -> (i32, i32) {
    %c0_i32 = arith.constant 0 : i32
    %c0_i32_0 = arith.constant 0 : i32
    %c0_i32_1 = arith.constant 0 : i32
    return %c0_i32, %c0_i32_0 : i32, i32
  }
  func.func @transform_32(%arg0: i32) -> (i32, i32) {
    %c0_i32 = arith.constant 0 : i32
    %c0_i32_0 = arith.constant 0 : i32
    %c0_i32_1 = arith.constant 0 : i32
    return %c0_i32, %c0_i32_0 : i32, i32
  }
  func.func @transform_33(%arg0: i32) -> (i32, i32) {
    %c0_i32 = arith.constant 0 : i32
    %c0_i32_0 = arith.constant 0 : i32
    %c0_i32_1 = arith.constant 0 : i32
    return %c0_i32, %c0_i32_0 : i32, i32
  }
  func.func @transform_34(%arg0: i32) -> (i32, i32, i32) {
    %c0_i32 = arith.constant 0 : i32
    %c0_i32_0 = arith.constant 0 : i32
    %c0_i32_1 = arith.constant 0 : i32
    return %arg0, %c0_i32, %c0_i32_0 : i32, i32, i32
  }
}

module attributes {stable_mosaic.version = 11 : i64} {
  func.func @_layer_kernel(%arg0: i32, %arg1: memref<1x1x32xf32, #tpu.memory_space<vmem>>, %arg2: memref<1x12x3x32xf32, #tpu.memory_space<vmem>>, %arg3: memref<9x32xf32, #tpu.memory_space<vmem>>, %arg4: memref<1x32xf32, #tpu.memory_space<vmem>>, %arg5: memref<1x32xf32, #tpu.memory_space<vmem>>, %arg6: memref<1x32xf32, #tpu.memory_space<vmem>>, %arg7: memref<32x32xbf16, #tpu.memory_space<vmem>>, %arg8: memref<1x32xf32, #tpu.memory_space<vmem>>, %arg9: memref<1x32xf32, #tpu.memory_space<vmem>>, %arg10: memref<1x32xf32, #tpu.memory_space<vmem>>, %arg11: memref<32x96xbf16, #tpu.memory_space<vmem>>, %arg12: memref<1x96xf32, #tpu.memory_space<vmem>>, %arg13: memref<4x8x32xbf16, #tpu.memory_space<vmem>>, %arg14: memref<1x32xf32, #tpu.memory_space<vmem>>, %arg15: memref<1x32xf32, #tpu.memory_space<vmem>>, %arg16: memref<1x32xf32, #tpu.memory_space<vmem>>, %arg17: memref<1x32xf32, #tpu.memory_space<vmem>>, %arg18: memref<1x32xf32, #tpu.memory_space<vmem>>, %arg19: memref<32x128xbf16, #tpu.memory_space<vmem>>, %arg20: memref<1x128xf32, #tpu.memory_space<vmem>>, %arg21: memref<128x32xbf16, #tpu.memory_space<vmem>>, %arg22: memref<1x32xf32, #tpu.memory_space<vmem>>, %arg23: memref<32x96xbf16, #tpu.memory_space<vmem>>, %arg24: memref<1x96xf32, #tpu.memory_space<vmem>>, %arg25: memref<4x8x32xbf16, #tpu.memory_space<vmem>>, %arg26: memref<1x32xf32, #tpu.memory_space<vmem>>, %arg27: memref<1x32xf32, #tpu.memory_space<vmem>>, %arg28: memref<1x32xf32, #tpu.memory_space<vmem>>, %arg29: memref<1x32xf32, #tpu.memory_space<vmem>>, %arg30: memref<1x32xf32, #tpu.memory_space<vmem>>, %arg31: memref<32x128xbf16, #tpu.memory_space<vmem>>, %arg32: memref<1x128xf32, #tpu.memory_space<vmem>>, %arg33: memref<128x32xbf16, #tpu.memory_space<vmem>>, %arg34: memref<1x32xf32, #tpu.memory_space<vmem>>, %arg35: memref<1x5x32xf32, #tpu.memory_space<vmem>>) attributes {dimension_semantics = [#tpu.dimension_semantics<parallel>], iteration_bounds = array<i64: 2>, scalar_prefetch = 0 : i64, scratch_operands = 0 : i64, tpu.core_type = #tpu.core_type<tc>, window_params = [{transform_indices = @transform_0, window_bounds = array<i64: 1, 1, 32>}, {transform_indices = @transform_1, window_bounds = array<i64: 1, 12, 3, 32>}, {pipeline_mode = #tpu.pipeline_mode<synchronous>, transform_indices = @transform_2, window_bounds = array<i64: 9, 32>}, {pipeline_mode = #tpu.pipeline_mode<synchronous>, transform_indices = @transform_3, window_bounds = array<i64: 1, 32>}, {pipeline_mode = #tpu.pipeline_mode<synchronous>, transform_indices = @transform_4, window_bounds = array<i64: 1, 32>}, {pipeline_mode = #tpu.pipeline_mode<synchronous>, transform_indices = @transform_5, window_bounds = array<i64: 1, 32>}, {pipeline_mode = #tpu.pipeline_mode<synchronous>, transform_indices = @transform_6, window_bounds = array<i64: 32, 32>}, {pipeline_mode = #tpu.pipeline_mode<synchronous>, transform_indices = @transform_7, window_bounds = array<i64: 1, 32>}, {pipeline_mode = #tpu.pipeline_mode<synchronous>, transform_indices = @transform_8, window_bounds = array<i64: 1, 32>}, {pipeline_mode = #tpu.pipeline_mode<synchronous>, transform_indices = @transform_9, window_bounds = array<i64: 1, 32>}, {pipeline_mode = #tpu.pipeline_mode<synchronous>, transform_indices = @transform_10, window_bounds = array<i64: 32, 96>}, {pipeline_mode = #tpu.pipeline_mode<synchronous>, transform_indices = @transform_11, window_bounds = array<i64: 1, 96>}, {pipeline_mode = #tpu.pipeline_mode<synchronous>, transform_indices = @transform_12, window_bounds = array<i64: 4, 8, 32>}, {pipeline_mode = #tpu.pipeline_mode<synchronous>, transform_indices = @transform_13, window_bounds = array<i64: 1, 32>}, {pipeline_mode = #tpu.pipeline_mode<synchronous>, transform_indices = @transform_14, window_bounds = array<i64: 1, 32>}, {pipeline_mode = #tpu.pipeline_mode<synchronous>, transform_indices = @transform_15, window_bounds = array<i64: 1, 32>}, {pipeline_mode = #tpu.pipeline_mode<synchronous>, transform_indices = @transform_16, window_bounds = array<i64: 1, 32>}, {pipeline_mode = #tpu.pipeline_mode<synchronous>, transform_indices = @transform_17, window_bounds = array<i64: 1, 32>}, {pipeline_mode = #tpu.pipeline_mode<synchronous>, transform_indices = @transform_18, window_bounds = array<i64: 32, 128>}, {pipeline_mode = #tpu.pipeline_mode<synchronous>, transform_indices = @transform_19, window_bounds = array<i64: 1, 128>}, {pipeline_mode = #tpu.pipeline_mode<synchronous>, transform_indices = @transform_20, window_bounds = array<i64: 128, 32>}, {pipeline_mode = #tpu.pipeline_mode<synchronous>, transform_indices = @transform_21, window_bounds = array<i64: 1, 32>}, {pipeline_mode = #tpu.pipeline_mode<synchronous>, transform_indices = @transform_22, window_bounds = array<i64: 32, 96>}, {pipeline_mode = #tpu.pipeline_mode<synchronous>, transform_indices = @transform_23, window_bounds = array<i64: 1, 96>}, {pipeline_mode = #tpu.pipeline_mode<synchronous>, transform_indices = @transform_24, window_bounds = array<i64: 4, 8, 32>}, {pipeline_mode = #tpu.pipeline_mode<synchronous>, transform_indices = @transform_25, window_bounds = array<i64: 1, 32>}, {pipeline_mode = #tpu.pipeline_mode<synchronous>, transform_indices = @transform_26, window_bounds = array<i64: 1, 32>}, {pipeline_mode = #tpu.pipeline_mode<synchronous>, transform_indices = @transform_27, window_bounds = array<i64: 1, 32>}, {pipeline_mode = #tpu.pipeline_mode<synchronous>, transform_indices = @transform_28, window_bounds = array<i64: 1, 32>}, {pipeline_mode = #tpu.pipeline_mode<synchronous>, transform_indices = @transform_29, window_bounds = array<i64: 1, 32>}, {pipeline_mode = #tpu.pipeline_mode<synchronous>, transform_indices = @transform_30, window_bounds = array<i64: 32, 128>}, {pipeline_mode = #tpu.pipeline_mode<synchronous>, transform_indices = @transform_31, window_bounds = array<i64: 1, 128>}, {pipeline_mode = #tpu.pipeline_mode<synchronous>, transform_indices = @transform_32, window_bounds = array<i64: 128, 32>}, {pipeline_mode = #tpu.pipeline_mode<synchronous>, transform_indices = @transform_33, window_bounds = array<i64: 1, 32>}, {transform_indices = @transform_34, window_bounds = array<i64: 1, 5, 32>}]} {
    %c0 = arith.constant 0 : index
    %c0_0 = arith.constant 0 : index
    %c0_1 = arith.constant 0 : index
    %c0_2 = arith.constant 0 : index
    %0 = vector.load %arg2[%c0, %c0_0, %c0_1, %c0_2] : memref<1x12x3x32xf32, #tpu.memory_space<vmem>>, vector<1x12x3x32xf32>
    %1 = vector.shape_cast %0 : vector<1x12x3x32xf32> to vector<12x3x32xf32>
    %c0_3 = arith.constant 0 : index
    %c0_4 = arith.constant 0 : index
    %2 = vector.load %arg3[%c0_3, %c0_4] : memref<9x32xf32, #tpu.memory_space<vmem>>, vector<9x32xf32>
    %cst = arith.constant 0.000000e+00 : f32
    %3 = vector.broadcast %cst : f32 to vector<2x2x32xf32>
    %4 = vector.extract_strided_slice %1 {offsets = [9, 0, 0], sizes = [2, 2, 32], strides = [1, 1, 1]} : vector<12x3x32xf32> to vector<2x2x32xf32>
    %5 = vector.extract_strided_slice %2 {offsets = [0, 0], sizes = [1, 32], strides = [1, 1]} : vector<9x32xf32> to vector<1x32xf32>
    %6 = vector.shape_cast %5 : vector<1x32xf32> to vector<1x1x32xf32>
    %7 = vector.broadcast %6 : vector<1x1x32xf32> to vector<2x2x32xf32>
    %8 = arith.mulf %4, %7 : vector<2x2x32xf32>
    %9 = arith.addf %3, %8 : vector<2x2x32xf32>
    %10 = vector.extract_strided_slice %1 {offsets = [6, 1, 0], sizes = [2, 2, 32], strides = [1, 1, 1]} : vector<12x3x32xf32> to vector<2x2x32xf32>
    %11 = vector.extract_strided_slice %2 {offsets = [1, 0], sizes = [1, 32], strides = [1, 1]} : vector<9x32xf32> to vector<1x32xf32>
    %12 = vector.shape_cast %11 : vector<1x32xf32> to vector<1x1x32xf32>
    %13 = vector.broadcast %12 : vector<1x1x32xf32> to vector<2x2x32xf32>
    %14 = arith.mulf %10, %13 : vector<2x2x32xf32>
    %15 = arith.addf %9, %14 : vector<2x2x32xf32>
    %16 = vector.extract_strided_slice %1 {offsets = [9, 1, 0], sizes = [2, 2, 32], strides = [1, 1, 1]} : vector<12x3x32xf32> to vector<2x2x32xf32>
    %17 = vector.extract_strided_slice %2 {offsets = [2, 0], sizes = [1, 32], strides = [1, 1]} : vector<9x32xf32> to vector<1x32xf32>
    %18 = vector.shape_cast %17 : vector<1x32xf32> to vector<1x1x32xf32>
    %19 = vector.broadcast %18 : vector<1x1x32xf32> to vector<2x2x32xf32>
    %20 = arith.mulf %16, %19 : vector<2x2x32xf32>
    %21 = arith.addf %15, %20 : vector<2x2x32xf32>
    %22 = vector.extract_strided_slice %1 {offsets = [4, 0, 0], sizes = [2, 2, 32], strides = [1, 1, 1]} : vector<12x3x32xf32> to vector<2x2x32xf32>
    %23 = vector.extract_strided_slice %2 {offsets = [3, 0], sizes = [1, 32], strides = [1, 1]} : vector<9x32xf32> to vector<1x32xf32>
    %24 = vector.shape_cast %23 : vector<1x32xf32> to vector<1x1x32xf32>
    %25 = vector.broadcast %24 : vector<1x1x32xf32> to vector<2x2x32xf32>
    %26 = arith.mulf %22, %25 : vector<2x2x32xf32>
    %27 = arith.addf %21, %26 : vector<2x2x32xf32>
    %28 = vector.extract_strided_slice %1 {offsets = [1, 1, 0], sizes = [2, 2, 32], strides = [1, 1, 1]} : vector<12x3x32xf32> to vector<2x2x32xf32>
    %29 = vector.extract_strided_slice %2 {offsets = [4, 0], sizes = [1, 32], strides = [1, 1]} : vector<9x32xf32> to vector<1x32xf32>
    %30 = vector.shape_cast %29 : vector<1x32xf32> to vector<1x1x32xf32>
    %31 = vector.broadcast %30 : vector<1x1x32xf32> to vector<2x2x32xf32>
    %32 = arith.mulf %28, %31 : vector<2x2x32xf32>
    %33 = arith.addf %27, %32 : vector<2x2x32xf32>
    %34 = vector.extract_strided_slice %1 {offsets = [4, 1, 0], sizes = [2, 2, 32], strides = [1, 1, 1]} : vector<12x3x32xf32> to vector<2x2x32xf32>
    %35 = vector.extract_strided_slice %2 {offsets = [5, 0], sizes = [1, 32], strides = [1, 1]} : vector<9x32xf32> to vector<1x32xf32>
    %36 = vector.shape_cast %35 : vector<1x32xf32> to vector<1x1x32xf32>
    %37 = vector.broadcast %36 : vector<1x1x32xf32> to vector<2x2x32xf32>
    %38 = arith.mulf %34, %37 : vector<2x2x32xf32>
    %39 = arith.addf %33, %38 : vector<2x2x32xf32>
    %40 = vector.extract_strided_slice %1 {offsets = [10, 0, 0], sizes = [2, 2, 32], strides = [1, 1, 1]} : vector<12x3x32xf32> to vector<2x2x32xf32>
    %41 = vector.extract_strided_slice %2 {offsets = [6, 0], sizes = [1, 32], strides = [1, 1]} : vector<9x32xf32> to vector<1x32xf32>
    %42 = vector.shape_cast %41 : vector<1x32xf32> to vector<1x1x32xf32>
    %43 = vector.broadcast %42 : vector<1x1x32xf32> to vector<2x2x32xf32>
    %44 = arith.mulf %40, %43 : vector<2x2x32xf32>
    %45 = arith.addf %39, %44 : vector<2x2x32xf32>
    %46 = vector.extract_strided_slice %1 {offsets = [7, 1, 0], sizes = [2, 2, 32], strides = [1, 1, 1]} : vector<12x3x32xf32> to vector<2x2x32xf32>
    %47 = vector.extract_strided_slice %2 {offsets = [7, 0], sizes = [1, 32], strides = [1, 1]} : vector<9x32xf32> to vector<1x32xf32>
    %48 = vector.shape_cast %47 : vector<1x32xf32> to vector<1x1x32xf32>
    %49 = vector.broadcast %48 : vector<1x1x32xf32> to vector<2x2x32xf32>
    %50 = arith.mulf %46, %49 : vector<2x2x32xf32>
    %51 = arith.addf %45, %50 : vector<2x2x32xf32>
    %52 = vector.extract_strided_slice %1 {offsets = [10, 1, 0], sizes = [2, 2, 32], strides = [1, 1, 1]} : vector<12x3x32xf32> to vector<2x2x32xf32>
    %53 = vector.extract_strided_slice %2 {offsets = [8, 0], sizes = [1, 32], strides = [1, 1]} : vector<9x32xf32> to vector<1x32xf32>
    %54 = vector.shape_cast %53 : vector<1x32xf32> to vector<1x1x32xf32>
    %55 = vector.broadcast %54 : vector<1x1x32xf32> to vector<2x2x32xf32>
    %56 = arith.mulf %52, %55 : vector<2x2x32xf32>
    %57 = arith.addf %51, %56 : vector<2x2x32xf32>
    %58 = vector.extract_strided_slice %57 {offsets = [0, 0, 0], sizes = [1, 2, 32], strides = [1, 1, 1]} : vector<2x2x32xf32> to vector<1x2x32xf32>
    %59 = vector.shape_cast %58 : vector<1x2x32xf32> to vector<2x32xf32>
    %60 = vector.extract_strided_slice %57 {offsets = [1, 0, 0], sizes = [1, 2, 32], strides = [1, 1, 1]} : vector<2x2x32xf32> to vector<1x2x32xf32>
    %61 = vector.shape_cast %60 : vector<1x2x32xf32> to vector<2x32xf32>
    %62 = tpu.concatenate %59, %61 in 0 : vector<2x32xf32>, vector<2x32xf32> -> vector<4x32xf32>
    %c0_5 = arith.constant 0 : index
    %c0_6 = arith.constant 0 : index
    %63 = vector.load %arg4[%c0_5, %c0_6] : memref<1x32xf32, #tpu.memory_space<vmem>>, vector<1x32xf32>
    %64 = vector.broadcast %63 : vector<1x32xf32> to vector<4x32xf32>
    %65 = arith.addf %62, %64 : vector<4x32xf32>
    %c0_7 = arith.constant 0 : index
    %c0_8 = arith.constant 0 : index
    %66 = vector.load %arg5[%c0_7, %c0_8] : memref<1x32xf32, #tpu.memory_space<vmem>>, vector<1x32xf32>
    %c0_9 = arith.constant 0 : index
    %c0_10 = arith.constant 0 : index
    %67 = vector.load %arg6[%c0_9, %c0_10] : memref<1x32xf32, #tpu.memory_space<vmem>>, vector<1x32xf32>
    %cst_11 = arith.constant dense<0.000000e+00> : vector<4xf32>
    %68 = vector.multi_reduction <add>, %65, %cst_11 [1] : vector<4x32xf32> to vector<4xf32>
    %69 = vector.shape_cast %68 : vector<4xf32> to vector<4x1xf32>
    %cst_12 = arith.constant 3.200000e+01 : f32
    %70 = vector.broadcast %cst_12 : f32 to vector<4x1xf32>
    %71 = arith.divf %69, %70 : vector<4x1xf32>
    %72 = vector.broadcast %71 : vector<4x1xf32> to vector<4x32xf32>
    %73 = arith.subf %65, %72 : vector<4x32xf32>
    %74 = arith.mulf %73, %73 : vector<4x32xf32>
    %cst_13 = arith.constant dense<0.000000e+00> : vector<4xf32>
    %75 = vector.multi_reduction <add>, %74, %cst_13 [1] : vector<4x32xf32> to vector<4xf32>
    %76 = vector.shape_cast %75 : vector<4xf32> to vector<4x1xf32>
    %cst_14 = arith.constant 3.200000e+01 : f32
    %77 = vector.broadcast %cst_14 : f32 to vector<4x1xf32>
    %78 = arith.divf %76, %77 : vector<4x1xf32>
    %79 = vector.broadcast %71 : vector<4x1xf32> to vector<4x32xf32>
    %80 = arith.subf %65, %79 : vector<4x32xf32>
    %cst_15 = arith.constant 9.99999974E-6 : f32
    %81 = vector.broadcast %cst_15 : f32 to vector<4x1xf32>
    %82 = arith.addf %78, %81 : vector<4x1xf32>
    %83 = math.rsqrt %82 : vector<4x1xf32>
    %84 = vector.broadcast %83 : vector<4x1xf32> to vector<4x32xf32>
    %85 = arith.mulf %80, %84 : vector<4x32xf32>
    %86 = vector.broadcast %66 : vector<1x32xf32> to vector<4x32xf32>
    %87 = arith.mulf %85, %86 : vector<4x32xf32>
    %88 = vector.broadcast %67 : vector<1x32xf32> to vector<4x32xf32>
    %89 = arith.addf %87, %88 : vector<4x32xf32>
    %cst_16 = arith.constant dense<0.000000e+00> : vector<4xf32>
    %90 = vector.multi_reduction <add>, %89, %cst_16 [1] : vector<4x32xf32> to vector<4xf32>
    %91 = vector.shape_cast %90 : vector<4xf32> to vector<4x1xf32>
    %cst_17 = arith.constant 3.200000e+01 : f32
    %92 = vector.broadcast %cst_17 : f32 to vector<4x1xf32>
    %93 = arith.divf %91, %92 : vector<4x1xf32>
    %94 = arith.negf %93 : vector<4x1xf32>
    %95 = math.exp %94 : vector<4x1xf32>
    %cst_18 = arith.constant 1.000000e+00 : f32
    %96 = vector.broadcast %cst_18 : f32 to vector<4x1xf32>
    %97 = arith.addf %96, %95 : vector<4x1xf32>
    %98 = arith.divf %96, %97 : vector<4x1xf32>
    %99 = vector.broadcast %98 : vector<4x1xf32> to vector<4x32xf32>
    %100 = arith.mulf %89, %99 : vector<4x32xf32>
    %101 = arith.truncf %100 : vector<4x32xf32> to vector<4x32xbf16>
    %c0_19 = arith.constant 0 : index
    %c0_20 = arith.constant 0 : index
    %102 = vector.load %arg7[%c0_19, %c0_20] : memref<32x32xbf16, #tpu.memory_space<vmem>>, vector<32x32xbf16>
    %cst_21 = arith.constant dense<0.000000e+00> : vector<4x32xf32>
    %103 = tpu.matmul %101, %102, %cst_21 {dimension_numbers = #tpu.dot_dimension_numbers<[1], [0], [0], [1], [0, 0, 1, 1], [], []>} : vector<4x32xbf16>, vector<32x32xbf16>, vector<4x32xf32> -> vector<4x32xf32>
    %c0_22 = arith.constant 0 : index
    %c0_23 = arith.constant 0 : index
    %104 = vector.load %arg8[%c0_22, %c0_23] : memref<1x32xf32, #tpu.memory_space<vmem>>, vector<1x32xf32>
    %105 = vector.broadcast %104 : vector<1x32xf32> to vector<4x32xf32>
    %106 = arith.addf %103, %105 : vector<4x32xf32>
    %cst_24 = arith.constant 1.702000e+00 : f32
    %107 = vector.broadcast %cst_24 : f32 to vector<4x32xf32>
    %108 = arith.mulf %107, %106 : vector<4x32xf32>
    %109 = arith.negf %108 : vector<4x32xf32>
    %110 = math.exp %109 : vector<4x32xf32>
    %cst_25 = arith.constant 1.000000e+00 : f32
    %111 = vector.broadcast %cst_25 : f32 to vector<4x32xf32>
    %112 = arith.addf %111, %110 : vector<4x32xf32>
    %113 = arith.divf %111, %112 : vector<4x32xf32>
    %114 = arith.mulf %106, %113 : vector<4x32xf32>
    %c0_26 = arith.constant 0 : index
    %c0_27 = arith.constant 0 : index
    %115 = vector.load %arg9[%c0_26, %c0_27] : memref<1x32xf32, #tpu.memory_space<vmem>>, vector<1x32xf32>
    %c0_28 = arith.constant 0 : index
    %c0_29 = arith.constant 0 : index
    %116 = vector.load %arg10[%c0_28, %c0_29] : memref<1x32xf32, #tpu.memory_space<vmem>>, vector<1x32xf32>
    %cst_30 = arith.constant dense<0.000000e+00> : vector<4xf32>
    %117 = vector.multi_reduction <add>, %114, %cst_30 [1] : vector<4x32xf32> to vector<4xf32>
    %118 = vector.shape_cast %117 : vector<4xf32> to vector<4x1xf32>
    %cst_31 = arith.constant 3.200000e+01 : f32
    %119 = vector.broadcast %cst_31 : f32 to vector<4x1xf32>
    %120 = arith.divf %118, %119 : vector<4x1xf32>
    %121 = vector.broadcast %120 : vector<4x1xf32> to vector<4x32xf32>
    %122 = arith.subf %114, %121 : vector<4x32xf32>
    %123 = arith.mulf %122, %122 : vector<4x32xf32>
    %cst_32 = arith.constant dense<0.000000e+00> : vector<4xf32>
    %124 = vector.multi_reduction <add>, %123, %cst_32 [1] : vector<4x32xf32> to vector<4xf32>
    %125 = vector.shape_cast %124 : vector<4xf32> to vector<4x1xf32>
    %cst_33 = arith.constant 3.200000e+01 : f32
    %126 = vector.broadcast %cst_33 : f32 to vector<4x1xf32>
    %127 = arith.divf %125, %126 : vector<4x1xf32>
    %128 = vector.broadcast %120 : vector<4x1xf32> to vector<4x32xf32>
    %129 = arith.subf %114, %128 : vector<4x32xf32>
    %cst_34 = arith.constant 9.99999974E-6 : f32
    %130 = vector.broadcast %cst_34 : f32 to vector<4x1xf32>
    %131 = arith.addf %127, %130 : vector<4x1xf32>
    %132 = math.rsqrt %131 : vector<4x1xf32>
    %133 = vector.broadcast %132 : vector<4x1xf32> to vector<4x32xf32>
    %134 = arith.mulf %129, %133 : vector<4x32xf32>
    %135 = vector.broadcast %115 : vector<1x32xf32> to vector<4x32xf32>
    %136 = arith.mulf %134, %135 : vector<4x32xf32>
    %137 = vector.broadcast %116 : vector<1x32xf32> to vector<4x32xf32>
    %138 = arith.addf %136, %137 : vector<4x32xf32>
    %139 = arith.addf %89, %138 : vector<4x32xf32>
    %c0_35 = arith.constant 0 : index
    %c0_36 = arith.constant 0 : index
    %c0_37 = arith.constant 0 : index
    %140 = vector.load %arg1[%c0_35, %c0_36, %c0_37] : memref<1x1x32xf32, #tpu.memory_space<vmem>>, vector<1x1x32xf32>
    %141 = vector.shape_cast %140 : vector<1x1x32xf32> to vector<1x32xf32>
    %142 = tpu.concatenate %141, %139 in 0 : vector<1x32xf32>, vector<4x32xf32> -> vector<5x32xf32>
    %c0_38 = arith.constant 0 : index
    %c0_39 = arith.constant 0 : index
    %143 = vector.load %arg15[%c0_38, %c0_39] : memref<1x32xf32, #tpu.memory_space<vmem>>, vector<1x32xf32>
    %c0_40 = arith.constant 0 : index
    %c0_41 = arith.constant 0 : index
    %144 = vector.load %arg16[%c0_40, %c0_41] : memref<1x32xf32, #tpu.memory_space<vmem>>, vector<1x32xf32>
    %cst_42 = arith.constant dense<0.000000e+00> : vector<5xf32>
    %145 = vector.multi_reduction <add>, %142, %cst_42 [1] : vector<5x32xf32> to vector<5xf32>
    %146 = vector.shape_cast %145 : vector<5xf32> to vector<5x1xf32>
    %cst_43 = arith.constant 3.200000e+01 : f32
    %147 = vector.broadcast %cst_43 : f32 to vector<5x1xf32>
    %148 = arith.divf %146, %147 : vector<5x1xf32>
    %149 = vector.broadcast %148 : vector<5x1xf32> to vector<5x32xf32>
    %150 = arith.subf %142, %149 : vector<5x32xf32>
    %151 = arith.mulf %150, %150 : vector<5x32xf32>
    %cst_44 = arith.constant dense<0.000000e+00> : vector<5xf32>
    %152 = vector.multi_reduction <add>, %151, %cst_44 [1] : vector<5x32xf32> to vector<5xf32>
    %153 = vector.shape_cast %152 : vector<5xf32> to vector<5x1xf32>
    %cst_45 = arith.constant 3.200000e+01 : f32
    %154 = vector.broadcast %cst_45 : f32 to vector<5x1xf32>
    %155 = arith.divf %153, %154 : vector<5x1xf32>
    %156 = vector.broadcast %148 : vector<5x1xf32> to vector<5x32xf32>
    %157 = arith.subf %142, %156 : vector<5x32xf32>
    %cst_46 = arith.constant 9.99999974E-6 : f32
    %158 = vector.broadcast %cst_46 : f32 to vector<5x1xf32>
    %159 = arith.addf %155, %158 : vector<5x1xf32>
    %160 = math.rsqrt %159 : vector<5x1xf32>
    %161 = vector.broadcast %160 : vector<5x1xf32> to vector<5x32xf32>
    %162 = arith.mulf %157, %161 : vector<5x32xf32>
    %163 = vector.broadcast %143 : vector<1x32xf32> to vector<5x32xf32>
    %164 = arith.mulf %162, %163 : vector<5x32xf32>
    %165 = vector.broadcast %144 : vector<1x32xf32> to vector<5x32xf32>
    %166 = arith.addf %164, %165 : vector<5x32xf32>
    %167 = arith.truncf %166 : vector<5x32xf32> to vector<5x32xbf16>
    %c0_47 = arith.constant 0 : index
    %c0_48 = arith.constant 0 : index
    %168 = vector.load %arg11[%c0_47, %c0_48] : memref<32x96xbf16, #tpu.memory_space<vmem>>, vector<32x96xbf16>
    %cst_49 = arith.constant dense<0.000000e+00> : vector<5x96xf32>
    %169 = tpu.matmul %167, %168, %cst_49 {dimension_numbers = #tpu.dot_dimension_numbers<[1], [0], [0], [1], [0, 0, 1, 1], [], []>} : vector<5x32xbf16>, vector<32x96xbf16>, vector<5x96xf32> -> vector<5x96xf32>
    %c0_50 = arith.constant 0 : index
    %c0_51 = arith.constant 0 : index
    %170 = vector.load %arg12[%c0_50, %c0_51] : memref<1x96xf32, #tpu.memory_space<vmem>>, vector<1x96xf32>
    %171 = vector.broadcast %170 : vector<1x96xf32> to vector<5x96xf32>
    %172 = arith.addf %169, %171 : vector<5x96xf32>
    %173 = vector.extract_strided_slice %172 {offsets = [0, 0], sizes = [5, 32], strides = [1, 1]} : vector<5x96xf32> to vector<5x32xf32>
    %cst_52 = arith.constant 0.353553385 : f32
    %174 = vector.broadcast %cst_52 : f32 to vector<5x32xf32>
    %175 = arith.mulf %173, %174 : vector<5x32xf32>
    %176 = vector.extract_strided_slice %172 {offsets = [0, 32], sizes = [5, 32], strides = [1, 1]} : vector<5x96xf32> to vector<5x32xf32>
    %177 = vector.extract_strided_slice %172 {offsets = [0, 64], sizes = [5, 32], strides = [1, 1]} : vector<5x96xf32> to vector<5x32xf32>
    %178 = vector.extract_strided_slice %175 {offsets = [0, 0], sizes = [5, 8], strides = [1, 1]} : vector<5x32xf32> to vector<5x8xf32>
    %179 = vector.extract_strided_slice %175 {offsets = [0, 8], sizes = [5, 8], strides = [1, 1]} : vector<5x32xf32> to vector<5x8xf32>
    %180 = vector.extract_strided_slice %175 {offsets = [0, 16], sizes = [5, 8], strides = [1, 1]} : vector<5x32xf32> to vector<5x8xf32>
    %181 = vector.extract_strided_slice %175 {offsets = [0, 24], sizes = [5, 8], strides = [1, 1]} : vector<5x32xf32> to vector<5x8xf32>
    %182 = vector.shape_cast %178 : vector<5x8xf32> to vector<1x5x8xf32>
    %183 = vector.shape_cast %179 : vector<5x8xf32> to vector<1x5x8xf32>
    %184 = vector.shape_cast %180 : vector<5x8xf32> to vector<1x5x8xf32>
    %185 = vector.shape_cast %181 : vector<5x8xf32> to vector<1x5x8xf32>
    %186 = tpu.concatenate %182, %183, %184, %185 in 0 : vector<1x5x8xf32>, vector<1x5x8xf32>, vector<1x5x8xf32>, vector<1x5x8xf32> -> vector<4x5x8xf32>
    %187 = arith.truncf %186 : vector<4x5x8xf32> to vector<4x5x8xbf16>
    %188 = vector.extract_strided_slice %176 {offsets = [0, 0], sizes = [5, 8], strides = [1, 1]} : vector<5x32xf32> to vector<5x8xf32>
    %189 = vector.extract_strided_slice %176 {offsets = [0, 8], sizes = [5, 8], strides = [1, 1]} : vector<5x32xf32> to vector<5x8xf32>
    %190 = vector.extract_strided_slice %176 {offsets = [0, 16], sizes = [5, 8], strides = [1, 1]} : vector<5x32xf32> to vector<5x8xf32>
    %191 = vector.extract_strided_slice %176 {offsets = [0, 24], sizes = [5, 8], strides = [1, 1]} : vector<5x32xf32> to vector<5x8xf32>
    %192 = vector.shape_cast %188 : vector<5x8xf32> to vector<1x5x8xf32>
    %193 = vector.shape_cast %189 : vector<5x8xf32> to vector<1x5x8xf32>
    %194 = vector.shape_cast %190 : vector<5x8xf32> to vector<1x5x8xf32>
    %195 = vector.shape_cast %191 : vector<5x8xf32> to vector<1x5x8xf32>
    %196 = tpu.concatenate %192, %193, %194, %195 in 0 : vector<1x5x8xf32>, vector<1x5x8xf32>, vector<1x5x8xf32>, vector<1x5x8xf32> -> vector<4x5x8xf32>
    %197 = arith.truncf %196 : vector<4x5x8xf32> to vector<4x5x8xbf16>
    %198 = vector.extract_strided_slice %177 {offsets = [0, 0], sizes = [5, 8], strides = [1, 1]} : vector<5x32xf32> to vector<5x8xf32>
    %199 = vector.extract_strided_slice %177 {offsets = [0, 8], sizes = [5, 8], strides = [1, 1]} : vector<5x32xf32> to vector<5x8xf32>
    %200 = vector.extract_strided_slice %177 {offsets = [0, 16], sizes = [5, 8], strides = [1, 1]} : vector<5x32xf32> to vector<5x8xf32>
    %201 = vector.extract_strided_slice %177 {offsets = [0, 24], sizes = [5, 8], strides = [1, 1]} : vector<5x32xf32> to vector<5x8xf32>
    %202 = vector.shape_cast %198 : vector<5x8xf32> to vector<1x5x8xf32>
    %203 = vector.shape_cast %199 : vector<5x8xf32> to vector<1x5x8xf32>
    %204 = vector.shape_cast %200 : vector<5x8xf32> to vector<1x5x8xf32>
    %205 = vector.shape_cast %201 : vector<5x8xf32> to vector<1x5x8xf32>
    %206 = tpu.concatenate %202, %203, %204, %205 in 0 : vector<1x5x8xf32>, vector<1x5x8xf32>, vector<1x5x8xf32>, vector<1x5x8xf32> -> vector<4x5x8xf32>
    %207 = arith.truncf %206 : vector<4x5x8xf32> to vector<4x5x8xbf16>
    %cst_53 = arith.constant dense<0.000000e+00> : vector<4x5x5xf32>
    %208 = tpu.matmul %187, %197, %cst_53 {dimension_numbers = #tpu.dot_dimension_numbers<[2], [2], [1], [1], [0, 0, 0, 1, 1, 1], [0], [0]>} : vector<4x5x8xbf16>, vector<4x5x8xbf16>, vector<4x5x5xf32> -> vector<4x5x5xf32>
    %cst_54 = arith.constant dense<0xFF800000> : vector<4x5xf32>
    %209 = vector.multi_reduction <maximumf>, %208, %cst_54 [2] : vector<4x5x5xf32> to vector<4x5xf32>
    %210 = vector.shape_cast %209 : vector<4x5xf32> to vector<4x5x1xf32>
    %211 = vector.broadcast %210 : vector<4x5x1xf32> to vector<4x5x5xf32>
    %212 = arith.subf %208, %211 : vector<4x5x5xf32>
    %213 = math.exp %212 : vector<4x5x5xf32>
    %cst_55 = arith.constant dense<0.000000e+00> : vector<4x5xf32>
    %214 = vector.multi_reduction <add>, %213, %cst_55 [2] : vector<4x5x5xf32> to vector<4x5xf32>
    %215 = vector.shape_cast %214 : vector<4x5xf32> to vector<4x5x1xf32>
    %216 = tpu.reciprocal %215 {approx = true} : vector<4x5x1xf32> -> vector<4x5x1xf32>
    %217 = vector.broadcast %216 : vector<4x5x1xf32> to vector<4x5x5xf32>
    %218 = arith.mulf %213, %217 : vector<4x5x5xf32>
    %219 = arith.truncf %218 : vector<4x5x5xf32> to vector<4x5x5xbf16>
    %cst_56 = arith.constant dense<0.000000e+00> : vector<4x5x8xf32>
    %220 = tpu.matmul %219, %207, %cst_56 {dimension_numbers = #tpu.dot_dimension_numbers<[2], [1], [1], [2], [0, 0, 0, 1, 1, 2], [0], [0]>} : vector<4x5x5xbf16>, vector<4x5x8xbf16>, vector<4x5x8xf32> -> vector<4x5x8xf32>
    %221 = arith.truncf %220 : vector<4x5x8xf32> to vector<4x5x8xbf16>
    %c0_57 = arith.constant 0 : index
    %c0_58 = arith.constant 0 : index
    %c0_59 = arith.constant 0 : index
    %222 = vector.load %arg13[%c0_57, %c0_58, %c0_59] : memref<4x8x32xbf16, #tpu.memory_space<vmem>>, vector<4x8x32xbf16>
    %cst_60 = arith.constant dense<0.000000e+00> : vector<4x5x32xf32>
    %223 = tpu.matmul %221, %222, %cst_60 {dimension_numbers = #tpu.dot_dimension_numbers<[2], [1], [1], [2], [0, 0, 0, 1, 1, 2], [0], [0]>} : vector<4x5x8xbf16>, vector<4x8x32xbf16>, vector<4x5x32xf32> -> vector<4x5x32xf32>
    %cst_61 = arith.constant dense<0.000000e+00> : vector<5x32xf32>
    %224 = vector.multi_reduction <add>, %223, %cst_61 [0] : vector<4x5x32xf32> to vector<5x32xf32>
    %225 = arith.addf %142, %224 : vector<5x32xf32>
    %c0_62 = arith.constant 0 : index
    %c0_63 = arith.constant 0 : index
    %226 = vector.load %arg14[%c0_62, %c0_63] : memref<1x32xf32, #tpu.memory_space<vmem>>, vector<1x32xf32>
    %227 = vector.broadcast %226 : vector<1x32xf32> to vector<5x32xf32>
    %228 = arith.addf %225, %227 : vector<5x32xf32>
    %c0_64 = arith.constant 0 : index
    %c0_65 = arith.constant 0 : index
    %229 = vector.load %arg17[%c0_64, %c0_65] : memref<1x32xf32, #tpu.memory_space<vmem>>, vector<1x32xf32>
    %c0_66 = arith.constant 0 : index
    %c0_67 = arith.constant 0 : index
    %230 = vector.load %arg18[%c0_66, %c0_67] : memref<1x32xf32, #tpu.memory_space<vmem>>, vector<1x32xf32>
    %cst_68 = arith.constant dense<0.000000e+00> : vector<5xf32>
    %231 = vector.multi_reduction <add>, %228, %cst_68 [1] : vector<5x32xf32> to vector<5xf32>
    %232 = vector.shape_cast %231 : vector<5xf32> to vector<5x1xf32>
    %cst_69 = arith.constant 3.200000e+01 : f32
    %233 = vector.broadcast %cst_69 : f32 to vector<5x1xf32>
    %234 = arith.divf %232, %233 : vector<5x1xf32>
    %235 = vector.broadcast %234 : vector<5x1xf32> to vector<5x32xf32>
    %236 = arith.subf %228, %235 : vector<5x32xf32>
    %237 = arith.mulf %236, %236 : vector<5x32xf32>
    %cst_70 = arith.constant dense<0.000000e+00> : vector<5xf32>
    %238 = vector.multi_reduction <add>, %237, %cst_70 [1] : vector<5x32xf32> to vector<5xf32>
    %239 = vector.shape_cast %238 : vector<5xf32> to vector<5x1xf32>
    %cst_71 = arith.constant 3.200000e+01 : f32
    %240 = vector.broadcast %cst_71 : f32 to vector<5x1xf32>
    %241 = arith.divf %239, %240 : vector<5x1xf32>
    %242 = vector.broadcast %234 : vector<5x1xf32> to vector<5x32xf32>
    %243 = arith.subf %228, %242 : vector<5x32xf32>
    %cst_72 = arith.constant 9.99999974E-6 : f32
    %244 = vector.broadcast %cst_72 : f32 to vector<5x1xf32>
    %245 = arith.addf %241, %244 : vector<5x1xf32>
    %246 = math.rsqrt %245 : vector<5x1xf32>
    %247 = vector.broadcast %246 : vector<5x1xf32> to vector<5x32xf32>
    %248 = arith.mulf %243, %247 : vector<5x32xf32>
    %249 = vector.broadcast %229 : vector<1x32xf32> to vector<5x32xf32>
    %250 = arith.mulf %248, %249 : vector<5x32xf32>
    %251 = vector.broadcast %230 : vector<1x32xf32> to vector<5x32xf32>
    %252 = arith.addf %250, %251 : vector<5x32xf32>
    %253 = arith.truncf %252 : vector<5x32xf32> to vector<5x32xbf16>
    %c0_73 = arith.constant 0 : index
    %c0_74 = arith.constant 0 : index
    %254 = vector.load %arg19[%c0_73, %c0_74] : memref<32x128xbf16, #tpu.memory_space<vmem>>, vector<32x128xbf16>
    %cst_75 = arith.constant dense<0.000000e+00> : vector<5x128xf32>
    %255 = tpu.matmul %253, %254, %cst_75 {dimension_numbers = #tpu.dot_dimension_numbers<[1], [0], [0], [1], [0, 0, 1, 1], [], []>} : vector<5x32xbf16>, vector<32x128xbf16>, vector<5x128xf32> -> vector<5x128xf32>
    %c0_76 = arith.constant 0 : index
    %c0_77 = arith.constant 0 : index
    %256 = vector.load %arg20[%c0_76, %c0_77] : memref<1x128xf32, #tpu.memory_space<vmem>>, vector<1x128xf32>
    %257 = vector.broadcast %256 : vector<1x128xf32> to vector<5x128xf32>
    %258 = arith.addf %255, %257 : vector<5x128xf32>
    %cst_78 = arith.constant 1.702000e+00 : f32
    %259 = vector.broadcast %cst_78 : f32 to vector<5x128xf32>
    %260 = arith.mulf %259, %258 : vector<5x128xf32>
    %261 = arith.negf %260 : vector<5x128xf32>
    %262 = math.exp %261 : vector<5x128xf32>
    %cst_79 = arith.constant 1.000000e+00 : f32
    %263 = vector.broadcast %cst_79 : f32 to vector<5x128xf32>
    %264 = arith.addf %263, %262 : vector<5x128xf32>
    %265 = arith.divf %263, %264 : vector<5x128xf32>
    %266 = arith.mulf %258, %265 : vector<5x128xf32>
    %267 = arith.truncf %266 : vector<5x128xf32> to vector<5x128xbf16>
    %c0_80 = arith.constant 0 : index
    %c0_81 = arith.constant 0 : index
    %268 = vector.load %arg21[%c0_80, %c0_81] : memref<128x32xbf16, #tpu.memory_space<vmem>>, vector<128x32xbf16>
    %cst_82 = arith.constant dense<0.000000e+00> : vector<5x32xf32>
    %269 = tpu.matmul %267, %268, %cst_82 {dimension_numbers = #tpu.dot_dimension_numbers<[1], [0], [0], [1], [0, 0, 1, 1], [], []>} : vector<5x128xbf16>, vector<128x32xbf16>, vector<5x32xf32> -> vector<5x32xf32>
    %c0_83 = arith.constant 0 : index
    %c0_84 = arith.constant 0 : index
    %270 = vector.load %arg22[%c0_83, %c0_84] : memref<1x32xf32, #tpu.memory_space<vmem>>, vector<1x32xf32>
    %271 = vector.broadcast %270 : vector<1x32xf32> to vector<5x32xf32>
    %272 = arith.addf %269, %271 : vector<5x32xf32>
    %273 = arith.addf %228, %272 : vector<5x32xf32>
    %c0_85 = arith.constant 0 : index
    %c0_86 = arith.constant 0 : index
    %274 = vector.load %arg27[%c0_85, %c0_86] : memref<1x32xf32, #tpu.memory_space<vmem>>, vector<1x32xf32>
    %c0_87 = arith.constant 0 : index
    %c0_88 = arith.constant 0 : index
    %275 = vector.load %arg28[%c0_87, %c0_88] : memref<1x32xf32, #tpu.memory_space<vmem>>, vector<1x32xf32>
    %cst_89 = arith.constant dense<0.000000e+00> : vector<5xf32>
    %276 = vector.multi_reduction <add>, %273, %cst_89 [1] : vector<5x32xf32> to vector<5xf32>
    %277 = vector.shape_cast %276 : vector<5xf32> to vector<5x1xf32>
    %cst_90 = arith.constant 3.200000e+01 : f32
    %278 = vector.broadcast %cst_90 : f32 to vector<5x1xf32>
    %279 = arith.divf %277, %278 : vector<5x1xf32>
    %280 = vector.broadcast %279 : vector<5x1xf32> to vector<5x32xf32>
    %281 = arith.subf %273, %280 : vector<5x32xf32>
    %282 = arith.mulf %281, %281 : vector<5x32xf32>
    %cst_91 = arith.constant dense<0.000000e+00> : vector<5xf32>
    %283 = vector.multi_reduction <add>, %282, %cst_91 [1] : vector<5x32xf32> to vector<5xf32>
    %284 = vector.shape_cast %283 : vector<5xf32> to vector<5x1xf32>
    %cst_92 = arith.constant 3.200000e+01 : f32
    %285 = vector.broadcast %cst_92 : f32 to vector<5x1xf32>
    %286 = arith.divf %284, %285 : vector<5x1xf32>
    %287 = vector.broadcast %279 : vector<5x1xf32> to vector<5x32xf32>
    %288 = arith.subf %273, %287 : vector<5x32xf32>
    %cst_93 = arith.constant 9.99999974E-6 : f32
    %289 = vector.broadcast %cst_93 : f32 to vector<5x1xf32>
    %290 = arith.addf %286, %289 : vector<5x1xf32>
    %291 = math.rsqrt %290 : vector<5x1xf32>
    %292 = vector.broadcast %291 : vector<5x1xf32> to vector<5x32xf32>
    %293 = arith.mulf %288, %292 : vector<5x32xf32>
    %294 = vector.broadcast %274 : vector<1x32xf32> to vector<5x32xf32>
    %295 = arith.mulf %293, %294 : vector<5x32xf32>
    %296 = vector.broadcast %275 : vector<1x32xf32> to vector<5x32xf32>
    %297 = arith.addf %295, %296 : vector<5x32xf32>
    %298 = arith.truncf %297 : vector<5x32xf32> to vector<5x32xbf16>
    %c0_94 = arith.constant 0 : index
    %c0_95 = arith.constant 0 : index
    %299 = vector.load %arg23[%c0_94, %c0_95] : memref<32x96xbf16, #tpu.memory_space<vmem>>, vector<32x96xbf16>
    %cst_96 = arith.constant dense<0.000000e+00> : vector<5x96xf32>
    %300 = tpu.matmul %298, %299, %cst_96 {dimension_numbers = #tpu.dot_dimension_numbers<[1], [0], [0], [1], [0, 0, 1, 1], [], []>} : vector<5x32xbf16>, vector<32x96xbf16>, vector<5x96xf32> -> vector<5x96xf32>
    %c0_97 = arith.constant 0 : index
    %c0_98 = arith.constant 0 : index
    %301 = vector.load %arg24[%c0_97, %c0_98] : memref<1x96xf32, #tpu.memory_space<vmem>>, vector<1x96xf32>
    %302 = vector.broadcast %301 : vector<1x96xf32> to vector<5x96xf32>
    %303 = arith.addf %300, %302 : vector<5x96xf32>
    %304 = vector.extract_strided_slice %303 {offsets = [0, 0], sizes = [5, 32], strides = [1, 1]} : vector<5x96xf32> to vector<5x32xf32>
    %cst_99 = arith.constant 0.353553385 : f32
    %305 = vector.broadcast %cst_99 : f32 to vector<5x32xf32>
    %306 = arith.mulf %304, %305 : vector<5x32xf32>
    %307 = vector.extract_strided_slice %303 {offsets = [0, 32], sizes = [5, 32], strides = [1, 1]} : vector<5x96xf32> to vector<5x32xf32>
    %308 = vector.extract_strided_slice %303 {offsets = [0, 64], sizes = [5, 32], strides = [1, 1]} : vector<5x96xf32> to vector<5x32xf32>
    %309 = vector.extract_strided_slice %306 {offsets = [0, 0], sizes = [5, 8], strides = [1, 1]} : vector<5x32xf32> to vector<5x8xf32>
    %310 = vector.extract_strided_slice %306 {offsets = [0, 8], sizes = [5, 8], strides = [1, 1]} : vector<5x32xf32> to vector<5x8xf32>
    %311 = vector.extract_strided_slice %306 {offsets = [0, 16], sizes = [5, 8], strides = [1, 1]} : vector<5x32xf32> to vector<5x8xf32>
    %312 = vector.extract_strided_slice %306 {offsets = [0, 24], sizes = [5, 8], strides = [1, 1]} : vector<5x32xf32> to vector<5x8xf32>
    %313 = vector.shape_cast %309 : vector<5x8xf32> to vector<1x5x8xf32>
    %314 = vector.shape_cast %310 : vector<5x8xf32> to vector<1x5x8xf32>
    %315 = vector.shape_cast %311 : vector<5x8xf32> to vector<1x5x8xf32>
    %316 = vector.shape_cast %312 : vector<5x8xf32> to vector<1x5x8xf32>
    %317 = tpu.concatenate %313, %314, %315, %316 in 0 : vector<1x5x8xf32>, vector<1x5x8xf32>, vector<1x5x8xf32>, vector<1x5x8xf32> -> vector<4x5x8xf32>
    %318 = arith.truncf %317 : vector<4x5x8xf32> to vector<4x5x8xbf16>
    %319 = vector.extract_strided_slice %307 {offsets = [0, 0], sizes = [5, 8], strides = [1, 1]} : vector<5x32xf32> to vector<5x8xf32>
    %320 = vector.extract_strided_slice %307 {offsets = [0, 8], sizes = [5, 8], strides = [1, 1]} : vector<5x32xf32> to vector<5x8xf32>
    %321 = vector.extract_strided_slice %307 {offsets = [0, 16], sizes = [5, 8], strides = [1, 1]} : vector<5x32xf32> to vector<5x8xf32>
    %322 = vector.extract_strided_slice %307 {offsets = [0, 24], sizes = [5, 8], strides = [1, 1]} : vector<5x32xf32> to vector<5x8xf32>
    %323 = vector.shape_cast %319 : vector<5x8xf32> to vector<1x5x8xf32>
    %324 = vector.shape_cast %320 : vector<5x8xf32> to vector<1x5x8xf32>
    %325 = vector.shape_cast %321 : vector<5x8xf32> to vector<1x5x8xf32>
    %326 = vector.shape_cast %322 : vector<5x8xf32> to vector<1x5x8xf32>
    %327 = tpu.concatenate %323, %324, %325, %326 in 0 : vector<1x5x8xf32>, vector<1x5x8xf32>, vector<1x5x8xf32>, vector<1x5x8xf32> -> vector<4x5x8xf32>
    %328 = arith.truncf %327 : vector<4x5x8xf32> to vector<4x5x8xbf16>
    %329 = vector.extract_strided_slice %308 {offsets = [0, 0], sizes = [5, 8], strides = [1, 1]} : vector<5x32xf32> to vector<5x8xf32>
    %330 = vector.extract_strided_slice %308 {offsets = [0, 8], sizes = [5, 8], strides = [1, 1]} : vector<5x32xf32> to vector<5x8xf32>
    %331 = vector.extract_strided_slice %308 {offsets = [0, 16], sizes = [5, 8], strides = [1, 1]} : vector<5x32xf32> to vector<5x8xf32>
    %332 = vector.extract_strided_slice %308 {offsets = [0, 24], sizes = [5, 8], strides = [1, 1]} : vector<5x32xf32> to vector<5x8xf32>
    %333 = vector.shape_cast %329 : vector<5x8xf32> to vector<1x5x8xf32>
    %334 = vector.shape_cast %330 : vector<5x8xf32> to vector<1x5x8xf32>
    %335 = vector.shape_cast %331 : vector<5x8xf32> to vector<1x5x8xf32>
    %336 = vector.shape_cast %332 : vector<5x8xf32> to vector<1x5x8xf32>
    %337 = tpu.concatenate %333, %334, %335, %336 in 0 : vector<1x5x8xf32>, vector<1x5x8xf32>, vector<1x5x8xf32>, vector<1x5x8xf32> -> vector<4x5x8xf32>
    %338 = arith.truncf %337 : vector<4x5x8xf32> to vector<4x5x8xbf16>
    %cst_100 = arith.constant dense<0.000000e+00> : vector<4x5x5xf32>
    %339 = tpu.matmul %318, %328, %cst_100 {dimension_numbers = #tpu.dot_dimension_numbers<[2], [2], [1], [1], [0, 0, 0, 1, 1, 1], [0], [0]>} : vector<4x5x8xbf16>, vector<4x5x8xbf16>, vector<4x5x5xf32> -> vector<4x5x5xf32>
    %cst_101 = arith.constant dense<0xFF800000> : vector<4x5xf32>
    %340 = vector.multi_reduction <maximumf>, %339, %cst_101 [2] : vector<4x5x5xf32> to vector<4x5xf32>
    %341 = vector.shape_cast %340 : vector<4x5xf32> to vector<4x5x1xf32>
    %342 = vector.broadcast %341 : vector<4x5x1xf32> to vector<4x5x5xf32>
    %343 = arith.subf %339, %342 : vector<4x5x5xf32>
    %344 = math.exp %343 : vector<4x5x5xf32>
    %cst_102 = arith.constant dense<0.000000e+00> : vector<4x5xf32>
    %345 = vector.multi_reduction <add>, %344, %cst_102 [2] : vector<4x5x5xf32> to vector<4x5xf32>
    %346 = vector.shape_cast %345 : vector<4x5xf32> to vector<4x5x1xf32>
    %347 = tpu.reciprocal %346 {approx = true} : vector<4x5x1xf32> -> vector<4x5x1xf32>
    %348 = vector.broadcast %347 : vector<4x5x1xf32> to vector<4x5x5xf32>
    %349 = arith.mulf %344, %348 : vector<4x5x5xf32>
    %350 = arith.truncf %349 : vector<4x5x5xf32> to vector<4x5x5xbf16>
    %cst_103 = arith.constant dense<0.000000e+00> : vector<4x5x8xf32>
    %351 = tpu.matmul %350, %338, %cst_103 {dimension_numbers = #tpu.dot_dimension_numbers<[2], [1], [1], [2], [0, 0, 0, 1, 1, 2], [0], [0]>} : vector<4x5x5xbf16>, vector<4x5x8xbf16>, vector<4x5x8xf32> -> vector<4x5x8xf32>
    %352 = arith.truncf %351 : vector<4x5x8xf32> to vector<4x5x8xbf16>
    %c0_104 = arith.constant 0 : index
    %c0_105 = arith.constant 0 : index
    %c0_106 = arith.constant 0 : index
    %353 = vector.load %arg25[%c0_104, %c0_105, %c0_106] : memref<4x8x32xbf16, #tpu.memory_space<vmem>>, vector<4x8x32xbf16>
    %cst_107 = arith.constant dense<0.000000e+00> : vector<4x5x32xf32>
    %354 = tpu.matmul %352, %353, %cst_107 {dimension_numbers = #tpu.dot_dimension_numbers<[2], [1], [1], [2], [0, 0, 0, 1, 1, 2], [0], [0]>} : vector<4x5x8xbf16>, vector<4x8x32xbf16>, vector<4x5x32xf32> -> vector<4x5x32xf32>
    %cst_108 = arith.constant dense<0.000000e+00> : vector<5x32xf32>
    %355 = vector.multi_reduction <add>, %354, %cst_108 [0] : vector<4x5x32xf32> to vector<5x32xf32>
    %356 = arith.addf %273, %355 : vector<5x32xf32>
    %c0_109 = arith.constant 0 : index
    %c0_110 = arith.constant 0 : index
    %357 = vector.load %arg26[%c0_109, %c0_110] : memref<1x32xf32, #tpu.memory_space<vmem>>, vector<1x32xf32>
    %358 = vector.broadcast %357 : vector<1x32xf32> to vector<5x32xf32>
    %359 = arith.addf %356, %358 : vector<5x32xf32>
    %c0_111 = arith.constant 0 : index
    %c0_112 = arith.constant 0 : index
    %360 = vector.load %arg29[%c0_111, %c0_112] : memref<1x32xf32, #tpu.memory_space<vmem>>, vector<1x32xf32>
    %c0_113 = arith.constant 0 : index
    %c0_114 = arith.constant 0 : index
    %361 = vector.load %arg30[%c0_113, %c0_114] : memref<1x32xf32, #tpu.memory_space<vmem>>, vector<1x32xf32>
    %cst_115 = arith.constant dense<0.000000e+00> : vector<5xf32>
    %362 = vector.multi_reduction <add>, %359, %cst_115 [1] : vector<5x32xf32> to vector<5xf32>
    %363 = vector.shape_cast %362 : vector<5xf32> to vector<5x1xf32>
    %cst_116 = arith.constant 3.200000e+01 : f32
    %364 = vector.broadcast %cst_116 : f32 to vector<5x1xf32>
    %365 = arith.divf %363, %364 : vector<5x1xf32>
    %366 = vector.broadcast %365 : vector<5x1xf32> to vector<5x32xf32>
    %367 = arith.subf %359, %366 : vector<5x32xf32>
    %368 = arith.mulf %367, %367 : vector<5x32xf32>
    %cst_117 = arith.constant dense<0.000000e+00> : vector<5xf32>
    %369 = vector.multi_reduction <add>, %368, %cst_117 [1] : vector<5x32xf32> to vector<5xf32>
    %370 = vector.shape_cast %369 : vector<5xf32> to vector<5x1xf32>
    %cst_118 = arith.constant 3.200000e+01 : f32
    %371 = vector.broadcast %cst_118 : f32 to vector<5x1xf32>
    %372 = arith.divf %370, %371 : vector<5x1xf32>
    %373 = vector.broadcast %365 : vector<5x1xf32> to vector<5x32xf32>
    %374 = arith.subf %359, %373 : vector<5x32xf32>
    %cst_119 = arith.constant 9.99999974E-6 : f32
    %375 = vector.broadcast %cst_119 : f32 to vector<5x1xf32>
    %376 = arith.addf %372, %375 : vector<5x1xf32>
    %377 = math.rsqrt %376 : vector<5x1xf32>
    %378 = vector.broadcast %377 : vector<5x1xf32> to vector<5x32xf32>
    %379 = arith.mulf %374, %378 : vector<5x32xf32>
    %380 = vector.broadcast %360 : vector<1x32xf32> to vector<5x32xf32>
    %381 = arith.mulf %379, %380 : vector<5x32xf32>
    %382 = vector.broadcast %361 : vector<1x32xf32> to vector<5x32xf32>
    %383 = arith.addf %381, %382 : vector<5x32xf32>
    %384 = arith.truncf %383 : vector<5x32xf32> to vector<5x32xbf16>
    %c0_120 = arith.constant 0 : index
    %c0_121 = arith.constant 0 : index
    %385 = vector.load %arg31[%c0_120, %c0_121] : memref<32x128xbf16, #tpu.memory_space<vmem>>, vector<32x128xbf16>
    %cst_122 = arith.constant dense<0.000000e+00> : vector<5x128xf32>
    %386 = tpu.matmul %384, %385, %cst_122 {dimension_numbers = #tpu.dot_dimension_numbers<[1], [0], [0], [1], [0, 0, 1, 1], [], []>} : vector<5x32xbf16>, vector<32x128xbf16>, vector<5x128xf32> -> vector<5x128xf32>
    %c0_123 = arith.constant 0 : index
    %c0_124 = arith.constant 0 : index
    %387 = vector.load %arg32[%c0_123, %c0_124] : memref<1x128xf32, #tpu.memory_space<vmem>>, vector<1x128xf32>
    %388 = vector.broadcast %387 : vector<1x128xf32> to vector<5x128xf32>
    %389 = arith.addf %386, %388 : vector<5x128xf32>
    %cst_125 = arith.constant 1.702000e+00 : f32
    %390 = vector.broadcast %cst_125 : f32 to vector<5x128xf32>
    %391 = arith.mulf %390, %389 : vector<5x128xf32>
    %392 = arith.negf %391 : vector<5x128xf32>
    %393 = math.exp %392 : vector<5x128xf32>
    %cst_126 = arith.constant 1.000000e+00 : f32
    %394 = vector.broadcast %cst_126 : f32 to vector<5x128xf32>
    %395 = arith.addf %394, %393 : vector<5x128xf32>
    %396 = arith.divf %394, %395 : vector<5x128xf32>
    %397 = arith.mulf %389, %396 : vector<5x128xf32>
    %398 = arith.truncf %397 : vector<5x128xf32> to vector<5x128xbf16>
    %c0_127 = arith.constant 0 : index
    %c0_128 = arith.constant 0 : index
    %399 = vector.load %arg33[%c0_127, %c0_128] : memref<128x32xbf16, #tpu.memory_space<vmem>>, vector<128x32xbf16>
    %cst_129 = arith.constant dense<0.000000e+00> : vector<5x32xf32>
    %400 = tpu.matmul %398, %399, %cst_129 {dimension_numbers = #tpu.dot_dimension_numbers<[1], [0], [0], [1], [0, 0, 1, 1], [], []>} : vector<5x128xbf16>, vector<128x32xbf16>, vector<5x32xf32> -> vector<5x32xf32>
    %c0_130 = arith.constant 0 : index
    %c0_131 = arith.constant 0 : index
    %401 = vector.load %arg34[%c0_130, %c0_131] : memref<1x32xf32, #tpu.memory_space<vmem>>, vector<1x32xf32>
    %402 = vector.broadcast %401 : vector<1x32xf32> to vector<5x32xf32>
    %403 = arith.addf %400, %402 : vector<5x32xf32>
    %404 = arith.addf %359, %403 : vector<5x32xf32>
    %c0_132 = arith.constant 0 : index
    %c0_133 = arith.constant 0 : index
    %c0_134 = arith.constant 0 : index
    %405 = vector.load %arg35[%c0_132, %c0_133, %c0_134] : memref<1x5x32xf32, #tpu.memory_space<vmem>>, vector<1x5x32xf32>
    %406 = vector.shape_cast %405 : vector<1x5x32xf32> to vector<5x32xf32>
    %407 = vector.shape_cast %404 : vector<5x32xf32> to vector<1x5x32xf32>
    tpu.vector_store %arg35[%c0_132, %c0_133, %c0_134], %407 {strides = array<i32>} : memref<1x5x32xf32, #tpu.memory_space<vmem>>, vector<1x5x32xf32>,
    return
  }
  func.func @transform_0(%arg0: i32) -> (i32, i32, i32) {
    %c0_i32 = arith.constant 0 : i32
    %c0_i32_0 = arith.constant 0 : i32
    %c0_i32_1 = arith.constant 0 : i32
    return %arg0, %c0_i32, %c0_i32_0 : i32, i32, i32
  }
  func.func @transform_1(%arg0: i32) -> (i32, i32, i32, i32) {
    %c0_i32 = arith.constant 0 : i32
    %c0_i32_0 = arith.constant 0 : i32
    %c0_i32_1 = arith.constant 0 : i32
    %c0_i32_2 = arith.constant 0 : i32
    return %arg0, %c0_i32, %c0_i32_0, %c0_i32_1 : i32, i32, i32, i32
  }
  func.func @transform_2(%arg0: i32) -> (i32, i32) {
    %c0_i32 = arith.constant 0 : i32
    %c0_i32_0 = arith.constant 0 : i32
    %c0_i32_1 = arith.constant 0 : i32
    return %c0_i32, %c0_i32_0 : i32, i32
  }
  func.func @transform_3(%arg0: i32) -> (i32, i32) {
    %c0_i32 = arith.constant 0 : i32
    %c0_i32_0 = arith.constant 0 : i32
    %c0_i32_1 = arith.constant 0 : i32
    return %c0_i32, %c0_i32_0 : i32, i32
  }
  func.func @transform_4(%arg0: i32) -> (i32, i32) {
    %c0_i32 = arith.constant 0 : i32
    %c0_i32_0 = arith.constant 0 : i32
    %c0_i32_1 = arith.constant 0 : i32
    return %c0_i32, %c0_i32_0 : i32, i32
  }
  func.func @transform_5(%arg0: i32) -> (i32, i32) {
    %c0_i32 = arith.constant 0 : i32
    %c0_i32_0 = arith.constant 0 : i32
    %c0_i32_1 = arith.constant 0 : i32
    return %c0_i32, %c0_i32_0 : i32, i32
  }
  func.func @transform_6(%arg0: i32) -> (i32, i32) {
    %c0_i32 = arith.constant 0 : i32
    %c0_i32_0 = arith.constant 0 : i32
    %c0_i32_1 = arith.constant 0 : i32
    return %c0_i32, %c0_i32_0 : i32, i32
  }
  func.func @transform_7(%arg0: i32) -> (i32, i32) {
    %c0_i32 = arith.constant 0 : i32
    %c0_i32_0 = arith.constant 0 : i32
    %c0_i32_1 = arith.constant 0 : i32
    return %c0_i32, %c0_i32_0 : i32, i32
  }
  func.func @transform_8(%arg0: i32) -> (i32, i32) {
    %c0_i32 = arith.constant 0 : i32
    %c0_i32_0 = arith.constant 0 : i32
    %c0_i32_1 = arith.constant 0 : i32
    return %c0_i32, %c0_i32_0 : i32, i32
  }
  func.func @transform_9(%arg0: i32) -> (i32, i32) {
    %c0_i32 = arith.constant 0 : i32
    %c0_i32_0 = arith.constant 0 : i32
    %c0_i32_1 = arith.constant 0 : i32
    return %c0_i32, %c0_i32_0 : i32, i32
  }
  func.func @transform_10(%arg0: i32) -> (i32, i32) {
    %c0_i32 = arith.constant 0 : i32
    %c0_i32_0 = arith.constant 0 : i32
    %c0_i32_1 = arith.constant 0 : i32
    return %c0_i32, %c0_i32_0 : i32, i32
  }
  func.func @transform_11(%arg0: i32) -> (i32, i32) {
    %c0_i32 = arith.constant 0 : i32
    %c0_i32_0 = arith.constant 0 : i32
    %c0_i32_1 = arith.constant 0 : i32
    return %c0_i32, %c0_i32_0 : i32, i32
  }
  func.func @transform_12(%arg0: i32) -> (i32, i32, i32) {
    %c0_i32 = arith.constant 0 : i32
    %c0_i32_0 = arith.constant 0 : i32
    %c0_i32_1 = arith.constant 0 : i32
    %c0_i32_2 = arith.constant 0 : i32
    return %c0_i32, %c0_i32_0, %c0_i32_1 : i32, i32, i32
  }
  func.func @transform_13(%arg0: i32) -> (i32, i32) {
    %c0_i32 = arith.constant 0 : i32
    %c0_i32_0 = arith.constant 0 : i32
    %c0_i32_1 = arith.constant 0 : i32
    return %c0_i32, %c0_i32_0 : i32, i32
  }
  func.func @transform_14(%arg0: i32) -> (i32, i32) {
    %c0_i32 = arith.constant 0 : i32
    %c0_i32_0 = arith.constant 0 : i32
    %c0_i32_1 = arith.constant 0 : i32
    return %c0_i32, %c0_i32_0 : i32, i32
  }
  func.func @transform_15(%arg0: i32) -> (i32, i32) {
    %c0_i32 = arith.constant 0 : i32
    %c0_i32_0 = arith.constant 0 : i32
    %c0_i32_1 = arith.constant 0 : i32
    return %c0_i32, %c0_i32_0 : i32, i32
  }
  func.func @transform_16(%arg0: i32) -> (i32, i32) {
    %c0_i32 = arith.constant 0 : i32
    %c0_i32_0 = arith.constant 0 : i32
    %c0_i32_1 = arith.constant 0 : i32
    return %c0_i32, %c0_i32_0 : i32, i32
  }
  func.func @transform_17(%arg0: i32) -> (i32, i32) {
    %c0_i32 = arith.constant 0 : i32
    %c0_i32_0 = arith.constant 0 : i32
    %c0_i32_1 = arith.constant 0 : i32
    return %c0_i32, %c0_i32_0 : i32, i32
  }
  func.func @transform_18(%arg0: i32) -> (i32, i32) {
    %c0_i32 = arith.constant 0 : i32
    %c0_i32_0 = arith.constant 0 : i32
    %c0_i32_1 = arith.constant 0 : i32
    return %c0_i32, %c0_i32_0 : i32, i32
  }
  func.func @transform_19(%arg0: i32) -> (i32, i32) {
    %c0_i32 = arith.constant 0 : i32
    %c0_i32_0 = arith.constant 0 : i32
    %c0_i32_1 = arith.constant 0 : i32
    return %c0_i32, %c0_i32_0 : i32, i32
  }
  func.func @transform_20(%arg0: i32) -> (i32, i32) {
    %c0_i32 = arith.constant 0 : i32
    %c0_i32_0 = arith.constant 0 : i32
    %c0_i32_1 = arith.constant 0 : i32
    return %c0_i32, %c0_i32_0 : i32, i32
  }
  func.func @transform_21(%arg0: i32) -> (i32, i32) {
    %c0_i32 = arith.constant 0 : i32
    %c0_i32_0 = arith.constant 0 : i32
    %c0_i32_1 = arith.constant 0 : i32
    return %c0_i32, %c0_i32_0 : i32, i32
  }
  func.func @transform_22(%arg0: i32) -> (i32, i32) {
    %c0_i32 = arith.constant 0 : i32
    %c0_i32_0 = arith.constant 0 : i32
    %c0_i32_1 = arith.constant 0 : i32
    return %c0_i32, %c0_i32_0 : i32, i32
  }
  func.func @transform_23(%arg0: i32) -> (i32, i32) {
    %c0_i32 = arith.constant 0 : i32
    %c0_i32_0 = arith.constant 0 : i32
    %c0_i32_1 = arith.constant 0 : i32
    return %c0_i32, %c0_i32_0 : i32, i32
  }
  func.func @transform_24(%arg0: i32) -> (i32, i32, i32) {
    %c0_i32 = arith.constant 0 : i32
    %c0_i32_0 = arith.constant 0 : i32
    %c0_i32_1 = arith.constant 0 : i32
    %c0_i32_2 = arith.constant 0 : i32
    return %c0_i32, %c0_i32_0, %c0_i32_1 : i32, i32, i32
  }
  func.func @transform_25(%arg0: i32) -> (i32, i32) {
    %c0_i32 = arith.constant 0 : i32
    %c0_i32_0 = arith.constant 0 : i32
    %c0_i32_1 = arith.constant 0 : i32
    return %c0_i32, %c0_i32_0 : i32, i32
  }
  func.func @transform_26(%arg0: i32) -> (i32, i32) {
    %c0_i32 = arith.constant 0 : i32
    %c0_i32_0 = arith.constant 0 : i32
    %c0_i32_1 = arith.constant 0 : i32
    return %c0_i32, %c0_i32_0 : i32, i32
  }
  func.func @transform_27(%arg0: i32) -> (i32, i32) {
    %c0_i32 = arith.constant 0 : i32
    %c0_i32_0 = arith.constant 0 : i32
    %c0_i32_1 = arith.constant 0 : i32
    return %c0_i32, %c0_i32_0 : i32, i32
  }
  func.func @transform_28(%arg0: i32) -> (i32, i32) {
    %c0_i32 = arith.constant 0 : i32
    %c0_i32_0 = arith.constant 0 : i32
    %c0_i32_1 = arith.constant 0 : i32
    return %c0_i32, %c0_i32_0 : i32, i32
  }
  func.func @transform_29(%arg0: i32) -> (i32, i32) {
    %c0_i32 = arith.constant 0 : i32
    %c0_i32_0 = arith.constant 0 : i32
    %c0_i32_1 = arith.constant 0 : i32
    return %c0_i32, %c0_i32_0 : i32, i32
  }
  func.func @transform_30(%arg0: i32) -> (i32, i32) {
    %c0_i32 = arith.constant 0 : i32
    %c0_i32_0 = arith.constant 0 : i32
    %c0_i32_1 = arith.constant 0 : i32
    return %c0_i32, %c0_i32_0 : i32, i32
  }
  func.func @transform_31(%arg0: i32) -> (i32, i32) {
    %c0_i32 = arith.constant 0 : i32
    %c0_i32_0 = arith.constant 0 : i32
    %c0_i32_1 = arith.constant 0 : i32
    return %c0_i32, %c0_i32_0 : i32, i32
  }
  func.func @transform_32(%arg0: i32) -> (i32, i32) {
    %c0_i32 = arith.constant 0 : i32
    %c0_i32_0 = arith.constant 0 : i32
    %c0_i32_1 = arith.constant 0 : i32
    return %c0_i32, %c0_i32_0 : i32, i32
  }
  func.func @transform_33(%arg0: i32) -> (i32, i32) {
    %c0_i32 = arith.constant 0 : i32
    %c0_i32_0 = arith.constant 0 : i32
    %c0_i32_1 = arith.constant 0 : i32
    return %c0_i32, %c0_i32_0 : i32, i32
  }
  func.func @transform_34(%arg0: i32) -> (i32, i32, i32) {
    %c0_i32 = arith.constant 0 : i32
    %c0_i32_0 = arith.constant 0 : i32
    %c0_i32_1 = arith.constant 0 : i32
    return %arg0, %c0_i32, %c0_i32_0 : i32, i32, i32
  }
}

</mosaic_0001>

<bundles_post_ra>
// kernel: pyramid_transformer_forward.3
= control target key start
LH: loop header
LB: loop body
LE: loop exit
PB: predicated region body
PF: predicated region fallthrough
CT: control target
= control target key end

     0   :  { %s3961_s6 = smov 1   ;;  %s3962_s10 = smov 2   ;;  %s4551_s0 = inlined_call_operand.smem [shape: u32[35], index: -1, kind: input, shape index: {}] }
   0x1   :  { %s4011_s5 = sld [smem:[%s4551_s0]]   ;;  %s3963_s14 = smov 3  }
   0x2   :  { %s4016_s9 = sld [smem:[%s4551_s0 + %s3961_s6]]   ;;  %s3964_s18 = smov 4  }
   0x3   :  { %s4021_s13 = sld [smem:[%s4551_s0 + %s3962_s10]]   ;;  %s3965_s22 = smov 5  }
   0x4   :  { %s4026_s17 = sld [smem:[%s4551_s0 + %s3963_s14]]   ;;  %s3966_s26 = smov 6  }
   0x5   :  { %s4031_s21 = sld [smem:[%s4551_s0 + %s3964_s18]]   ;;  %s3967_s30 = smov 7  }
   0x6   :  { %s4036_s25 = sld [smem:[%s4551_s0 + %s3965_s22]]   ;;  %s3968_s4 = smov 8  }
   0x7   :  { %s4041_s29 = sld [smem:[%s4551_s0 + %s3966_s26]]   ;;  %s3969_s10 = smov 9  }
   0x8   :  { %s4046_s3 = sld [smem:[%s4551_s0 + %s3967_s30]]   ;;  %s3970_s15 = smov 10  }
   0x9   :  { %s4051_s8 = sld [smem:[%s4551_s0 + %s3968_s4]]   ;;  %s3971_s20 = smov 11  }
   0xa   :  { %s4056_s14 = sld [smem:[%s4551_s0 + %s3969_s10]]   ;;  %s3972_s26 = smov 12  }
   0xb   :  { %s4061_s19 = sld [smem:[%s4551_s0 + %s3970_s15]]   ;;  %s3973_s1 = smov 13  }
   0xc   :  { %s4066_s24 = sld [smem:[%s4551_s0 + %s3971_s20]]   ;;  %s3974_s7 = smov 14  }
   0xd   :  { %s4071_s30 = sld [smem:[%s4551_s0 + %s3972_s26]]   ;;  %s3975_s15 = smov 15  }
   0xe   :  { %s4076_s6 = sld [smem:[%s4551_s0 + %s3973_s1]]   ;;  %s3976_s22 = smov 16  }
   0xf   :  { %s4081_s12 = sld [smem:[%s4551_s0 + %s3974_s7]]   ;;  %s3977_s28 = smov 17  }
  0x10   :  { %s4086_s20 = sld [smem:[%s4551_s0 + %s3975_s15]]   ;;  %s3978_s7 = smov 18  }
  0x11   :  { %s4091_s27 = sld [smem:[%s4551_s0 + %s3976_s22]]   ;;  %s3979_s15 = smov 19  }
  0x12   :  { %s4096_s4 = sld [smem:[%s4551_s0 + %s3977_s28]]   ;;  %s3980_s22 = smov 20  }
  0x13   :  { %4560 = sst [smem:[#allocation2_spill]] %s4071_s30  ;;  %s3981_s28 = smov 21  }
  0x14   :  { %4561 = sst [smem:[#allocation3_spill]] %s4076_s6 }
  0x15   :  { %s4101_s6 = sld [smem:[%s4551_s0 + %s3978_s7]]   ;;  %s3982_s7 = smov 22  }
  0x16   :  { %s4106_s30 = sld [smem:[%s4551_s0 + %s3979_s15]]   ;;  %s3983_s15 = smov 23  }
  0x17   :  { %4562 = sst [smem:[#allocation4_spill]] %s4091_s27 }
  0x18   :  { %4563 = sst [smem:[#allocation5_spill]] %s4096_s4 }
  0x19   :  { %s4111_s27 = sld [smem:[%s4551_s0 + %s3980_s22]]   ;;  %s3984_s22 = smov 24  }
  0x1a   :  { %s4116_s4 = sld [smem:[%s4551_s0 + %s3981_s28]]   ;;  %s3985_s28 = smov 25  }
  0x1b   :  { %4564 = sst [smem:[#allocation6_spill]] %s4101_s6 }
  0x1c   :  { %4565 = sst [smem:[#allocation7_spill]] %s4106_s30 }
  0x1d   :  { %s4121_s6 = sld [smem:[%s4551_s0 + %s3982_s7]]   ;;  %s3986_s7 = smov 26  }
  0x1e   :  { %s4126_s30 = sld [smem:[%s4551_s0 + %s3983_s15]]   ;;  %s3987_s15 = smov 27  }
  0x1f   :  { %4566 = sst [smem:[#allocation8_spill]] %s4111_s27 }
  0x20   :  { %4567 = sst [smem:[#allocation9_spill]] %s4116_s4 }
  0x21   :  { %s4131_s27 = sld [smem:[%s4551_s0 + %s3984_s22]]   ;;  %s3988_s22 = smov 28  }
  0x22   :  { %s4136_s4 = sld [smem:[%s4551_s0 + %s3985_s28]]   ;;  %s3989_s28 = smov 29  }
  0x23   :  { %4568 = sst [smem:[#allocation10_spill]] %s4121_s6 }
  0x24   :  { %4569 = sst [smem:[#allocation11_spill]] %s4126_s30 }
  0x25   :  { %s4141_s6 = sld [smem:[%s4551_s0 + %s3986_s7]]   ;;  %s3990_s7 = smov 30  }
  0x26   :  { %s4146_s30 = sld [smem:[%s4551_s0 + %s3987_s15]]   ;;  %s3991_s15 = smov 31  }
  0x27   :  { %4570 = sst [smem:[#allocation12_spill]] %s4131_s27 }
  0x28   :  { %4571 = sst [smem:[#allocation13_spill]] %s4136_s4 }
  0x29   :  { %s4151_s27 = sld [smem:[%s4551_s0 + %s3988_s22]]   ;;  %s3992_s22 = smov 32  }
  0x2a   :  { %s4156_s4 = sld [smem:[%s4551_s0 + %s3989_s28]]   ;;  %s3993_s28 = smov 33  }
  0x2b   :  { %4572 = sst [smem:[#allocation14_spill]] %s4141_s6 }
  0x2c   :  { %4573 = sst [smem:[#allocation15_spill]] %s4146_s30 }
  0x2d   :  { %s4161_s6 = sld [smem:[%s4551_s0 + %s3990_s7]]   ;;  %s3994_s7 = smov 34  }
  0x2e   :  { %s4166_s30 = sld [smem:[%s4551_s0 + %s3991_s15]]   ;;  %s4183_s15 = smov 0  }
  0x2f   :  { %4574 = sst [smem:[#allocation16_spill]] %s4151_s27 }
  0x30   :  { %4575 = sst [smem:[#allocation17_spill]] %s4156_s4 }
  0x31   :  { %s4171_s27 = sld [smem:[%s4551_s0 + %s3992_s22]]  }
  0x32   :  { %s4176_s4 = sld [smem:[%s4551_s0 + %s3993_s28]]  }
  0x33   :  { %4576 = sst [smem:[#allocation18_spill]] %s4161_s6 }
  0x34   :  { %s4181_s6 = sld [smem:[%s4551_s0 + %s3994_s7]]  }
  0x35 LB: > { %s3420_s16 = sadd.s32 4294967295, %s3959_s15   ;;  %p3424_p0 = scmp.ge.s32.totalorder %s3959_s15, 1  ;;  %s3959_s15 = sphi %s4183_s15, %s79_s15  }
  0x36   : > { %p955_p1 = scmp.lt.s32.totalorder %s3959_s15, 3 }
  0x38   : > { %p956_p2 = pnand %p3424_p0, %p955_p1 }
  0x39   : > { %p1043_p3 = scmp.lt.s32.totalorder (!%p956_p2), %s3420_s16, 1  ;;  %s3997_s23 = smov (!%p956_p2), 112  }
  0x3a   : > { %959 = sbr.rel (%p956_p2) target bundleno = 5921 (0x1721), region = 156  ;;  %s3998_s26 = smov (!%p956_p2), 120  }
  0x3b   : > { %s3999_s28 = smov (!%p956_p2), 104   ;;  %s4000_s1 = smov (!%p956_p2), 96  }
  0x3c   : > { %s4558_s2 = smov (!%p956_p2), 64   ;;  %s4577_s7 = sld [smem:[#allocation2_spill]] (!%p956_p2) }
  0x3d   : > { %s4578_s10 = sld [smem:[#allocation3_spill]] (!%p956_p2) }
  0x3e   : > { %s4579_s11 = sld [smem:[#allocation6_spill]] (!%p956_p2) }
  0x3f   : > { %v1068_v0 = vlaneseq  ;;  %s4596_s16 = smov (!%p1043_p3, %s3420_s16), 1  ;;  %v1066_v2 = vld [vmem:[%s4021_s13] sm:$0xff]  ;;  %v3427_v33 = vld [vmem:[%s4021_s13 + $0x8] ss:$0 sm:$0xff]  ;;  %vm1179_vm0 = vcmask 1041408   ;;  %vm1191_vm1 = vcmask 257024  }
  0x40   : > { %s3816_s0 = smul.u32 48, %s4596_s16  ;;  %vm3996_vm2 = vmmov 0   ;;  %vm1255_vm3 = vcmask 261120   ;;  %s1045_s22 = scalar_lea.vmem %s4011_s5, %s4596_s16  ;;  %vm1341_vm4 = vcmask 1040384   ;;  %vm1345_vm5 = vcmask 258048  }
  0x41   : > { %v1069_v1 = vshrl.u32 %v1068_v0, 7  ;;  %vm1472_vm6 = vcmask 64512   ;;  %vm1666_vm7 = vcmask 36864   ;;  %vm1721_vm8 = vcmask 1042432  }
  0x42   : > { %s4196_s18 = scalar_lea.vmem %s4016_s9, %s3816_s0  ;;  %vm1717_vm9 = vcmask 39936   ;;  %vm1922_vm10 = vcmask 1043456   ;;  %s4580_s0 = sld [smem:[#allocation4_spill]] }
  0x43   : > { %v1070_v3 = vsub.s32 0, %v1069_v1  ;;  %v1078_v4 = vsub.s32 1, %v1069_v1  ;;  %v1092_v5 = vsub.s32 2, %v1069_v1  ;;  %v1106_v6 = vsub.s32 3, %v1069_v1  ;;  %v1056_v12 = vld [vmem:[%s4196_s18 + $0x4] sm:$0x7] }
  0x44   : > { %v1114_v7 = vsub.s32 4, %v1069_v1  ;;  %v1128_v8 = vsub.s32 5, %v1069_v1  ;;  %v1142_v14 = vsub.s32 6, %v1069_v1  ;;  %v1150_v15 = vsub.s32 7, %v1069_v1  ;;  %v1057_v16 = vld [vmem:[%s4196_s18 + $0x8] sm:$0x7] }
  0x45   : > { %v1071_v9 = vrot.slane %v1066_v2, %v1070_v3  ;;  %v1079_v10 = vrot.slane %v1066_v2, %v1078_v4  ;;  %v1093_v11 = vrot.slane %v1066_v2, %v1092_v5  ;;  %v1060_v17 = vld [vmem:[%s4196_s18 + $0x18] sm:$0x7]  ;;  %v1061_v18 = vld [vmem:[%s4196_s18 + $0x1c] sm:$0x7]  ;;  %v1058_v20 = vld [vmem:[%s4196_s18 + $0x10] sm:$0x7]  ;;  %v1107_v25 = vrot.slane %v1066_v2, %v1106_v6 }
  0x46   : > { %v1115_v13 = vrot.slane %v1066_v2, %v1114_v7  ;;  %v1129_v19 = vrot.slane %v1066_v2, %v1128_v8  ;;  %v1063_v21 = vld [vmem:[%s4196_s18 + $0x24] sm:$0x7]  ;;  %v1064_v22 = vld [vmem:[%s4196_s18 + $0x28] sm:$0x7]  ;;  %v1059_v27 = vld [vmem:[%s4196_s18 + $0x14] sm:$0x7]  ;;  %v1151_v37 = vrot.slane %v1066_v2, %v1150_v15  ;;  %v1143_v49 = vrot.slane %v1066_v2, %v1142_v14 }
  0x47   : > { %v1080_v23 = vmul.f32 %v1079_v10, %v1060_v17  ;;  %v1081_v24 = vmul.f32 %v1079_v10, %v1061_v18  ;;  %v1072_v28 = vmul.f32 %v1071_v9, %v1063_v21  ;;  %v1073_v29 = vmul.f32 %v1071_v9, %v1064_v22  ;;  %v1062_v32 = vld [vmem:[%s4196_s18 + $0x20] sm:$0x7]  ;;  %v1065_v42 = vld [vmem:[%s4196_s18 + $0x2c] sm:$0x7]  ;;  %s4581_s18 = sld [smem:[#allocation5_spill]] }
  0x48   : > { %v1116_v26 = vmul.f32 %v1115_v13, %v1056_v12  ;;  %v1094_v30 = vmul.f32 %v1093_v11, %v1063_v21  ;;  %v1095_v31 = vmul.f32 %v1093_v11, %v1064_v22  ;;  %v1117_v36 = vmul.f32 %v1115_v13, %v1057_v16  ;;  %v3428_v13 = vld [vmem:[%s4026_s17] ss:$0 sm:$0xff] }
  0x49   : > { %v1084_v34 = vrot.slane %v1080_v23, 1  ;;  %v1085_v35 = vrot.slane %v1081_v24, 1  ;;  %v1130_v40 = vmul.f32 %v1129_v19, %v1058_v20  ;;  %v1131_v41 = vmul.f32 %v1129_v19, %v1059_v27 }
  0x4a   : > { %v1098_v38 = vrot.slane %v1094_v30, 1  ;;  %v1099_v39 = vrot.slane %v1095_v31, 1  ;;  %v1108_v45 = vmul.f32 %v1107_v25, %v1058_v20  ;;  %v1109_v46 = vmul.f32 %v1107_v25, %v1059_v27 }
  0x4b   : > { %v1088_v43 = vadd.f32 %v1084_v34, %v1072_v28  ;;  %v1089_v44 = vadd.f32 %v1085_v35, %v1073_v29  ;;  %v1120_v47 = vrot.slane %v1116_v26, 1  ;;  %v1121_v48 = vrot.slane %v1117_v36, 1  ;;  %v3429_v26 = vld [vmem:[%s4031_s21] ss:$0 sm:$0xff] }
  0x4c   : > { %v1152_v50 = vmul.f32 %v1151_v37, %v1061_v18  ;;  %v1153_v53 = vmul.f32 %v1151_v37, %v1062_v32  ;;  %v1166_v54 = vmul.f32 %v3427_v33, %v1064_v22  ;;  %v1134_v55 = vrot.slane %v1130_v40, 1  ;;  %v3430_v28 = vld [vmem:[%s4036_s25] ss:$0 sm:$0xff]  ;;  %v3867_v32 = vld [vmem:[%s4041_s29 + $0x8] sm:$0xff]  }
  0x4d   : > { %v1102_v51 = vadd.f32 %v1098_v38, %v1088_v43  ;;  %v1103_v52 = vadd.f32 %v1099_v39, %v1089_v44  ;;  %v1135_v56 = vrot.slane %v1131_v41, 1  ;;  %v1167_v57 = vmul.f32 %v3427_v33, %v1065_v42  ;;  %v3868_v34 = vld [vmem:[%s4041_s29] sm:$0xff]  }
  0x4e   : > { %v1156_v60 = vrot.slane %v1152_v50, 1  ;;  %v1157_v61 = vrot.slane %v1153_v53, 1  ;;  %v1170_v62 = vrot.slane %v1166_v54, 1  ;;  %v1144_v3 = vmul.f32 %v1143_v49, %v1064_v22  ;;  %v3432_v43 = vld [vmem:[%s4046_s3] ss:$0 sm:$0xff] }
  0x4f   : > { %v1110_v58 = vadd.f32 %v1108_v45, %v1102_v51  ;;  %v1111_v59 = vadd.f32 %v1109_v46, %v1103_v52  ;;  %v1171_v63 = vrot.slane %v1167_v57, 1  ;;  %v1145_v4 = vmul.f32 %v1143_v49, %v1065_v42 }
  0x50   : > { %v3995_v33 = vmov 0.0  }
  0x51   : > { %v1124_v0 = vadd.f32 %v1120_v47, %v1110_v58  ;;  %v1125_v1 = vadd.f32 %v1121_v48, %v1111_v59  ;;  %3592 = vmatprep.subr.bf16.mxu0 %v3995_v33  ;;  %3596 = vmatprep.mubr.msk.bf16.mxu0 %vm3996_vm2, %v3995_v33 }
  0x52   : > { %3593 = vmatpush3.bf16.msra.mxu0 %v3867_v32  ;;  %3614 = vmatprep.subr.bf16.mxu1 %v3995_v33 }
  0x53   : > { %v1138_v2 = vadd.f32 %v1134_v55, %v1124_v0  ;;  %v1139_v5 = vadd.f32 %v1135_v56, %v1125_v1  ;;  %3594 = vmatprep.subr.bf16.mxu0 %v3995_v33  ;;  %3616 = vmatprep.mubr.msk.bf16.mxu1 %vm3996_vm2, %v3995_v33  ;;  %v3437_v1 = vld [vmem:[%s4051_s8] ss:$0 sm:$0xff] }
  0x55   : > { %v1146_v6 = vadd.f32 %v1144_v3, %v1138_v2  ;;  %v1147_v7 = vadd.f32 %v1145_v4, %v1139_v5  ;;  %v3438_v4 = vld [vmem:[%s4056_s14] ss:$0 sm:$0xff] }
  0x56   : > { %3595 = vmatpush3.bf16.msra.mxu0 %v3868_v34 }
  0x57   : > { %v1160_v8 = vadd.f32 %v1156_v60, %v1146_v6  ;;  %v1161_v9 = vadd.f32 %v1157_v61, %v1147_v7  ;;  %3600 = vmatprep.subr.bf16.mxu0 %v3995_v33  ;;  %v1337_v7 = vld [vmem:[%s1045_s22] sm:$0x1]  ;;  %s4582_s22 = sld [smem:[#allocation8_spill]] }
  0x59   : > { %v1174_v10 = vadd.f32 %v1170_v62, %v1160_v8  ;;  %v1175_v11 = vadd.f32 %v1171_v63, %v1161_v9 }
  0x5b   : > { %v1177_v12 = vrot.slane %v1175_v11, 6 }
  0x5d   : > { %v1180_v14 = vsel %vm1179_vm0, %v1174_v10, %v1177_v12 }
  0x5e   : > { %v1188_v15 = vadd.f32 %v3428_v13, %v1180_v14 }
  0x60   : > { %v1192_v16 = vsel %vm1191_vm1, %v1188_v15, 0.0 }
  0x61   : > { %1193 = vadd.xlane.f32.xlu0 %v1192_v16  ;;  %v3869_v16 = vld [vmem:[%s4061_s19 + $0x8] sm:$0xff]  }
  0xea   : > { %v1194_v17 = vpop.xlane.xlu0 %1193 }
  0xeb   : > { %v1196_v18 = vmul.f32 0.03125, %v1194_v17  ;;  %v3870_v17 = vld [vmem:[%s4061_s19] sm:$0xff]  }
  0xed   : > { %v1197_v19 = vsub.f32 %v1188_v15, %v1196_v18 }
  0xef   : > { %v1198_v20 = vmul.f32 %v1197_v19, %v1197_v19 }
  0xf1   : > { %v1199_v21 = vsel %vm1191_vm1, %v1198_v20, 0.0 }
  0xf2   : > { %1200 = vadd.xlane.f32.xlu0 %v1199_v21 }
 0x17b   : > { %v1201_v22 = vpop.xlane.xlu0 %1200 }
 0x17c   : > { %v1202_v23 = vmul.f32 0.03125, %v1201_v22  ;;  %v3439_v22 = vld [vmem:[%s4081_s12] ss:$0 sm:$0xff] }
 0x17e   : > { %v1203_v24 = vadd.f32 1e-05, %v1202_v23 }
 0x180   : > { %3893 = vrsqrt.f32 %v1203_v24  ;;  %v3440_v24 = vld [vmem:[%s4086_s20] ss:$0 sm:$0xff] }
 0x18d   : > { %v3894_v25 = vpop.eup %3893 }
 0x18e   : > { %v1205_v27 = vmul.f32 %v3894_v25, %v1197_v19 }
 0x190   : > { %v1212_v29 = vmul.f32 %v3429_v26, %v1205_v27 }
 0x192   : > { %v1219_v30 = vadd.f32 %v3430_v28, %v1212_v29  ;;  %v3441_v28 = vld [vmem:[%s4066_s24] ss:$0 sm:$0xff] }
 0x194   : > { %v1220_v31 = vsel %vm1191_vm1, %v1219_v30, 0.0 }
 0x195   : > { %1221 = vadd.xlane.f32.xlu1 %v1220_v31 }
 0x21e   : > { %v1222_v35 = vpop.xlane.xlu1 %1221 }
 0x21f   : > { %v3431_v36 = vmul.f32 -0.03125, %v1222_v35 }
 0x221   : > { %v1225_v37 = vmul.f32 1.442695, %v3431_v36 }
 0x223   : > { %3895 = vpow2.f32 %v1225_v37 }
 0x230   : > { %v3896_v38 = vpop.eup %3895 }
 0x231   : > { %v1227_v39 = vadd.f32 1.0, %v3896_v38 }
 0x233   : > { %3897 = vrcp.f32 %v1227_v39 }
 0x240   : > { %v3898_v40 = vpop.eup %3897 }
 0x241   : > { %v1230_v41 = vmul.f32 %v3898_v40, %v1219_v30 }
 0x243   : > { %v1231_v42 = vpack.c.bf16 %v1230_v41, %v1230_v41 }
 0x245   : > { %3597 = vmatmul.mubr.msk.bf16.vlgmr.msra.gmra.mxu0 %vm1255_vm3, %v1231_v42 }
 0x246   : > { %3604 = vmatprep.mubr.msk.bf16.mxu0 %vm3996_vm2, %v3995_v33  ;;  %3601 = vmatpush3.bf16.msra.mxu0 %v3869_v16 }
 0x247   : > { %3602 = vmatprep.subr.bf16.mxu0 %v3995_v33 }
 0x24a   : > { %3603 = vmatpush3.bf16.msra.mxu0 %v3870_v17 }
 0x24b   : > { %3608 = vmatprep.subr.bf16.mxu0 %v3995_v33 }
 0x305   : > { %v1293_v44 = vpop.f32.mrf.mxu0 }
 0x306   : > { %v1294_v45 = vadd.f32 %v3432_v43, %v1293_v44 }
 0x307   : > { %v3598_v46 = vpop.f32.mrf.mxu0 }
 0x308   : > { %v3436_v47 = vmul.f32 -1.702, %v1294_v45 }
 0x309   : > { %v1296_v48 = vpop.f32.mrf.mxu0 }
 0x30a   : > { %v1301_v49 = vmul.f32 1.442695, %v3436_v47 }
 0x30b   : > { %v3599_v50 = vpop.f32.mrf.mxu0 }
 0x30c   : > { %3899 = vpow2.f32 %v1301_v49 }
 0x319   : > { %v3900_v51 = vpop.eup %3899 }
 0x31a   : > { %v1303_v52 = vadd.f32 1.0, %v3900_v51 }
 0x31c   : > { %3901 = vrcp.f32 %v1303_v52 }
 0x329   : > { %v3902_v53 = vpop.eup %3901 }
 0x32a   : > { %v1306_v54 = vmul.f32 %v3902_v53, %v1294_v45 }
 0x32c   : > { %v1309_v55 = vsel %vm1191_vm1, %v1306_v54, 0.0 }
 0x32d   : > { %1310 = vadd.xlane.f32.xlu1 %v1309_v55 }
 0x3b6   : > { %v1311_v56 = vpop.xlane.xlu1 %1310 }
 0x3b7   : > { %v1312_v57 = vmul.f32 0.03125, %v1311_v56 }
 0x3b9   : > { %v1313_v58 = vsub.f32 %v1306_v54, %v1312_v57 }
 0x3bb   : > { %v1314_v59 = vmul.f32 %v1313_v58, %v1313_v58 }
 0x3bd   : > { %v1315_v60 = vsel %vm1191_vm1, %v1314_v59, 0.0 }
 0x3be   : > { %1316 = vadd.xlane.f32.xlu0 %v1315_v60 }
 0x447   : > { %v1317_v61 = vpop.xlane.xlu0 %1316 }
 0x448   : > { %v1318_v62 = vmul.f32 0.03125, %v1317_v61 }
 0x44a   : > { %v1319_v63 = vadd.f32 1e-05, %v1318_v62 }
 0x44c   : > { %3903 = vrsqrt.f32 %v1319_v63 }
 0x459   : > { %v3904_v0 = vpop.eup %3903 }
 0x45a   : > { %v1321_v3 = vmul.f32 %v3904_v0, %v1313_v58 }
 0x45c   : > { %v1328_v2 = vmul.f32 %v3437_v1, %v1321_v3 }
 0x45e   : > { %v1335_v5 = vadd.f32 %v3438_v4, %v1328_v2 }
 0x460   : > { %v1336_v6 = vadd.f32 %v1335_v5, %v1219_v30 }
 0x462   : > { %v1339_v8 = vrot.slane %v1336_v6, 7 }
 0x464   : > { %v4236_v9 = vsel %vm1341_vm4, %v1337_v7, %v1339_v8 }
 0x465   : > { %v1346_v10 = vsel %vm1345_vm5, %v4236_v9, 0.0 }
 0x466   : > { %1347 = vadd.xlane.f32.xlu1 %v1346_v10 }
 0x4ef   : > { %v1348_v11 = vpop.xlane.xlu1 %1347 }
 0x4f0   : > { %v1349_v12 = vmul.f32 0.03125, %v1348_v11 }
 0x4f2   : > { %v1350_v13 = vsub.f32 %v4236_v9, %v1349_v12 }
 0x4f4   : > { %v1351_v14 = vmul.f32 %v1350_v13, %v1350_v13 }
 0x4f6   : > { %v1352_v15 = vsel %vm1345_vm5, %v1351_v14, 0.0 }
 0x4f7   : > { %1353 = vadd.xlane.f32.xlu0 %v1352_v15  ;;  %v4002_v15 = vmov 65535  }
 0x4f8   : > { %v1722_v16 = vsel %vm1179_vm0, 4294967295, %v4002_v15 }
 0x580   : > { %v1354_v18 = vpop.xlane.xlu0 %1353 }
 0x581   : > { %v1355_v19 = vmul.f32 0.03125, %v1354_v18 }
 0x583   : > { %v1356_v20 = vadd.f32 1e-05, %v1355_v19  ;;  %v4297_v19 = vsel %vm1721_vm8, %v1722_v16, 0 }
 0x585   : > { %3905 = vrsqrt.f32 %v1356_v20 }
 0x592   : > { %v3906_v21 = vpop.eup %3905 }
 0x593   : > { %v1358_v23 = vmul.f32 %v3906_v21, %v1350_v13 }
 0x595   : > { %v1365_v25 = vmul.f32 %v3439_v22, %v1358_v23 }
 0x597   : > { %v1372_v26 = vadd.f32 %v3440_v24, %v1365_v25 }
 0x599   : > { %v1373_v27 = vpack.c.bf16 %v1372_v26, %v1372_v26 }
 0x59b   : > { %3605 = vmatmul.mubr.msk.bf16.vlgmr.msra.gmra.mxu0 %vm1255_vm3, %v1373_v27 }
 0x59c   : > { %3610 = vmatprep.mubr.msk.bf16.mxu0 %vm3996_vm2, %v3995_v33 }
 0x65b   : > { %v1434_v29 = vpop.f32.mrf.mxu0 }
 0x65c   : > { %v1435_v30 = vadd.f32 %v3441_v28, %v1434_v29 }
 0x65d   : > { %v3606_v31 = vpop.f32.mrf.mxu0 }
 0x65e   : > { %1459 = vrot.lane.b32.xlu0 %v1435_v30, %s3997_s23  ;;  %1456 = vrot.lane.b32.xlu1 %v1435_v30, %s3998_s26  ;;  %v1440_v34 = vmul.f32 0.35355338, %v1435_v30  ;;  %v1465_v36 = vpack.c.bf16 %v1435_v30, %v1435_v30 }
 0x65f   : > { %v1437_v32 = vpop.f32.mrf.mxu0 }
 0x660   : > { %v1451_v45 = vpack.c.bf16 %v1440_v34, %v1440_v34 }
 0x661   : > { %v3607_v35 = vpop.f32.mrf.mxu0 }
 0x662   : > { %1462 = vrot.lane.b32.xlu1 %v1435_v30, %s3999_s28  ;;  %1442 = vrot.lane.b32.xlu0 %v1440_v34, %s3998_s26 }
 0x666   : > { %1470 = vrot.lane.b32.xlu1 %v1465_v36, %s4000_s1 }
 0x6d0   : > { %v1457_v37 = vpop.permute.xlu1 %1456  ;;  %v1460_v39 = vpop.permute.xlu0 %1459 }
 0x6d1   : > { %v4257_v38 = vpack.c.bf16 %v1457_v37, %v1457_v37  ;;  %v4261_v41 = vpack.c.bf16 %v1460_v39, %v1460_v39 }
 0x6d3   : > { %1520 = vrot.lane.b32.xlu1 %v4257_v38, %s4000_s1 }
 0x6d4   : > { %v1463_v40 = vpop.permute.xlu1 %1462  ;;  %v1443_v48 = vpop.permute.xlu0 %1442 }
 0x6d5   : > { %v4263_v42 = vpack.c.bf16 %v1463_v40, %v1463_v40  ;;  %v1452_v52 = vpack.c.bf16 %v1443_v48, %v1443_v48 }
 0x6d7   : > { %1569 = vrot.lane.b32.xlu1 %v4261_v41, %s4000_s1  ;;  %1618 = vrot.lane.b32.xlu0 %v4263_v42, %s4000_s1 }
 0x6d8   : > { %v1471_v43 = vpop.permute.xlu1 %1470 }
 0x6d9   : > { %v1477_v44 = vsel %vm1472_vm6, %v1471_v43, 0 }
 0x6da   : > { %3609 = vmatpush3.bf16.xpose.msra.mxu0 %v1477_v44 }
 0x6db   : > { %1445 = vrot.lane.b32.xlu1 %v1440_v34, %s3997_s23  ;;  %1448 = vrot.lane.b32.xlu0 %v1440_v34, %s3999_s28 }
 0x6dc   : > { %3620 = vmatprep.subr.bf16.mxu0 %v3995_v33 }
 0x6e1   : > { %3611 = vmatmul.mubr.msk.bf16.vlgmr.msra.gmra.mxu0 %vm1472_vm6, %v1451_v45 }
 0x6e2   : > { %3622 = vmatprep.mubr.msk.bf16.mxu0 %vm3996_vm2, %v3995_v33 }
 0x745   : > { %v1521_v46 = vpop.permute.xlu1 %1520 }
 0x746   : > { %v1526_v47 = vsel %vm1472_vm6, %v1521_v46, 0 }
 0x747   : > { %3615 = vmatpush3.bf16.xpose.msra.mxu1 %v1526_v47 }
 0x748   : > { %3626 = vmatprep.subr.bf16.mxu1 %v3995_v33 }
 0x749   : > { %v1570_v49 = vpop.permute.xlu1 %1569  ;;  %v1619_v51 = vpop.permute.xlu0 %1618 }
 0x74a   : > { %v1575_v50 = vsel %vm1472_vm6, %v1570_v49, 0  ;;  %v1624_v54 = vsel %vm1472_vm6, %v1619_v51, 0 }
 0x74b   : > { %3621 = vmatpush3.bf16.xpose.msra.mxu0 %v1575_v50 }
 0x74c   : > { %3632 = vmatprep.subr.bf16.mxu0 %v3995_v33 }
 0x74d   : > { %v1446_v53 = vpop.permute.xlu1 %1445  ;;  %v1449_v56 = vpop.permute.xlu0 %1448 }
 0x74e   : > { %3617 = vmatmul.mubr.msk.bf16.vlgmr.msra.gmra.mxu1 %vm1472_vm6, %v1452_v52  ;;  %v1453_v55 = vpack.c.bf16 %v1446_v53, %v1446_v53  ;;  %v1454_v57 = vpack.c.bf16 %v1449_v56, %v1449_v56 }
 0x74f   : > { %3627 = vmatpush3.bf16.xpose.msra.mxu1 %v1624_v54  ;;  %3628 = vmatprep.mubr.msk.bf16.mxu1 %vm3996_vm2, %v3995_v33 }
 0x750   : > { %3638 = vmatprep.subr.bf16.mxu1 %v3995_v33 }
 0x752   : > { %3623 = vmatmul.mubr.msk.bf16.vlgmr.msra.gmra.mxu0 %vm1472_vm6, %v1453_v55 }
 0x753   : > { %3634 = vmatprep.mubr.msk.bf16.mxu0 %vm3996_vm2, %v3995_v33 }
 0x756   : > { %3629 = vmatmul.mubr.msk.bf16.vlgmr.msra.gmra.mxu1 %vm1472_vm6, %v1454_v57 }
 0x757   : > { %3640 = vmatprep.mubr.msk.bf16.mxu1 %vm3996_vm2, %v3995_v33 }
 0x7a1   : > { %v1513_v58 = vpop.f32.mrf.mxu0 }
 0x7a2   : > { %v1667_v59 = vsel %vm1666_vm7, %v1513_v58, -inf }
 0x7a3   : > { %1668 = vmax.xlane.f32.xlu1 %v1667_v59  ;;  %v3612_v60 = vpop.f32.mrf.mxu0 }
 0x7a5   : > { %v1516_v61 = vpop.f32.mrf.mxu0 }
 0x7a7   : > { %v3613_v62 = vpop.f32.mrf.mxu0 }
 0x7b4   : > { %1715 = vrot.lane.b32.xlu1 %v1465_v36, %s4558_s2 }
 0x80e   : > { %v1562_v63 = vpop.f32.mrf.mxu1 }
 0x80f   : > { %v1670_v0 = vsel %vm1666_vm7, %v1562_v63, -inf }
 0x810   : > { %1671 = vmax.xlane.f32.xlu0 %v1670_v0  ;;  %v3618_v1 = vpop.f32.mrf.mxu1 }
 0x812   : > { %v1565_v3 = vpop.f32.mrf.mxu1  ;;  %v1611_v4 = vpop.f32.mrf.mxu0 }
 0x813   : > { %v1673_v2 = vsel %vm1666_vm7, %v1611_v4, -inf }
 0x814   : > { %v3619_v5 = vpop.f32.mrf.mxu1  ;;  %1674 = vmax.xlane.f32.xlu0 %v1673_v2  ;;  %v3624_v6 = vpop.f32.mrf.mxu0 }
 0x816   : > { %v1614_v7 = vpop.f32.mrf.mxu0  ;;  %v1660_v8 = vpop.f32.mrf.mxu1 }
 0x817   : > { %v1676_v10 = vsel %vm1666_vm7, %v1660_v8, -inf }
 0x818   : > { %v3630_v11 = vpop.f32.mrf.mxu1  ;;  %1677 = vmax.xlane.f32.xlu0 %v1676_v10  ;;  %v3625_v12 = vpop.f32.mrf.mxu0 }
 0x819   : > { %v1918_v11 = vld [vmem:[%s4577_s7 + $0xc] sm:$0xf] }
 0x81a   : > { %v1663_v13 = vpop.f32.mrf.mxu1 }
 0x81c   : > { %v3631_v14 = vpop.f32.mrf.mxu1 }
 0x81d   : > { %v2062_v14 = vsel %vm1922_vm10, %v1918_v11, 0  ;;  %v3874_v11 = vld [vmem:[%s4582_s22 + $0x30] sm:$0xff]  }
 0x82c   : > { %v1669_v17 = vpop.xlane.xlu1 %1668 }
 0x82d   : > { %v1679_v18 = vsub.f32 %v1513_v58, %v1669_v17  ;;  %v1915_v58 = vld [vmem:[%s4577_s7] sm:$0xf] }
 0x82e   : > { %v1924_v61 = vsel %vm1922_vm10, %v1915_v58, 0 }
 0x82f   : > { %v1683_v20 = vmul.f32 1.442695, %v1679_v18 }
 0x830   : > { %v1716_v21 = vpop.permute.xlu1 %1715 }
 0x831   : > { %3907 = vpow2.f32 %v1683_v20  ;;  %v1725_v22 = vand.u32 %v4297_v19, %v1716_v21 }
 0x833   : > { %3633 = vmatpush3.bf16.msra.mxu0 %v1725_v22 }
 0x834   : > { %3644 = vmatprep.subr.bf16.mxu0 %v3995_v33 }
 0x83e   : > { %v3908_v23 = vpop.eup %3907 }
 0x83f   : > { %v1691_v24 = vsel %vm1666_vm7, %v3908_v23, 0.0 }
 0x840   : > { %1692 = vadd.xlane.f32.xlu1 %v1691_v24 }
 0x899   : > { %v1672_v25 = vpop.xlane.xlu0 %1671 }
 0x89a   : > { %v1680_v26 = vsub.f32 %v1562_v63, %v1672_v25  ;;  %v1916_v63 = vld [vmem:[%s4577_s7 + $0x4] sm:$0xf] }
 0x89b   : > { %v1970_v3 = vsel %vm1922_vm10, %v1916_v63, 0 }
 0x89c   : > { %v1685_v27 = vmul.f32 1.442695, %v1680_v26 }
 0x89d   : > { %v1675_v28 = vpop.xlane.xlu0 %1674 }
 0x89e   : > { %3909 = vpow2.f32 %v1685_v27  ;;  %v1681_v29 = vsub.f32 %v1611_v4, %v1675_v28  ;;  %v1917_v4 = vld [vmem:[%s4577_s7 + $0x8] sm:$0xf] }
 0x89f   : > { %v2016_v6 = vsel %vm1922_vm10, %v1917_v4, 0  ;;  %v3458_v4 = vld [vmem:[%s4580_s0] ss:$0 sm:$0xff]  ;;  %s4584_s0 = sld [smem:[#allocation9_spill]] }
 0x8a0   : > { %v1687_v30 = vmul.f32 1.442695, %v1681_v29 }
 0x8a1   : > { %v1678_v31 = vpop.xlane.xlu0 %1677 }
 0x8a2   : > { %3911 = vpow2.f32 %v1687_v30  ;;  %v1682_v32 = vsub.f32 %v1660_v8, %v1678_v31 }
 0x8a4   : > { %v1689_v34 = vmul.f32 1.442695, %v1682_v32 }
 0x8a6   : > { %3913 = vpow2.f32 %v1689_v34 }
 0x8ab   : > { %v3910_v35 = vpop.eup %3909 }
 0x8ac   : > { %v1694_v36 = vsel %vm1666_vm7, %v3910_v35, 0.0 }
 0x8ad   : > { %1695 = vadd.xlane.f32.xlu0 %v1694_v36 }
 0x8af   : > { %v3912_v37 = vpop.eup %3911 }
 0x8b0   : > { %v1697_v39 = vsel %vm1666_vm7, %v3912_v37, 0.0 }
 0x8b1   : > { %1698 = vadd.xlane.f32.xlu1 %v1697_v39 }
 0x8b3   : > { %v3914_v40 = vpop.eup %3913 }
 0x8b4   : > { %v1700_v43 = vsel %vm1666_vm7, %v3914_v40, 0.0 }
 0x8b5   : > { %1701 = vadd.xlane.f32.xlu0 %v1700_v43 }
 0x8c2   : > { %1815 = vrot.lane.b32.xlu1 %v4261_v41, %s4558_s2 }
 0x8c6   : > { %1863 = vrot.lane.b32.xlu1 %v4263_v42, %s4558_s2 }
 0x8c9   : > { %v1693_v44 = vpop.xlane.xlu1 %1692 }
 0x8ca   : > { %3915 = vrcp.f32 %v1693_v44 }
 0x8cb   : > { %1767 = vrot.lane.b32.xlu0 %v4257_v38, %s4558_s2  ;;  %s4588_s2 = sld [smem:[#allocation11_spill]] }
 0x8d7   : > { %v3916_v45 = vpop.eup %3915 }
 0x8d8   : > { %v1707_v46 = vmul.f32 %v3916_v45, %v3908_v23 }
 0x8da   : > { %v1711_v47 = vpack.c.bf16 %v1707_v46, %v1707_v46 }
 0x8dc   : > { %3635 = vmatmul.mubr.msk.bf16.vlgmr.msra.gmra.mxu0 %vm1717_vm9, %v1711_v47 }
 0x8dd   : > { %3646 = vmatprep.mubr.msk.bf16.mxu0 %vm3996_vm2, %v3995_v33 }
 0x936   : > { %v1696_v48 = vpop.xlane.xlu0 %1695 }
 0x937   : > { %3917 = vrcp.f32 %v1696_v48 }
 0x93a   : > { %v1699_v41 = vpop.xlane.xlu1 %1698 }
 0x93b   : > { %3919 = vrcp.f32 %v1699_v41 }
 0x93e   : > { %v1816_v49 = vpop.permute.xlu1 %1815  ;;  %v1702_v42 = vpop.xlane.xlu0 %1701 }
 0x93f   : > { %v1821_v50 = vand.u32 %v1816_v49, %v4297_v19  ;;  %3921 = vrcp.f32 %v1702_v42 }
 0x941   : > { %3645 = vmatpush3.bf16.msra.mxu0 %v1821_v50 }
 0x942   : > { %v1768_v38 = vpop.permute.xlu0 %1767  ;;  %3656 = vmatprep.subr.bf16.mxu0 %v3995_v33  ;;  %v1864_v53 = vpop.permute.xlu1 %1863 }
 0x943   : > { %v1773_v51 = vand.u32 %v1768_v38, %v4297_v19  ;;  %v1869_v57 = vand.u32 %v1864_v53, %v4297_v19 }
 0x944   : > { %v3918_v52 = vpop.eup %3917 }
 0x945   : > { %3639 = vmatpush3.bf16.msra.mxu1 %v1773_v51  ;;  %v1708_v54 = vmul.f32 %v3918_v52, %v3910_v35  ;;  %v3457_v51 = vld [vmem:[%s4578_s10] ss:$0 sm:$0xff]  ;;  %s4583_s10 = sld [smem:[#allocation7_spill]] }
 0x946   : > { %3650 = vmatprep.subr.bf16.mxu1 %v3995_v33 }
 0x947   : > { %v1712_v55 = vpack.c.bf16 %v1708_v54, %v1708_v54 }
 0x948   : > { %v3920_v56 = vpop.eup %3919 }
 0x949   : > { %3641 = vmatmul.mubr.msk.bf16.vlgmr.msra.gmra.mxu1 %vm1717_vm9, %v1712_v55  ;;  %v1709_v59 = vmul.f32 %v3920_v56, %v3912_v37 }
 0x94a   : > { %3651 = vmatpush3.bf16.msra.mxu1 %v1869_v57  ;;  %3652 = vmatprep.mubr.msk.bf16.mxu1 %vm3996_vm2, %v3995_v33 }
 0x94b   : > { %v1713_v60 = vpack.c.bf16 %v1709_v59, %v1709_v59  ;;  %3662 = vmatprep.subr.bf16.mxu1 %v3995_v33 }
 0x94c   : > { %v3922_v62 = vpop.eup %3921 }
 0x94d   : > { %3647 = vmatmul.mubr.msk.bf16.vlgmr.msra.gmra.mxu0 %vm1717_vm9, %v1713_v60  ;;  %v1710_v0 = vmul.f32 %v3922_v62, %v3914_v40  ;;  %v3871_v62 = vld [vmem:[%s4579_s11 + $0x8] sm:$0xff]  }
 0x94e   : > { %3657 = vmatpush3.bf16.msra.mxu0 %v1924_v61  ;;  %3658 = vmatprep.mubr.msk.bf16.mxu0 %vm3996_vm2, %v3995_v33 }
 0x94f   : > { %v1714_v1 = vpack.c.bf16 %v1710_v0, %v1710_v0  ;;  %3668 = vmatprep.subr.bf16.mxu0 %v3995_v33 }
 0x951   : > { %3653 = vmatmul.mubr.msk.bf16.vlgmr.msra.gmra.mxu1 %vm1717_vm9, %v1714_v1 }
 0x952   : > { %3663 = vmatpush3.bf16.msra.mxu1 %v1970_v3  ;;  %3664 = vmatprep.mubr.msk.bf16.mxu1 %vm3996_vm2, %v3995_v33 }
 0x953   : > { %3674 = vmatprep.subr.bf16.mxu1 %v3995_v33 }
 0x99c   : > { %v1761_v2 = vpop.f32.mrf.mxu0 }
 0x99d   : > { %v1911_v5 = vpack.c.bf16 %v1761_v2, %v1761_v2 }
 0x99e   : > { %v3636_v7 = vpop.f32.mrf.mxu0 }
 0x99f   : > { %3659 = vmatmul.mubr.msk.bf16.vlgmr.msra.gmra.mxu0 %vm1472_vm6, %v1911_v5  ;;  %v3459_v5 = vld [vmem:[%s4581_s18] ss:$0 sm:$0xff]  ;;  %s4585_s18 = sld [smem:[#allocation10_spill]] }
 0x9a0   : > { %v1764_v8 = vpop.f32.mrf.mxu0  ;;  %3669 = vmatpush3.bf16.msra.mxu0 %v2016_v6  ;;  %3670 = vmatprep.mubr.msk.bf16.mxu0 %vm3996_vm2, %v3995_v33 }
 0x9a1   : > { %3680 = vmatprep.subr.bf16.mxu0 %v3995_v33 }
 0x9a2   : > { %v3637_v10 = vpop.f32.mrf.mxu0 }
 0x9a3   : > { %v3873_v10 = vld [vmem:[%s4582_s22 + $0x38] sm:$0xff]  }
 0xa09   : > { %v1809_v12 = vpop.f32.mrf.mxu1 }
 0xa0a   : > { %v1912_v13 = vpack.c.bf16 %v1809_v12, %v1809_v12  ;;  %v3875_v12 = vld [vmem:[%s4582_s22 + $0x28] sm:$0xff]  }
 0xa0b   : > { %v3642_v15 = vpop.f32.mrf.mxu1 }
 0xa0c   : > { %3665 = vmatmul.mubr.msk.bf16.vlgmr.msra.gmra.mxu1 %vm1472_vm6, %v1912_v13  ;;  %v3876_v13 = vld [vmem:[%s4582_s22 + $0x20] sm:$0xff]   ;;  %v3878_v15 = vld [vmem:[%s4582_s22 + $0x10] sm:$0xff]  }
 0xa0d   : > { %v1812_v16 = vpop.f32.mrf.mxu1  ;;  %v1857_v17 = vpop.f32.mrf.mxu0  ;;  %3675 = vmatpush3.bf16.msra.mxu1 %v2062_v14  ;;  %3676 = vmatprep.mubr.msk.bf16.mxu1 %vm3996_vm2, %v3995_v33  ;;  %v3877_v14 = vld [vmem:[%s4582_s22 + $0x18] sm:$0xff]  }
 0xa0e   : > { %v1913_v18 = vpack.c.bf16 %v1857_v17, %v1857_v17  ;;  %3688 = vmatprep.subr.bf16.mxu1 %v3995_v33  ;;  %v3879_v16 = vld [vmem:[%s4582_s22 + $0x8] sm:$0xff]   ;;  %v3880_v17 = vld [vmem:[%s4582_s22] sm:$0xff]  }
 0xa0f   : > { %v3643_v20 = vpop.f32.mrf.mxu1  ;;  %v3648_v21 = vpop.f32.mrf.mxu0 }
 0xa10   : > { %3671 = vmatmul.mubr.msk.bf16.vlgmr.msra.gmra.mxu0 %vm1472_vm6, %v1913_v18  ;;  %v3460_v18 = vld [vmem:[%s4583_s10] ss:$0 sm:$0xff]  ;;  %s4586_s10 = sld [smem:[#allocation14_spill]] }
 0xa11   : > { %v1860_v22 = vpop.f32.mrf.mxu0  ;;  %v1905_v23 = vpop.f32.mrf.mxu1  ;;  %3684 = vmatprep.mubr.msk.bf16.mxu0 %vm3996_vm2, %v3995_v33  ;;  %3681 = vmatpush3.bf16.msra.mxu0 %v3871_v62 }
 0xa12   : > { %v1914_v24 = vpack.c.bf16 %v1905_v23, %v1905_v23  ;;  %3682 = vmatprep.subr.bf16.mxu0 %v3995_v33 }
 0xa13   : > { %v3649_v25 = vpop.f32.mrf.mxu0  ;;  %v3654_v26 = vpop.f32.mrf.mxu1 }
 0xa14   : > { %3677 = vmatmul.mubr.msk.bf16.vlgmr.msra.gmra.mxu1 %vm1472_vm6, %v1914_v24 }
 0xa15   : > { %v1908_v27 = vpop.f32.mrf.mxu1  ;;  %3704 = vmatprep.mubr.msk.bf16.mxu1 %vm3996_vm2, %v3995_v33  ;;  %3689 = vmatpush3.bf16.msra.mxu1 %v3873_v10 }
 0xa16   : > { %3690 = vmatprep.subr.bf16.mxu1 %v3995_v33 }
 0xa17   : > { %v3655_v28 = vpop.f32.mrf.mxu1 }
 0xa19   : > { %3691 = vmatpush3.bf16.msra.mxu1 %v3874_v11 }
 0xa1a   : > { %3692 = vmatprep.subr.bf16.mxu1 %v3995_v33 }
 0xa1d   : > { %3693 = vmatpush3.bf16.msra.mxu1 %v3875_v12 }
 0xa1e   : > { %3694 = vmatprep.subr.bf16.mxu1 %v3995_v33 }
 0xa21   : > { %3695 = vmatpush3.bf16.msra.mxu1 %v3876_v13 }
 0xa22   : > { %3696 = vmatprep.subr.bf16.mxu1 %v3995_v33 }
 0xa25   : > { %3697 = vmatpush3.bf16.msra.mxu1 %v3877_v14 }
 0xa26   : > { %3698 = vmatprep.subr.bf16.mxu1 %v3995_v33 }
 0xa29   : > { %3699 = vmatpush3.bf16.msra.mxu1 %v3878_v15 }
 0xa2a   : > { %3700 = vmatprep.subr.bf16.mxu1 %v3995_v33 }
 0xa2d   : > { %3701 = vmatpush3.bf16.msra.mxu1 %v3879_v16 }
 0xa2e   : > { %3702 = vmatprep.subr.bf16.mxu1 %v3995_v33 }
 0xa31   : > { %3703 = vmatpush3.bf16.msra.mxu1 %v3880_v17 }
 0xa32   : > { %3734 = vmatprep.subr.bf16.mxu1 %v3995_v33 }
 0xa5f   : > { %v1960_v29 = vpop.f32.mrf.mxu0 }
 0xa60   : > { %v2104_v40 = vsel %vm1345_vm5, %v1960_v29, 0.0 }
 0xa61   : > { %v3660_v30 = vpop.f32.mrf.mxu0 }
 0xa63   : > { %v1963_v31 = vpop.f32.mrf.mxu0 }
 0xa65   : > { %v3661_v32 = vpop.f32.mrf.mxu0 }
 0xa66   : > { %v3465_v32 = vld [vmem:[%s4584_s0] ss:$0 sm:$0xff]  ;;  %s4587_s0 = sld [smem:[#allocation15_spill]] }
 0xacc   : > { %v2006_v34 = vpop.f32.mrf.mxu1 }
 0xacd   : > { %v2105_v36 = vsel %vm1345_vm5, %v2006_v34, 0.0 }
 0xace   : > { %v3666_v35 = vpop.f32.mrf.mxu1  ;;  %v2106_v44 = vadd.f32 %v2105_v36, %v2104_v40 }
 0xad0   : > { %v2009_v37 = vpop.f32.mrf.mxu1  ;;  %v2052_v39 = vpop.f32.mrf.mxu0 }
 0xad1   : > { %v2107_v43 = vsel %vm1345_vm5, %v2052_v39, 0.0 }
 0xad2   : > { %v3667_v45 = vpop.f32.mrf.mxu1  ;;  %v3672_v46 = vpop.f32.mrf.mxu0  ;;  %v2108_v47 = vadd.f32 %v2107_v43, %v2106_v44 }
 0xad4   : > { %v2055_v48 = vpop.f32.mrf.mxu0  ;;  %v2098_v41 = vpop.f32.mrf.mxu1 }
 0xad5   : > { %v2109_v49 = vsel %vm1345_vm5, %v2098_v41, 0.0  ;;  %v3881_v41 = vld [vmem:[%s4585_s18 + $0x8] sm:$0xff]  }
 0xad6   : > { %v2110_v42 = vadd.f32 %v2109_v49, %v2108_v47  ;;  %v3673_v50 = vpop.f32.mrf.mxu0  ;;  %v3678_v38 = vpop.f32.mrf.mxu1  ;;  %v3882_v49 = vld [vmem:[%s4585_s18] sm:$0xff]  }
 0xad8   : > { %v2111_v52 = vadd.f32 %v2110_v42, %v4236_v9  ;;  %v2101_v53 = vpop.f32.mrf.mxu1  ;;  %v3872_v9 = vld [vmem:[%s4579_s11] sm:$0xff]  }
 0xad9   : > { %3683 = vmatpush3.bf16.msra.mxu0 %v3872_v9 }
 0xada   : > { %v3679_v54 = vpop.f32.mrf.mxu1  ;;  %v4359_v55 = vadd.f32 %v3457_v51, %v2111_v52  ;;  %3708 = vmatprep.subr.bf16.mxu0 %v3995_v33  ;;  %v3474_v52 = vld [vmem:[%s4586_s10] ss:$0 sm:$0xff]  ;;  %s4594_s10 = sld [smem:[#allocation17_spill]] }
 0xadb   : > { %v3475_v54 = vld [vmem:[%s4587_s0] ss:$0 sm:$0xff]  ;;  %s3426_s0 = sshll.u32 %s4596_s16, 3 }
 0xadc   : > { %v2122_v56 = vsel %vm1345_vm5, %v4359_v55, 0.0 }
 0xadd   : > { %2123 = vadd.xlane.f32.xlu1 %v2122_v56 }
 0xb66   : > { %v2124_v57 = vpop.xlane.xlu1 %2123 }
 0xb67   : > { %v2125_v58 = vmul.f32 0.03125, %v2124_v57 }
 0xb69   : > { %v2126_v59 = vsub.f32 %v4359_v55, %v2125_v58  ;;  %v3476_v58 = vld [vmem:[%s4588_s2] ss:$0 sm:$0xff]  ;;  %s4593_s2 = sld [smem:[#allocation16_spill]] }
 0xb6b   : > { %v2127_v60 = vmul.f32 %v2126_v59, %v2126_v59 }
 0xb6d   : > { %v2128_v61 = vsel %vm1345_vm5, %v2127_v60, 0.0 }
 0xb6e   : > { %2129 = vadd.xlane.f32.xlu0 %v2128_v61 }
 0xbf7   : > { %v2130_v63 = vpop.xlane.xlu0 %2129 }
 0xbf8   : > { %v2131_v0 = vmul.f32 0.03125, %v2130_v63 }
 0xbfa   : > { %v2132_v1 = vadd.f32 1e-05, %v2131_v0 }
 0xbfc   : > { %3923 = vrsqrt.f32 %v2132_v1 }
 0xc09   : > { %v3924_v3 = vpop.eup %3923 }
 0xc0a   : > { %v2134_v2 = vmul.f32 %v3924_v3, %v2126_v59 }
 0xc0c   : > { %v2141_v6 = vmul.f32 %v3458_v4, %v2134_v2 }
 0xc0e   : > { %v2148_v7 = vadd.f32 %v3459_v5, %v2141_v6 }
 0xc10   : > { %v2149_v8 = vpack.c.bf16 %v2148_v7, %v2148_v7 }
 0xc12   : > { %3685 = vmatmul.mubr.msk.bf16.vlgmr.msra.gmra.mxu0 %vm1255_vm3, %v2149_v8 }
 0xc13   : > { %3712 = vmatprep.mubr.msk.bf16.mxu0 %vm3996_vm2, %v3995_v33  ;;  %3709 = vmatpush3.bf16.msra.mxu0 %v3881_v41 }
 0xc14   : > { %3710 = vmatprep.subr.bf16.mxu0 %v3995_v33 }
 0xc17   : > { %3711 = vmatpush3.bf16.msra.mxu0 %v3882_v49 }
 0xc18   : > { %3716 = vmatprep.subr.bf16.mxu0 %v3995_v33 }
 0xcd2   : > { %v2210_v20 = vpop.f32.mrf.mxu0 }
 0xcd3   : > { %v2211_v21 = vadd.f32 %v3460_v18, %v2210_v20 }
 0xcd4   : > { %v3686_v22 = vpop.f32.mrf.mxu0 }
 0xcd5   : > { %v3464_v23 = vmul.f32 -1.702, %v2211_v21 }
 0xcd6   : > { %v2213_v24 = vpop.f32.mrf.mxu0 }
 0xcd7   : > { %v2218_v25 = vmul.f32 1.442695, %v3464_v23 }
 0xcd8   : > { %v3687_v26 = vpop.f32.mrf.mxu0 }
 0xcd9   : > { %3925 = vpow2.f32 %v2218_v25 }
 0xce6   : > { %v3926_v27 = vpop.eup %3925 }
 0xce7   : > { %v2220_v28 = vadd.f32 1.0, %v3926_v27 }
 0xce9   : > { %3927 = vrcp.f32 %v2220_v28 }
 0xcf6   : > { %v3928_v29 = vpop.eup %3927 }
 0xcf7   : > { %v2223_v30 = vmul.f32 %v3928_v29, %v2211_v21 }
 0xcf9   : > { %v2224_v31 = vpack.c.bf16 %v2223_v30, %v2223_v30 }
 0xcfb   : > { %3705 = vmatmul.mubr.bf16.vlgmr.msra.gmra.mxu1 %v2224_v31 }
 0xcfc   : > { %3736 = vmatprep.mubr.msk.bf16.mxu1 %vm3996_vm2, %v3995_v33 }
 0xdbb   : > { %v2330_v34 = vpop.f32.mrf.mxu1 }
 0xdbc   : > { %v2331_v35 = vadd.f32 %v3465_v32, %v2330_v34 }
 0xdbd   : > { %v3706_v36 = vpop.f32.mrf.mxu1 }
 0xdbe   : > { %v4395_v37 = vadd.f32 %v2331_v35, %v4359_v55 }
 0xdbf   : > { %v2333_v39 = vpop.f32.mrf.mxu1 }
 0xdc0   : > { %v2339_v40 = vsel %vm1345_vm5, %v4395_v37, 0.0 }
 0xdc1   : > { %2340 = vadd.xlane.f32.xlu0 %v2339_v40  ;;  %v3707_v43 = vpop.f32.mrf.mxu1 }
 0xe4a   : > { %v2341_v44 = vpop.xlane.xlu0 %2340 }
 0xe4b   : > { %v2342_v45 = vmul.f32 0.03125, %v2341_v44 }
 0xe4d   : > { %v2343_v46 = vsub.f32 %v4395_v37, %v2342_v45 }
 0xe4f   : > { %v2344_v47 = vmul.f32 %v2343_v46, %v2343_v46 }
 0xe51   : > { %v2345_v48 = vsel %vm1345_vm5, %v2344_v47, 0.0 }
 0xe52   : > { %2346 = vadd.xlane.f32.xlu0 %v2345_v48 }
 0xedb   : > { %v2347_v42 = vpop.xlane.xlu0 %2346 }
 0xedc   : > { %v2348_v50 = vmul.f32 0.03125, %v2347_v42 }
 0xede   : > { %v2349_v38 = vadd.f32 1e-05, %v2348_v50 }
 0xee0   : > { %3929 = vrsqrt.f32 %v2349_v38 }
 0xeed   : > { %v3930_v51 = vpop.eup %3929 }
 0xeee   : > { %v2351_v53 = vmul.f32 %v3930_v51, %v2343_v46 }
 0xef0   : > { %v2358_v55 = vmul.f32 %v3474_v52, %v2351_v53 }
 0xef2   : > { %v2365_v56 = vadd.f32 %v3475_v54, %v2358_v55 }
 0xef4   : > { %v2366_v57 = vpack.c.bf16 %v2365_v56, %v2365_v56 }
 0xef6   : > { %3713 = vmatmul.mubr.msk.bf16.vlgmr.msra.gmra.mxu0 %vm1255_vm3, %v2366_v57 }
 0xef7   : > { %3718 = vmatprep.mubr.msk.bf16.mxu0 %vm3996_vm2, %v3995_v33 }
 0xfb6   : > { %v2427_v59 = vpop.f32.mrf.mxu0 }
 0xfb7   : > { %v2428_v60 = vadd.f32 %v3476_v58, %v2427_v59 }
 0xfb8   : > { %v3714_v61 = vpop.f32.mrf.mxu0 }
 0xfb9   : > { %2452 = vrot.lane.b32.xlu0 %v2428_v60, %s3997_s23  ;;  %2449 = vrot.lane.b32.xlu1 %v2428_v60, %s3998_s26  ;;  %v2433_v9 = vmul.f32 0.35355338, %v2428_v60  ;;  %v2458_v0 = vpack.c.bf16 %v2428_v60, %v2428_v60 }
 0xfba   : > { %v2430_v62 = vpop.f32.mrf.mxu0 }
 0xfbb   : > { %v2444_v10 = vpack.c.bf16 %v2433_v9, %v2433_v9 }
 0xfbc   : > { %v3715_v63 = vpop.f32.mrf.mxu0 }
 0xfbd   : > { %2455 = vrot.lane.b32.xlu1 %v2428_v60, %s3999_s28  ;;  %2435 = vrot.lane.b32.xlu0 %v2433_v9, %s3998_s26  ;;  %s4590_s26 = sld [smem:[#allocation12_spill]] }
 0xfc1   : > { %2463 = vrot.lane.b32.xlu1 %v2458_v0, %s4000_s1 }
0x102b   : > { %v2450_v1 = vpop.permute.xlu1 %2449  ;;  %v2453_v4 = vpop.permute.xlu0 %2452 }
0x102c   : > { %v4416_v3 = vpack.c.bf16 %v2450_v1, %v2450_v1  ;;  %v4420_v5 = vpack.c.bf16 %v2453_v4, %v2453_v4 }
0x102e   : > { %2512 = vrot.lane.b32.xlu1 %v4416_v3, %s4000_s1 }
0x102f   : > { %v2456_v2 = vpop.permute.xlu1 %2455  ;;  %v2436_v11 = vpop.permute.xlu0 %2435 }
0x1030   : > { %v4422_v6 = vpack.c.bf16 %v2456_v2, %v2456_v2  ;;  %v2445_v17 = vpack.c.bf16 %v2436_v11, %v2436_v11 }
0x1032   : > { %2561 = vrot.lane.b32.xlu1 %v4420_v5, %s4000_s1  ;;  %2610 = vrot.lane.b32.xlu0 %v4422_v6, %s4000_s1  ;;  %s4592_s1 = sld [smem:[#allocation18_spill]] }
0x1033   : > { %v2464_v7 = vpop.permute.xlu1 %2463 }
0x1034   : > { %v2469_v8 = vsel %vm1472_vm6, %v2464_v7, 0 }
0x1035   : > { %3717 = vmatpush3.bf16.xpose.msra.mxu0 %v2469_v8 }
0x1036   : > { %2438 = vrot.lane.b32.xlu1 %v2433_v9, %s3997_s23  ;;  %2441 = vrot.lane.b32.xlu0 %v2433_v9, %s3999_s28  ;;  %s4589_s23 = smov 64   ;;  %s4591_s28 = sld [smem:[#allocation13_spill]] }
0x1037   : > { %3722 = vmatprep.subr.bf16.mxu0 %v3995_v33 }
0x103c   : > { %3719 = vmatmul.mubr.msk.bf16.vlgmr.msra.gmra.mxu0 %vm1472_vm6, %v2444_v10 }
0x103d   : > { %3724 = vmatprep.mubr.msk.bf16.mxu0 %vm3996_vm2, %v3995_v33 }
0x10a0   : > { %v2513_v12 = vpop.permute.xlu1 %2512 }
0x10a1   : > { %v2518_v13 = vsel %vm1472_vm6, %v2513_v12, 0 }
0x10a2   : > { %3723 = vmatpush3.bf16.xpose.msra.mxu0 %v2518_v13 }
0x10a3   : > { %3728 = vmatprep.subr.bf16.mxu0 %v3995_v33 }
0x10a4   : > { %v2611_v14 = vpop.permute.xlu0 %2610  ;;  %v2562_v16 = vpop.permute.xlu1 %2561 }
0x10a5   : > { %v2616_v15 = vsel %vm1472_vm6, %v2611_v14, 0  ;;  %v2567_v20 = vsel %vm1472_vm6, %v2562_v16, 0 }
0x10a6   : > { %3735 = vmatpush3.bf16.xpose.msra.mxu1 %v2616_v15 }
0x10a7   : > { %3746 = vmatprep.subr.bf16.mxu1 %v3995_v33 }
0x10a8   : > { %v2442_v18 = vpop.permute.xlu0 %2441  ;;  %v2439_v22 = vpop.permute.xlu1 %2438 }
0x10a9   : > { %3725 = vmatmul.mubr.msk.bf16.vlgmr.msra.gmra.mxu0 %vm1472_vm6, %v2445_v17  ;;  %v2447_v21 = vpack.c.bf16 %v2442_v18, %v2442_v18  ;;  %v2446_v23 = vpack.c.bf16 %v2439_v22, %v2439_v22  ;;  %v2902_v22 = vld [vmem:[%s4590_s26] sm:$0xf] }
0x10aa   : > { %3729 = vmatpush3.bf16.xpose.msra.mxu0 %v2567_v20  ;;  %3730 = vmatprep.mubr.msk.bf16.mxu0 %vm3996_vm2, %v3995_v33 }
0x10ab   : > { %3740 = vmatprep.subr.bf16.mxu0 %v3995_v33 }
0x10ad   : > { %3737 = vmatmul.mubr.msk.bf16.vlgmr.msra.gmra.mxu1 %vm1472_vm6, %v2447_v21 }
0x10ae   : > { %3748 = vmatprep.mubr.msk.bf16.mxu1 %vm3996_vm2, %v3995_v33 }
0x10b1   : > { %3731 = vmatmul.mubr.msk.bf16.vlgmr.msra.gmra.mxu0 %vm1472_vm6, %v2446_v23 }
0x10b2   : > { %3742 = vmatprep.mubr.msk.bf16.mxu0 %vm3996_vm2, %v3995_v33 }
0x10fc   : > { %v2505_v24 = vpop.f32.mrf.mxu0 }
0x10fd   : > { %v2658_v25 = vsel %vm1666_vm7, %v2505_v24, -inf }
0x10fe   : > { %2659 = vmax.xlane.f32.xlu1 %v2658_v25  ;;  %v3720_v26 = vpop.f32.mrf.mxu0  ;;  %v2910_v25 = vsel %vm1922_vm10, %v2902_v22, 0 }
0x1100   : > { %v2508_v27 = vpop.f32.mrf.mxu0 }
0x1102   : > { %v3721_v28 = vpop.f32.mrf.mxu0 }
0x1103   : > { %v2903_v28 = vld [vmem:[%s4590_s26 + $0x4] sm:$0xf] }
0x110f   : > { %2706 = vrot.lane.b32.xlu1 %v2458_v0, %s4589_s23 }
0x1169   : > { %v2554_v29 = vpop.f32.mrf.mxu0 }
0x116a   : > { %v2661_v30 = vsel %vm1666_vm7, %v2554_v29, -inf }
0x116b   : > { %2662 = vmax.xlane.f32.xlu0 %v2661_v30  ;;  %v3726_v31 = vpop.f32.mrf.mxu0  ;;  %v2904_v30 = vld [vmem:[%s4590_s26 + $0x8] sm:$0xf] }
0x116d   : > { %v2557_v32 = vpop.f32.mrf.mxu0  ;;  %v2652_v34 = vpop.f32.mrf.mxu1 }
0x116e   : > { %v2667_v47 = vsel %vm1666_vm7, %v2652_v34, -inf }
0x116f   : > { %v3727_v35 = vpop.f32.mrf.mxu0  ;;  %v3738_v36 = vpop.f32.mrf.mxu1 }
0x1171   : > { %v2603_v39 = vpop.f32.mrf.mxu0  ;;  %v2655_v40 = vpop.f32.mrf.mxu1 }
0x1172   : > { %v2664_v43 = vsel %vm1666_vm7, %v2603_v39, -inf  ;;  %v2905_v40 = vld [vmem:[%s4590_s26 + $0xc] sm:$0xf] }
0x1173   : > { %v3739_v44 = vpop.f32.mrf.mxu1  ;;  %2665 = vmax.xlane.f32.xlu0 %v2664_v43  ;;  %v3732_v45 = vpop.f32.mrf.mxu0 }
0x1174   : > { %v3048_v45 = vsel %vm1922_vm10, %v2905_v40, 0  ;;  %v3887_v40 = vld [vmem:[%s4171_s27 + $0x28] sm:$0xff]  }
0x1175   : > { %v2606_v46 = vpop.f32.mrf.mxu0 }
0x1177   : > { %2668 = vmax.xlane.f32.xlu0 %v2667_v47  ;;  %v3733_v48 = vpop.f32.mrf.mxu0 }
0x1187   : > { %v2660_v41 = vpop.xlane.xlu1 %2659 }
0x1188   : > { %v2670_v49 = vsub.f32 %v2505_v24, %v2660_v41 }
0x118a   : > { %v2674_v42 = vmul.f32 1.442695, %v2670_v49 }
0x118b   : > { %v2707_v50 = vpop.permute.xlu1 %2706 }
0x118c   : > { %3931 = vpow2.f32 %v2674_v42  ;;  %v2712_v38 = vand.u32 %v2707_v50, %v4297_v19 }
0x118e   : > { %3741 = vmatpush3.bf16.msra.mxu0 %v2712_v38 }
0x118f   : > { %3752 = vmatprep.subr.bf16.mxu0 %v3995_v33 }
0x1199   : > { %v3932_v51 = vpop.eup %3931 }
0x119a   : > { %v2682_v52 = vsel %vm1666_vm7, %v3932_v51, 0.0 }
0x119b   : > { %2683 = vadd.xlane.f32.xlu1 %v2682_v52 }
0x11ac   : > { %2802 = vrot.lane.b32.xlu1 %v4420_v5, %s4589_s23 }
0x11f4   : > { %v2663_v53 = vpop.xlane.xlu0 %2662 }
0x11f5   : > { %v2671_v54 = vsub.f32 %v2554_v29, %v2663_v53  ;;  %v2956_v29 = vsel %vm1922_vm10, %v2903_v28, 0 }
0x11f7   : > { %v2676_v55 = vmul.f32 1.442695, %v2671_v54 }
0x11f9   : > { %3933 = vpow2.f32 %v2676_v55 }
0x11fc   : > { %v2666_v56 = vpop.xlane.xlu0 %2665 }
0x11fd   : > { %v2672_v57 = vsub.f32 %v2603_v39, %v2666_v56 }
0x11ff   : > { %v2678_v58 = vmul.f32 1.442695, %v2672_v57 }
0x1200   : > { %v2669_v59 = vpop.xlane.xlu0 %2668 }
0x1201   : > { %3935 = vpow2.f32 %v2678_v58  ;;  %v2673_v60 = vsub.f32 %v2652_v34, %v2669_v59  ;;  %v3002_v34 = vsel %vm1922_vm10, %v2904_v30, 0 }
0x1203   : > { %v2680_v61 = vmul.f32 1.442695, %v2673_v60 }
0x1205   : > { %3937 = vpow2.f32 %v2680_v61 }
0x1206   : > { %v3934_v62 = vpop.eup %3933 }
0x1207   : > { %v2685_v9 = vsel %vm1666_vm7, %v3934_v62, 0.0 }
0x1208   : > { %2686 = vadd.xlane.f32.xlu0 %v2685_v9 }
0x120e   : > { %v3936_v63 = vpop.eup %3935 }
0x120f   : > { %v2688_v0 = vsel %vm1666_vm7, %v3936_v63, 0.0 }
0x1210   : > { %2689 = vadd.xlane.f32.xlu1 %v2688_v0 }
0x1212   : > { %v3938_v1 = vpop.eup %3937 }
0x1213   : > { %v2691_v4 = vsel %vm1666_vm7, %v3938_v1, 0.0 }
0x1214   : > { %2692 = vadd.xlane.f32.xlu0 %v2691_v4 }
0x1221   : > { %2850 = vrot.lane.b32.xlu1 %v4422_v6, %s4589_s23 }
0x1224   : > { %v2684_v2 = vpop.xlane.xlu1 %2683 }
0x1225   : > { %3939 = vrcp.f32 %v2684_v2 }
0x1228   : > { %v2803_v7 = vpop.permute.xlu1 %2802 }
0x1229   : > { %v2808_v11 = vand.u32 %v2803_v7, %v4297_v19 }
0x122a   : > { %2754 = vrot.lane.b32.xlu0 %v4416_v3, %s4589_s23  ;;  %s1054_s23 = scalar_lea.vmem %s4181_s6, %s3426_s0 }
0x1232   : > { %v3940_v5 = vpop.eup %3939 }
0x1233   : > { %v2698_v8 = vmul.f32 %v3940_v5, %v3932_v51 }
0x1235   : > { %v2702_v10 = vpack.c.bf16 %v2698_v8, %v2698_v8 }
0x1237   : > { %3743 = vmatmul.mubr.msk.bf16.vlgmr.msra.gmra.mxu0 %vm1717_vm9, %v2702_v10 }
0x1238   : > { %3753 = vmatpush3.bf16.msra.mxu0 %v2808_v11  ;;  %3754 = vmatprep.mubr.msk.bf16.mxu0 %vm3996_vm2, %v3995_v33 }
0x1239   : > { %3764 = vmatprep.subr.bf16.mxu0 %v3995_v33 }
0x1291   : > { %v2687_v6 = vpop.xlane.xlu0 %2686 }
0x1292   : > { %3941 = vrcp.f32 %v2687_v6 }
0x1299   : > { %v2690_v12 = vpop.xlane.xlu1 %2689 }
0x129a   : > { %3943 = vrcp.f32 %v2690_v12 }
0x129d   : > { %v2693_v3 = vpop.xlane.xlu0 %2692  ;;  %v2851_v17 = vpop.permute.xlu1 %2850 }
0x129e   : > { %3945 = vrcp.f32 %v2693_v3  ;;  %v2856_v20 = vand.u32 %v2851_v17, %v4297_v19 }
0x129f   : > { %v3942_v13 = vpop.eup %3941 }
0x12a0   : > { %v2699_v15 = vmul.f32 %v3942_v13, %v3934_v62  ;;  %v3492_v13 = vld [vmem:[%s4591_s28] ss:$0 sm:$0xff] }
0x12a1   : > { %v2755_v14 = vpop.permute.xlu0 %2754 }
0x12a2   : > { %v2760_v16 = vand.u32 %v2755_v14, %v4297_v19  ;;  %v2703_v18 = vpack.c.bf16 %v2699_v15, %v2699_v15 }
0x12a4   : > { %3747 = vmatpush3.bf16.msra.mxu1 %v2760_v16 }
0x12a5   : > { %3758 = vmatprep.subr.bf16.mxu1 %v3995_v33 }
0x12a7   : > { %v3944_v21 = vpop.eup %3943  ;;  %3749 = vmatmul.mubr.msk.bf16.vlgmr.msra.gmra.mxu1 %vm1717_vm9, %v2703_v18 }
0x12a8   : > { %3759 = vmatpush3.bf16.msra.mxu1 %v2856_v20  ;;  %v2700_v23 = vmul.f32 %v3944_v21, %v3936_v63  ;;  %3760 = vmatprep.mubr.msk.bf16.mxu1 %vm3996_vm2, %v3995_v33 }
0x12a9   : > { %3770 = vmatprep.subr.bf16.mxu1 %v3995_v33 }
0x12aa   : > { %v2704_v24 = vpack.c.bf16 %v2700_v23, %v2700_v23 }
0x12ab   : > { %v3946_v26 = vpop.eup %3945 }
0x12ac   : > { %3755 = vmatmul.mubr.msk.bf16.vlgmr.msra.gmra.mxu0 %vm1717_vm9, %v2704_v24  ;;  %v2701_v19 = vmul.f32 %v3946_v26, %v3938_v1 }
0x12ad   : > { %3765 = vmatpush3.bf16.msra.mxu0 %v2910_v25  ;;  %3766 = vmatprep.mubr.msk.bf16.mxu0 %vm3996_vm2, %v3995_v33  ;;  %v3883_v25 = vld [vmem:[%s4592_s1 + $0x8] sm:$0xff]  }
0x12ae   : > { %v2705_v27 = vpack.c.bf16 %v2701_v19, %v2701_v19  ;;  %3776 = vmatprep.subr.bf16.mxu0 %v3995_v33 }
0x12b0   : > { %3761 = vmatmul.mubr.msk.bf16.vlgmr.msra.gmra.mxu1 %vm1717_vm9, %v2705_v27 }
0x12b1   : > { %3772 = vmatprep.mubr.msk.bf16.mxu1 %vm3996_vm2, %v3995_v33  ;;  %3771 = vmatpush3.bf16.msra.mxu1 %v2956_v29  ;;  %v3493_v29 = vld [vmem:[%s4593_s2] ss:$0 sm:$0xff] }
0x12b2   : > { %3782 = vmatprep.subr.bf16.mxu1 %v3995_v33 }
0x12f7   : > { %v2748_v31 = vpop.f32.mrf.mxu0 }
0x12f8   : > { %v2898_v32 = vpack.c.bf16 %v2748_v31, %v2748_v31  ;;  %v3494_v31 = vld [vmem:[%s4594_s10] ss:$0 sm:$0xff] }
0x12f9   : > { %v3744_v35 = vpop.f32.mrf.mxu0 }
0x12fa   : > { %3767 = vmatmul.mubr.msk.bf16.vlgmr.msra.gmra.mxu0 %vm1472_vm6, %v2898_v32 }
0x12fb   : > { %v2751_v36 = vpop.f32.mrf.mxu0  ;;  %3777 = vmatpush3.bf16.msra.mxu0 %v3002_v34  ;;  %3778 = vmatprep.mubr.msk.bf16.mxu0 %vm3996_vm2, %v3995_v33 }
0x12fc   : > { %3788 = vmatprep.subr.bf16.mxu0 %v3995_v33  ;;  %v3885_v36 = vld [vmem:[%s4171_s27 + $0x38] sm:$0xff]  }
0x12fd   : > { %v3745_v39 = vpop.f32.mrf.mxu0 }
0x12fe   : > { %v3886_v39 = vld [vmem:[%s4171_s27 + $0x30] sm:$0xff]  }
0x1367   : > { %v2796_v43 = vpop.f32.mrf.mxu1 }
0x1368   : > { %v2899_v44 = vpack.c.bf16 %v2796_v43, %v2796_v43  ;;  %v3888_v43 = vld [vmem:[%s4171_s27 + $0x20] sm:$0xff]  }
0x1369   : > { %v3750_v46 = vpop.f32.mrf.mxu1 }
0x136a   : > { %3773 = vmatmul.mubr.msk.bf16.vlgmr.msra.gmra.mxu1 %vm1472_vm6, %v2899_v44  ;;  %v3889_v44 = vld [vmem:[%s4171_s27 + $0x18] sm:$0xff]   ;;  %v3891_v46 = vld [vmem:[%s4171_s27 + $0x8] sm:$0xff]  }
0x136b   : > { %v2799_v47 = vpop.f32.mrf.mxu1  ;;  %3783 = vmatpush3.bf16.msra.mxu1 %v3048_v45  ;;  %3784 = vmatprep.mubr.msk.bf16.mxu1 %vm3996_vm2, %v3995_v33  ;;  %v3890_v45 = vld [vmem:[%s4171_s27 + $0x10] sm:$0xff]  }
0x136c   : > { %v2844_v48 = vpop.f32.mrf.mxu0  ;;  %3796 = vmatprep.subr.bf16.mxu1 %v3995_v33  ;;  %v3892_v47 = vld [vmem:[%s4171_s27] sm:$0xff]  }
0x136d   : > { %v2900_v41 = vpack.c.bf16 %v2844_v48, %v2844_v48  ;;  %v3751_v49 = vpop.f32.mrf.mxu1  ;;  %v3495_v48 = vld [vmem:[%s4166_s30] ss:$0 sm:$0xff] }
0x136e   : > { %v3756_v42 = vpop.f32.mrf.mxu0 }
0x136f   : > { %3779 = vmatmul.mubr.msk.bf16.vlgmr.msra.gmra.mxu0 %vm1472_vm6, %v2900_v41 }
0x1370   : > { %v2847_v50 = vpop.f32.mrf.mxu0  ;;  %v2892_v38 = vpop.f32.mrf.mxu1  ;;  %3792 = vmatprep.mubr.msk.bf16.mxu0 %vm3996_vm2, %v3995_v33  ;;  %3789 = vmatpush3.bf16.msra.mxu0 %v3883_v25 }
0x1371   : > { %v2901_v51 = vpack.c.bf16 %v2892_v38, %v2892_v38  ;;  %3790 = vmatprep.subr.bf16.mxu0 %v3995_v33 }
0x1372   : > { %v3757_v52 = vpop.f32.mrf.mxu0  ;;  %v3762_v53 = vpop.f32.mrf.mxu1 }
0x1373   : > { %3785 = vmatmul.mubr.msk.bf16.vlgmr.msra.gmra.mxu1 %vm1472_vm6, %v2901_v51 }
0x1374   : > { %v2895_v54 = vpop.f32.mrf.mxu1  ;;  %3812 = vmatprep.mubr.msk.bf16.mxu1 %vm3996_vm2, %v3995_v33  ;;  %3797 = vmatpush3.bf16.msra.mxu1 %v3885_v36 }
0x1375   : > { %3798 = vmatprep.subr.bf16.mxu1 %v3995_v33 }
0x1376   : > { %v3763_v55 = vpop.f32.mrf.mxu1 }
0x1378   : > { %3799 = vmatpush3.bf16.msra.mxu1 %v3886_v39 }
0x1379   : > { %3800 = vmatprep.subr.bf16.mxu1 %v3995_v33 }
0x137c   : > { %3801 = vmatpush3.bf16.msra.mxu1 %v3887_v40 }
0x137d   : > { %3802 = vmatprep.subr.bf16.mxu1 %v3995_v33 }
0x1380   : > { %3803 = vmatpush3.bf16.msra.mxu1 %v3888_v43 }
0x1381   : > { %3804 = vmatprep.subr.bf16.mxu1 %v3995_v33 }
0x1384   : > { %3805 = vmatpush3.bf16.msra.mxu1 %v3889_v44 }
0x1385   : > { %3806 = vmatprep.subr.bf16.mxu1 %v3995_v33 }
0x1388   : > { %3807 = vmatpush3.bf16.msra.mxu1 %v3890_v45 }
0x1389   : > { %3808 = vmatprep.subr.bf16.mxu1 %v3995_v33 }
0x138c   : > { %3809 = vmatpush3.bf16.msra.mxu1 %v3891_v46 }
0x138d   : > { %3810 = vmatprep.subr.bf16.mxu1 %v3995_v33 }
0x1390   : > { %3811 = vmatpush3.bf16.msra.mxu1 %v3892_v47 }
0x13ba   : > { %v2946_v56 = vpop.f32.mrf.mxu0 }
0x13bb   : > { %v3090_v0 = vsel %vm1345_vm5, %v2946_v56, 0.0 }
0x13bc   : > { %v3768_v57 = vpop.f32.mrf.mxu0 }
0x13bd   : > { %v3500_v57 = vld [vmem:[%s4176_s4] ss:$0 sm:$0xff] }
0x13be   : > { %v2949_v58 = vpop.f32.mrf.mxu0 }
0x13c0   : > { %v3769_v59 = vpop.f32.mrf.mxu0 }
0x142a   : > { %v2992_v60 = vpop.f32.mrf.mxu1 }
0x142b   : > { %v3091_v62 = vsel %vm1345_vm5, %v2992_v60, 0.0 }
0x142c   : > { %v3774_v61 = vpop.f32.mrf.mxu1  ;;  %v3092_v2 = vadd.f32 %v3091_v62, %v3090_v0 }
0x142e   : > { %v2995_v9 = vpop.f32.mrf.mxu1 }
0x142f   : > { %v3038_v63 = vpop.f32.mrf.mxu0 }
0x1430   : > { %v3093_v1 = vsel %vm1345_vm5, %v3038_v63, 0.0  ;;  %v3775_v4 = vpop.f32.mrf.mxu1 }
0x1431   : > { %v3780_v5 = vpop.f32.mrf.mxu0  ;;  %v3094_v7 = vadd.f32 %v3093_v1, %v3092_v2 }
0x1433   : > { %v3041_v8 = vpop.f32.mrf.mxu0  ;;  %v3084_v10 = vpop.f32.mrf.mxu1 }
0x1434   : > { %v3095_v11 = vsel %vm1345_vm5, %v3084_v10, 0.0 }
0x1435   : > { %v3096_v6 = vadd.f32 %v3095_v11, %v3094_v7  ;;  %v3781_v12 = vpop.f32.mrf.mxu0  ;;  %v3786_v3 = vpop.f32.mrf.mxu1 }
0x1437   : > { %v3097_v14 = vadd.f32 %v3096_v6, %v4395_v37  ;;  %v3087_v15 = vpop.f32.mrf.mxu1  ;;  %v3884_v37 = vld [vmem:[%s4592_s1] sm:$0xff]  }
0x1438   : > { %3791 = vmatpush3.bf16.msra.mxu0 %v3884_v37 }
0x1439   : > { %v3787_v16 = vpop.f32.mrf.mxu1  ;;  %v4515_v17 = vadd.f32 %v3492_v13, %v3097_v14 }
0x143b   : > { %v3108_v18 = vsel %vm1345_vm5, %v4515_v17, 0.0 }
0x143c   : > { %3109 = vadd.xlane.f32.xlu1 %v3108_v18 }
0x14c5   : > { %v3110_v20 = vpop.xlane.xlu1 %3109 }
0x14c6   : > { %v3111_v21 = vmul.f32 0.03125, %v3110_v20 }
0x14c8   : > { %v3112_v22 = vsub.f32 %v4515_v17, %v3111_v21 }
0x14ca   : > { %v3113_v23 = vmul.f32 %v3112_v22, %v3112_v22 }
0x14cc   : > { %v3114_v24 = vsel %vm1345_vm5, %v3113_v23, 0.0 }
0x14cd   : > { %3115 = vadd.xlane.f32.xlu0 %v3114_v24 }
0x1556   : > { %v3116_v26 = vpop.xlane.xlu0 %3115 }
0x1557   : > { %v3117_v19 = vmul.f32 0.03125, %v3116_v26 }
0x1559   : > { %v3118_v27 = vadd.f32 1e-05, %v3117_v19 }
0x155b   : > { %3947 = vrsqrt.f32 %v3118_v27 }
0x1568   : > { %v3948_v28 = vpop.eup %3947 }
0x1569   : > { %v3120_v30 = vmul.f32 %v3948_v28, %v3112_v22 }
0x156b   : > { %v3127_v32 = vmul.f32 %v3493_v29, %v3120_v30 }
0x156d   : > { %v3134_v34 = vadd.f32 %v3494_v31, %v3127_v32 }
0x156f   : > { %v3135_v35 = vpack.c.bf16 %v3134_v34, %v3134_v34 }
0x1571   : > { %3793 = vmatmul.mubr.msk.bf16.vlgmr.msra.gmra.mxu0 %vm1255_vm3, %v3135_v35 }
0x1631   : > { %v3196_v41 = vpop.f32.mrf.mxu0 }
0x1632   : > { %v3197_v49 = vadd.f32 %v3495_v48, %v3196_v41 }
0x1633   : > { %v3794_v42 = vpop.f32.mrf.mxu0 }
0x1634   : > { %v3499_v50 = vmul.f32 -1.702, %v3197_v49 }
0x1635   : > { %v3199_v38 = vpop.f32.mrf.mxu0 }
0x1636   : > { %v3204_v51 = vmul.f32 1.442695, %v3499_v50 }
0x1637   : > { %v3795_v52 = vpop.f32.mrf.mxu0 }
0x1638   : > { %3949 = vpow2.f32 %v3204_v51 }
0x1645   : > { %v3950_v53 = vpop.eup %3949 }
0x1646   : > { %v3206_v54 = vadd.f32 1.0, %v3950_v53 }
0x1648   : > { %3951 = vrcp.f32 %v3206_v54 }
0x1655   : > { %v3952_v55 = vpop.eup %3951 }
0x1656   : > { %v3209_v56 = vmul.f32 %v3952_v55, %v3197_v49 }
0x1658   : > { %v3210_v33 = vpack.c.bf16 %v3209_v56, %v3209_v56 }
0x165a   : > { %3813 = vmatmul.mubr.bf16.vlgmr.msra.gmra.mxu1 %v3210_v33 }
0x171a   : > { %v3316_v58 = vpop.f32.mrf.mxu1 }
0x171b   : > { %v3317_v59 = vadd.f32 %v3500_v57, %v3316_v58 }
0x171c   : > { %v3814_v60 = vpop.f32.mrf.mxu1 }
0x171d   : > { %v3322_v61 = vadd.f32 %v3317_v59, %v4515_v17 }
0x171e   : > { %v3319_v62 = vpop.f32.mrf.mxu1 }
0x171f   : > { %3323 = vst.msk [vmem:[%s1054_s23] sm:$0x1f] %vm1345_vm5, %v3322_v61 }
0x1720   : > { %v3815_v9 = vpop.f32.mrf.mxu1 }
0x1721 PF: > { %s79_s15 = sadd.s32 1, %s3959_s15  }
0x1722   : > { %p76_p4 = scmp.ge.s32.totalorder %s79_s15, 4  }
0x1724   :  { %78 = sbr.rel (!%p76_p4) target bundleno = 53 (0x35), region = 223 }

// kernel: pyramid_transformer_forward.2
= control target key start
LH: loop header
LB: loop body
LE: loop exit
PB: predicated region body
PF: predicated region fallthrough
CT: control target
= control target key end

     0   :  { %s5296_s6 = smov 1   ;;  %s5297_s10 = smov 2   ;;  %s6243_s0 = inlined_call_operand.smem [shape: u32[35], index: -1, kind: input, shape index: {}] }
   0x1   :  { %s5346_s5 = sld [smem:[%s6243_s0]]   ;;  %s5298_s14 = smov 3  }
   0x2   :  { %s5351_s9 = sld [smem:[%s6243_s0 + %s5296_s6]]   ;;  %s5299_s18 = smov 4  }
   0x3   :  { %s5356_s13 = sld [smem:[%s6243_s0 + %s5297_s10]]   ;;  %s5300_s22 = smov 5  }
   0x4   :  { %s5361_s17 = sld [smem:[%s6243_s0 + %s5298_s14]]   ;;  %s5301_s26 = smov 6  }
   0x5   :  { %s5366_s21 = sld [smem:[%s6243_s0 + %s5299_s18]]   ;;  %s5302_s30 = smov 7  }
   0x6   :  { %s5371_s25 = sld [smem:[%s6243_s0 + %s5300_s22]]   ;;  %s5303_s4 = smov 8  }
   0x7   :  { %s5376_s29 = sld [smem:[%s6243_s0 + %s5301_s26]]   ;;  %s5304_s10 = smov 9  }
   0x8   :  { %s5381_s3 = sld [smem:[%s6243_s0 + %s5302_s30]]   ;;  %s5305_s15 = smov 10  }
   0x9   :  { %s5386_s8 = sld [smem:[%s6243_s0 + %s5303_s4]]   ;;  %s5306_s20 = smov 11  }
   0xa   :  { %s5391_s14 = sld [smem:[%s6243_s0 + %s5304_s10]]   ;;  %s5307_s26 = smov 12  }
   0xb   :  { %s5396_s19 = sld [smem:[%s6243_s0 + %s5305_s15]]   ;;  %s5308_s1 = smov 13  }
   0xc   :  { %s5401_s24 = sld [smem:[%s6243_s0 + %s5306_s20]]   ;;  %s5309_s7 = smov 14  }
   0xd   :  { %s5406_s30 = sld [smem:[%s6243_s0 + %s5307_s26]]   ;;  %s5310_s15 = smov 15  }
   0xe   :  { %s5411_s6 = sld [smem:[%s6243_s0 + %s5308_s1]]   ;;  %s5311_s22 = smov 16  }
   0xf   :  { %s5416_s12 = sld [smem:[%s6243_s0 + %s5309_s7]]   ;;  %s5312_s28 = smov 17  }
  0x10   :  { %s5421_s20 = sld [smem:[%s6243_s0 + %s5310_s15]]   ;;  %s5313_s7 = smov 18  }
  0x11   :  { %s5426_s27 = sld [smem:[%s6243_s0 + %s5311_s22]]   ;;  %s5314_s15 = smov 19  }
  0x12   :  { %s5431_s4 = sld [smem:[%s6243_s0 + %s5312_s28]]   ;;  %s5315_s22 = smov 20  }
  0x13   :  { %6252 = sst [smem:[#allocation2_spill]] %s5406_s30  ;;  %s5316_s28 = smov 21  }
  0x14   :  { %6253 = sst [smem:[#allocation3_spill]] %s5411_s6 }
  0x15   :  { %s5436_s6 = sld [smem:[%s6243_s0 + %s5313_s7]]   ;;  %s5317_s7 = smov 22  }
  0x16   :  { %s5441_s30 = sld [smem:[%s6243_s0 + %s5314_s15]]   ;;  %s5318_s15 = smov 23  }
  0x17   :  { %6254 = sst [smem:[#allocation4_spill]] %s5426_s27 }
  0x18   :  { %6255 = sst [smem:[#allocation5_spill]] %s5431_s4 }
  0x19   :  { %s5446_s27 = sld [smem:[%s6243_s0 + %s5315_s22]]   ;;  %s5319_s22 = smov 24  }
  0x1a   :  { %s5451_s4 = sld [smem:[%s6243_s0 + %s5316_s28]]   ;;  %s5320_s28 = smov 25  }
  0x1b   :  { %6256 = sst [smem:[#allocation6_spill]] %s5436_s6 }
  0x1c   :  { %6257 = sst [smem:[#allocation7_spill]] %s5441_s30 }
  0x1d   :  { %s5456_s6 = sld [smem:[%s6243_s0 + %s5317_s7]]   ;;  %s5321_s7 = smov 26  }
  0x1e   :  { %s5461_s30 = sld [smem:[%s6243_s0 + %s5318_s15]]   ;;  %s5322_s15 = smov 27  }
  0x1f   :  { %6258 = sst [smem:[#allocation8_spill]] %s5446_s27 }
  0x20   :  { %6259 = sst [smem:[#allocation9_spill]] %s5451_s4 }
  0x21   :  { %s5466_s27 = sld [smem:[%s6243_s0 + %s5319_s22]]   ;;  %s5323_s22 = smov 28  }
  0x22   :  { %s5471_s4 = sld [smem:[%s6243_s0 + %s5320_s28]]   ;;  %s5324_s28 = smov 29  }
  0x23   :  { %6260 = sst [smem:[#allocation10_spill]] %s5456_s6 }
  0x24   :  { %6261 = sst [smem:[#allocation11_spill]] %s5461_s30 }
  0x25   :  { %s5476_s6 = sld [smem:[%s6243_s0 + %s5321_s7]]   ;;  %s5325_s7 = smov 30  }
  0x26   :  { %s5481_s30 = sld [smem:[%s6243_s0 + %s5322_s15]]   ;;  %s5326_s15 = smov 31  }
  0x27   :  { %6262 = sst [smem:[#allocation12_spill]] %s5466_s27 }
  0x28   :  { %6263 = sst [smem:[#allocation13_spill]] %s5471_s4 }
  0x29   :  { %s5486_s27 = sld [smem:[%s6243_s0 + %s5323_s22]]   ;;  %s5327_s22 = smov 32  }
  0x2a   :  { %s5491_s4 = sld [smem:[%s6243_s0 + %s5324_s28]]   ;;  %s5328_s28 = smov 33  }
  0x2b   :  { %6264 = sst [smem:[#allocation14_spill]] %s5476_s6 }
  0x2c   :  { %6265 = sst [smem:[#allocation15_spill]] %s5481_s30 }
  0x2d   :  { %s5496_s6 = sld [smem:[%s6243_s0 + %s5325_s7]]   ;;  %s5329_s7 = smov 34  }
  0x2e   :  { %s5501_s30 = sld [smem:[%s6243_s0 + %s5326_s15]]   ;;  %s5518_s15 = smov 0  }
  0x2f   :  { %6266 = sst [smem:[#allocation16_spill]] %s5486_s27 }
  0x30   :  { %6267 = sst [smem:[#allocation17_spill]] %s5491_s4 }
  0x31   :  { %s5506_s27 = sld [smem:[%s6243_s0 + %s5327_s22]]  }
  0x32   :  { %s5511_s4 = sld [smem:[%s6243_s0 + %s5328_s28]]  }
  0x33   :  { %6268 = sst [smem:[#allocation18_spill]] %s5496_s6 }
  0x34   :  { %s5516_s6 = sld [smem:[%s6243_s0 + %s5329_s7]]  }
  0x35 LB: > { %s4450_s16 = sadd.s32 4294967295, %s5294_s15   ;;  %p4454_p0 = scmp.ge.s32.totalorder %s5294_s15, 1  ;;  %s5294_s15 = sphi %s5518_s15, %s79_s15  }
  0x36   : > { %p955_p1 = scmp.lt.s32.totalorder %s5294_s15, 3 }
  0x38   : > { %p956_p2 = pnand %p4454_p0, %p955_p1 }
  0x39   : > { %p1044_p3 = scmp.lt.s32.totalorder (!%p956_p2), %s4450_s16, 1  ;;  %s5332_s23 = smov (!%p956_p2), 120  }
  0x3a   : > { %959 = sbr.rel (%p956_p2) target bundleno = 6071 (0x17b7), region = 156  ;;  %s5333_s26 = smov (!%p956_p2), 112  }
  0x3b   : > { %s5334_s28 = smov (!%p956_p2), 96   ;;  %s5335_s1 = smov (!%p956_p2), 104  }
  0x3c   : > { %s6250_s2 = smov (!%p956_p2), 64   ;;  %s6269_s7 = sld [smem:[#allocation2_spill]] (!%p956_p2) }
  0x3d   : > { %s6270_s10 = sld [smem:[#allocation3_spill]] (!%p956_p2) }
  0x3e   : > { %s6271_s11 = sld [smem:[#allocation6_spill]] (!%p956_p2) }
  0x3f   : > { %v1078_v0 = vlaneseq  ;;  %v1076_v1 = vld [vmem:[%s5356_s13] sm:$0xff]  ;;  %s6288_s16 = smov (!%p1044_p3, %s4450_s16), 1  ;;  %v5573_v46 = vld [vmem:[%s5356_s13 + $0x8] ss:$0 sm:$0xff]  ;;  %vm1264_vm0 = vcmask 1043456   ;;  %vm1278_vm1 = vcmask 261120  }
  0x40   : > { %s4982_s0 = smul.u32 160, %s6288_s16  ;;  %vm5331_vm2 = vmmov 0   ;;  %s1046_s22 = scalar_lea.vmem %s5346_s5, %s6288_s16  ;;  %vm1477_vm3 = vcmask 1040384   ;;  %vm1493_vm4 = vcmask 253952   ;;  %vm1709_vm5 = vcmask 64512  }
  0x41   : > { %v1079_v2 = vshrl.u32 %v1078_v0, 7  ;;  %vm1975_vm6 = vcmask 131072   ;;  %vm1968_vm7 = vcmask 138240  }
  0x42   : > { %s5531_s18 = scalar_lea.vmem %s5351_s9, %s4982_s0  ;;  %s6272_s0 = sld [smem:[#allocation4_spill]] }
  0x43   : > { %v1080_v3 = vsub.s32 0, %v1079_v2  ;;  %v1092_v4 = vsub.s32 1, %v1079_v2  ;;  %v1116_v5 = vsub.s32 2, %v1079_v2  ;;  %v1140_v6 = vsub.s32 3, %v1079_v2  ;;  %v1058_v14 = vld [vmem:[%s5531_s18 + $0x8] sm:$0x1f] }
  0x44   : > { %v1152_v7 = vsub.s32 4, %v1079_v2  ;;  %v1176_v8 = vsub.s32 5, %v1079_v2  ;;  %v1200_v9 = vsub.s32 6, %v1079_v2  ;;  %v1212_v10 = vsub.s32 7, %v1079_v2  ;;  %v1059_v15 = vld [vmem:[%s5531_s18 + $0x10] sm:$0x1f] }
  0x45   : > { %v5533_v11 = vrot.slane %v1076_v1, %v1080_v3  ;;  %v5535_v12 = vrot.slane %v1076_v1, %v1092_v4  ;;  %v5537_v13 = vrot.slane %v1076_v1, %v1140_v6  ;;  %v1062_v16 = vld [vmem:[%s5531_s18 + $0x30] sm:$0x1f]  ;;  %v5542_v17 = vrot.slane %v1076_v1, %v1116_v5  ;;  %v1063_v19 = vld [vmem:[%s5531_s18 + $0x38] sm:$0x1f]  ;;  %v1068_v26 = vld [vmem:[%s5531_s18 + $0x60] sm:$0x1f] }
  0x46   : > { %v5544_v18 = vrot.slane %v1076_v1, %v1152_v7  ;;  %v1066_v20 = vld [vmem:[%s5531_s18 + $0x50] sm:$0x1f]  ;;  %v1067_v21 = vld [vmem:[%s5531_s18 + $0x58] sm:$0x1f]  ;;  %v5550_v23 = vrot.slane %v1076_v1, %v1176_v8  ;;  %v5552_v24 = vrot.slane %v1076_v1, %v1200_v9  ;;  %v5554_v25 = vrot.slane %v1076_v1, %v1212_v10  ;;  %v1072_v28 = vld [vmem:[%s5531_s18 + $0x80] sm:$0x1f] }
  0x47   : > { %v1142_v22 = vmul.f32 %v5537_v13, %v1062_v16  ;;  %v1071_v27 = vld [vmem:[%s5531_s18 + $0x78] sm:$0x1f]  ;;  %v1094_v29 = vmul.f32 %v5535_v12, %v1066_v20  ;;  %v1095_v30 = vmul.f32 %v5535_v12, %v1067_v21  ;;  %v1143_v31 = vmul.f32 %v5537_v13, %v1063_v19  ;;  %v1073_v33 = vld [vmem:[%s5531_s18 + $0x88] sm:$0x1f]  ;;  %v5576_v51 = vld [vmem:[%s5531_s18 + $0x90] sm:$0x1f] }
  0x48   : > { %v1154_v32 = vmul.f32 %v5544_v18, %v1058_v14  ;;  %v1082_v34 = vmul.f32 %v5533_v11, %v1071_v27  ;;  %v1083_v35 = vmul.f32 %v5533_v11, %v1072_v28  ;;  %v1096_v36 = vmul.f32 %v5535_v12, %v1068_v26  ;;  %v1069_v56 = vld [vmem:[%s5531_s18 + $0x68] sm:$0x1f]  ;;  %v1064_v61 = vld [vmem:[%s5531_s18 + $0x40] sm:$0x1f]  ;;  %v1060_v7 = vld [vmem:[%s5531_s18 + $0x18] sm:$0x1f] }
  0x49   : > { %v1118_v37 = vmul.f32 %v5542_v17, %v1071_v27  ;;  %v1084_v38 = vmul.f32 %v5533_v11, %v1073_v33  ;;  %v1102_v39 = vrot.slane %v1094_v29, 1  ;;  %v1103_v40 = vrot.slane %v1095_v30, 1  ;;  %v1065_v2 = vld [vmem:[%s5531_s18 + $0x48] sm:$0x1f]  ;;  %v1061_v8 = vld [vmem:[%s5531_s18 + $0x20] sm:$0x1f] }
  0x4a   : > { %v1119_v41 = vmul.f32 %v5542_v17, %v1072_v28  ;;  %v1104_v42 = vrot.slane %v1096_v36, 1  ;;  %v1120_v43 = vmul.f32 %v5542_v17, %v1073_v33  ;;  %v1155_v45 = vmul.f32 %v5544_v18, %v1059_v15 }
  0x4b   : > { %v1126_v44 = vrot.slane %v1118_v37, 1  ;;  %v1110_v47 = vadd.f32 %v1102_v39, %v1082_v34  ;;  %v1111_v48 = vadd.f32 %v1103_v40, %v1083_v35  ;;  %v1162_v50 = vrot.slane %v1154_v32, 1 }
  0x4c   : > { %v1127_v49 = vrot.slane %v1119_v41, 1  ;;  %v1112_v52 = vadd.f32 %v1104_v42, %v1084_v38  ;;  %v1128_v53 = vrot.slane %v1120_v43, 1  ;;  %v1163_v54 = vrot.slane %v1155_v45, 1  ;;  %v1075_v38 = vld [vmem:[%s5531_s18 + $0x98] sm:$0x1f] }
  0x4d   : > { %v1178_v55 = vmul.f32 %v5550_v23, %v1062_v16  ;;  %v1134_v57 = vadd.f32 %v1126_v44, %v1110_v47  ;;  %v1179_v59 = vmul.f32 %v5550_v23, %v1063_v19  ;;  %v1202_v60 = vmul.f32 %v5552_v24, %v1072_v28 }
  0x4e   : > { %v1135_v58 = vadd.f32 %v1127_v49, %v1111_v48  ;;  %v1136_v62 = vadd.f32 %v1128_v53, %v1112_v52  ;;  %v1203_v0 = vmul.f32 %v5552_v24, %v1073_v33  ;;  %v1214_v1 = vmul.f32 %v5554_v25, %v1067_v21  ;;  %v4458_v53 = vld [vmem:[%s5361_s17] ss:$0 sm:$0xff] }
  0x4f   : > { %v1186_v63 = vrot.slane %v1178_v55, 1  ;;  %v1146_v3 = vadd.f32 %v1142_v22, %v1134_v57  ;;  %v1187_v5 = vrot.slane %v1179_v59, 1  ;;  %v1215_v6 = vmul.f32 %v5554_v25, %v1068_v26 }
  0x50   : > { %v1147_v4 = vadd.f32 %v1143_v31, %v1135_v58  ;;  %v1222_v9 = vrot.slane %v1214_v1, 1  ;;  %v1238_v10 = vmul.f32 %v5573_v46, %v1072_v28  ;;  %v1239_v14 = vmul.f32 %v5573_v46, %v1073_v33  ;;  %v1070_v33 = vld [vmem:[%s5531_s18 + $0x70] sm:$0x1f]  ;;  %s6273_s18 = sld [smem:[#allocation5_spill]] }
  0x51   : > { %v1085_v15 = vmul.f32 %v5533_v11, %v5576_v51  ;;  %v1170_v16 = vadd.f32 %v1162_v50, %v1146_v3  ;;  %v1223_v20 = vrot.slane %v1215_v6, 1  ;;  %v1097_v21 = vmul.f32 %v5535_v12, %v1069_v56 }
  0x52   : > { %v1171_v19 = vadd.f32 %v1163_v54, %v1147_v4  ;;  %v1246_v22 = vrot.slane %v1238_v10, 1  ;;  %v1247_v27 = vrot.slane %v1239_v14, 1  ;;  %v1121_v26 = vmul.f32 %v5542_v17, %v5576_v51 }
  0x53   : > { %v1144_v29 = vmul.f32 %v5537_v13, %v1064_v61  ;;  %v1194_v30 = vadd.f32 %v1186_v63, %v1170_v16  ;;  %v1105_v31 = vrot.slane %v1097_v21, 1  ;;  %v1145_v32 = vmul.f32 %v5537_v13, %v1065_v2 }
  0x54   : > { %v1195_v28 = vadd.f32 %v1187_v5, %v1171_v19  ;;  %v1129_v11 = vrot.slane %v1121_v26, 1  ;;  %v1156_v35 = vmul.f32 %v5544_v18, %v1060_v7  ;;  %v1157_v12 = vmul.f32 %v5544_v18, %v1061_v8 }
  0x55   : > { %v1148_v34 = vadd.f32 %v1144_v29, %v1136_v62  ;;  %v1206_v36 = vadd.f32 %v1202_v60, %v1194_v30  ;;  %v1113_v39 = vadd.f32 %v1105_v31, %v1085_v15  ;;  %v1180_v17 = vmul.f32 %v5550_v23, %v1064_v61 }
  0x56   : > { %v1207_v37 = vadd.f32 %v1203_v0, %v1195_v28  ;;  %v1164_v40 = vrot.slane %v1156_v35, 1  ;;  %v1165_v41 = vrot.slane %v1157_v12, 1  ;;  %v1181_v42 = vmul.f32 %v5550_v23, %v1065_v2  ;;  %v4459_v35 = vld [vmem:[%s5366_s21] ss:$0 sm:$0xff] }
  0x57   : > { %v1230_v43 = vadd.f32 %v1222_v9, %v1206_v36  ;;  %v1137_v44 = vadd.f32 %v1129_v11, %v1113_v39  ;;  %v1188_v45 = vrot.slane %v1180_v17, 1  ;;  %v1204_v18 = vmul.f32 %v5552_v24, %v5576_v51  ;;  %v4460_v36 = vld [vmem:[%s5371_s25] ss:$0 sm:$0xff] }
  0x58   : > { %v1231_v13 = vadd.f32 %v1223_v20, %v1207_v37  ;;  %v1172_v47 = vadd.f32 %v1164_v40, %v1148_v34  ;;  %v1189_v48 = vrot.slane %v1181_v42, 1  ;;  %v1216_v49 = vmul.f32 %v5554_v25, %v1069_v56 }
  0x59   : > { %v1254_v50 = vadd.f32 %v1246_v22, %v1230_v43  ;;  %v1149_v54 = vadd.f32 %v1145_v32, %v1137_v44  ;;  %v1217_v55 = vmul.f32 %v5554_v25, %v1070_v33  ;;  %v1205_v23 = vmul.f32 %v5552_v24, %v1075_v38 }
  0x5a   : > { %v1255_v52 = vadd.f32 %v1247_v27, %v1231_v13  ;;  %v1196_v57 = vadd.f32 %v1188_v45, %v1172_v47  ;;  %v1224_v58 = vrot.slane %v1216_v49, 1  ;;  %v1240_v61 = vmul.f32 %v5573_v46, %v5576_v51  ;;  %v5094_v13 = vld [vmem:[%s5376_s29 + $0x8] sm:$0xff]   ;;  %v5095_v45 = vld [vmem:[%s5376_s29] sm:$0xff]  }
  0x5b   : > { %v1173_v60 = vadd.f32 %v1165_v41, %v1149_v54  ;;  %v1241_v62 = vmul.f32 %v5573_v46, %v1075_v38  ;;  %v1225_v63 = vrot.slane %v1217_v55, 1  ;;  %v5330_v44 = vmov 0.0  }
  0x5c   : > { %v1259_v59 = vrot.slane %v1255_v52, 4  ;;  %v1208_v56 = vadd.f32 %v1204_v18, %v1196_v57  ;;  %v1248_v4 = vrot.slane %v1240_v61, 1  ;;  %4702 = vmatprep.subr.bf16.mxu0 %v5330_v44  ;;  %4706 = vmatprep.mubr.msk.bf16.mxu0 %vm5331_vm2, %v5330_v44 }
  0x5d   : > { %v1197_v1 = vadd.f32 %v1189_v48, %v1173_v60  ;;  %v1249_v5 = vrot.slane %v1241_v62, 1  ;;  %4703 = vmatpush3.bf16.msra.mxu0 %v5094_v13  ;;  %v4463_v62 = vld [vmem:[%s5381_s3] ss:$0 sm:$0xff] }
  0x5e   : > { %v1265_v0 = vsel %vm1264_vm0, %v1254_v50, %v1259_v59  ;;  %v1232_v3 = vadd.f32 %v1224_v58, %v1208_v56  ;;  %4704 = vmatprep.subr.bf16.mxu0 %v5330_v44 }
  0x5f   : > { %v1274_v2 = vadd.f32 %v4458_v53, %v1265_v0  ;;  %v1209_v25 = vadd.f32 %v1205_v23, %v1197_v1 }
  0x60   : > { %v1256_v7 = vadd.f32 %v1248_v4, %v1232_v3 }
  0x61   : > { %v1279_v24 = vsel %vm1278_vm1, %v1274_v2, 0.0  ;;  %v1233_v6 = vadd.f32 %v1225_v63, %v1209_v25  ;;  %4705 = vmatpush3.bf16.msra.mxu0 %v5095_v45 }
  0x62   : > { %1280 = vadd.xlane.f32.xlu0 %v1279_v24 }
  0x63   : > { %v1257_v8 = vadd.f32 %v1249_v5, %v1233_v6 }
  0x65   : > { %v1262_v51 = vrot.slane %v1257_v8, 4 }
  0x67   : > { %v1266_v46 = vsel %vm1264_vm0, %v1256_v7, %v1262_v51 }
  0x68   : > { %v1275_v9 = vadd.f32 %v4458_v53, %v1266_v46 }
  0x6a   : > { %v1282_v10 = vsel %vm1278_vm1, %v1275_v9, 0.0 }
  0x6b   : > { %1283 = vadd.xlane.f32.xlu0 %v1282_v10 }
  0xeb   : > { %v1281_v14 = vpop.xlane.xlu0 %1280 }
  0xec   : > { %v1286_v15 = vmul.f32 0.03125, %v1281_v14 }
  0xee   : > { %v1288_v16 = vsub.f32 %v1274_v2, %v1286_v15 }
  0xf0   : > { %v1290_v19 = vmul.f32 %v1288_v16, %v1288_v16 }
  0xf2   : > { %v1292_v20 = vsel %vm1278_vm1, %v1290_v19, 0.0 }
  0xf3   : > { %1293 = vadd.xlane.f32.xlu1 %v1292_v20 }
  0xf4   : > { %v1284_v21 = vpop.xlane.xlu0 %1283 }
  0xf5   : > { %v1287_v22 = vmul.f32 0.03125, %v1284_v21 }
  0xf7   : > { %v1289_v27 = vsub.f32 %v1275_v9, %v1287_v22 }
  0xf9   : > { %v1291_v26 = vmul.f32 %v1289_v27, %v1289_v27 }
  0xfb   : > { %v1295_v29 = vsel %vm1278_vm1, %v1291_v26, 0.0 }
  0xfc   : > { %1296 = vadd.xlane.f32.xlu1 %v1295_v29 }
 0x17c   : > { %v1294_v30 = vpop.xlane.xlu1 %1293 }
 0x17d   : > { %v1298_v28 = vmul.f32 0.03125, %v1294_v30 }
 0x17f   : > { %v1300_v31 = vadd.f32 1e-05, %v1298_v28 }
 0x181   : > { %5120 = vrsqrt.f32 %v1300_v31 }
 0x185   : > { %v1297_v32 = vpop.xlane.xlu1 %1296 }
 0x186   : > { %v1299_v33 = vmul.f32 0.03125, %v1297_v32 }
 0x188   : > { %v1301_v11 = vadd.f32 1e-05, %v1299_v33 }
 0x18a   : > { %5122 = vrsqrt.f32 %v1301_v11 }
 0x18e   : > { %v5121_v34 = vpop.eup %5120 }
 0x18f   : > { %v1304_v12 = vmul.f32 %v5121_v34, %v1288_v16 }
 0x191   : > { %v1312_v37 = vmul.f32 %v4459_v35, %v1304_v12 }
 0x193   : > { %v5621_v38 = vadd.f32 %v4460_v36, %v1312_v37  ;;  %v4469_v37 = vld [vmem:[%s5386_s8] ss:$0 sm:$0xff] }
 0x195   : > { %v1322_v39 = vsel %vm1278_vm1, %v5621_v38, 0.0 }
 0x196   : > { %1323 = vadd.xlane.f32.xlu0 %v1322_v39 }
 0x197   : > { %v5123_v17 = vpop.eup %5122 }
 0x198   : > { %v1305_v40 = vmul.f32 %v5123_v17, %v1289_v27  ;;  %v4470_v17 = vld [vmem:[%s5391_s14] ss:$0 sm:$0xff] }
 0x19a   : > { %v1313_v41 = vmul.f32 %v4459_v35, %v1305_v40 }
 0x19c   : > { %v5625_v42 = vadd.f32 %v4460_v36, %v1313_v41 }
 0x19e   : > { %v1325_v43 = vsel %vm1278_vm1, %v5625_v42, 0.0 }
 0x19f   : > { %1326 = vadd.xlane.f32.xlu1 %v1325_v43 }
 0x21f   : > { %v1324_v47 = vpop.xlane.xlu0 %1323 }
 0x220   : > { %v4461_v48 = vmul.f32 -0.03125, %v1324_v47  ;;  %v1474_v47 = vld [vmem:[%s1046_s22] sm:$0x1]  ;;  %s6274_s22 = sld [smem:[#allocation8_spill]] }
 0x222   : > { %v1332_v18 = vmul.f32 1.442695, %v4461_v48 }
 0x224   : > { %5124 = vpow2.f32 %v1332_v18 }
 0x228   : > { %v1327_v49 = vpop.xlane.xlu1 %1326 }
 0x229   : > { %v4462_v50 = vmul.f32 -0.03125, %v1327_v49 }
 0x22b   : > { %v1334_v52 = vmul.f32 1.442695, %v4462_v50 }
 0x22d   : > { %5126 = vpow2.f32 %v1334_v52 }
 0x231   : > { %v5125_v53 = vpop.eup %5124 }
 0x232   : > { %v1336_v54 = vadd.f32 1.0, %v5125_v53 }
 0x234   : > { %5128 = vrcp.f32 %v1336_v54 }
 0x23a   : > { %v5127_v55 = vpop.eup %5126 }
 0x23b   : > { %v1337_v57 = vadd.f32 1.0, %v5127_v55 }
 0x23d   : > { %5130 = vrcp.f32 %v1337_v57 }
 0x241   : > { %v5129_v23 = vpop.eup %5128 }
 0x242   : > { %v1342_v59 = vmul.f32 %v5129_v23, %v5621_v38 }
 0x24a   : > { %v5131_v58 = vpop.eup %5130 }
 0x24b   : > { %v1343_v60 = vmul.f32 %v5131_v58, %v5625_v42 }
 0x24d   : > { %v1344_v61 = vpack.c.bf16 %v1343_v60, %v1342_v59 }
 0x24f   : > { %4707 = vmatmul.mubr.msk.bf16.vlgmr.msra.gmra.mxu0 %vm1278_vm1, %v1344_v61 }
 0x30f   : > { %v1405_v56 = vpop.f32.mrf.mxu0 }
 0x310   : > { %v1406_v63 = vadd.f32 %v4463_v62, %v1405_v56 }
 0x311   : > { %v4708_v0 = vpop.f32.mrf.mxu0 }
 0x312   : > { %v4467_v1 = vmul.f32 -1.702, %v1406_v63 }
 0x313   : > { %v1408_v2 = vpop.f32.mrf.mxu0 }
 0x314   : > { %v1416_v25 = vmul.f32 1.442695, %v4467_v1  ;;  %v1409_v3 = vadd.f32 %v4463_v62, %v1408_v2 }
 0x315   : > { %v4709_v4 = vpop.f32.mrf.mxu0 }
 0x316   : > { %5132 = vpow2.f32 %v1416_v25  ;;  %v4468_v5 = vmul.f32 -1.702, %v1409_v3  ;;  %v5096_v4 = vld [vmem:[%s5396_s19 + $0x8] sm:$0xff]  }
 0x317   : > { %4710 = vmatprep.subr.bf16.mxu0 %v5096_v4 }
 0x318   : > { %v1418_v24 = vmul.f32 1.442695, %v4468_v5  ;;  %v5097_v5 = vld [vmem:[%s5396_s19] sm:$0xff]   ;;  %4711 = vmatpush3.bf16.msra.mxu0 %v5096_v4 }
 0x319   : > { %4712 = vmatprep.subr.bf16.mxu0 %v5097_v5 }
 0x31a   : > { %5134 = vpow2.f32 %v1418_v24 }
 0x31c   : > { %4713 = vmatpush3.bf16.msra.mxu0 %v5097_v5 }
 0x323   : > { %v5133_v6 = vpop.eup %5132 }
 0x324   : > { %v1420_v7 = vadd.f32 1.0, %v5133_v6 }
 0x326   : > { %5136 = vrcp.f32 %v1420_v7 }
 0x327   : > { %v5135_v8 = vpop.eup %5134 }
 0x328   : > { %v1421_v51 = vadd.f32 1.0, %v5135_v8 }
 0x32a   : > { %5138 = vrcp.f32 %v1421_v51 }
 0x333   : > { %v5137_v46 = vpop.eup %5136 }
 0x334   : > { %v1426_v9 = vmul.f32 %v5137_v46, %v1406_v63 }
 0x336   : > { %v1430_v10 = vsel %vm1278_vm1, %v1426_v9, 0.0 }
 0x337   : > { %v5139_v14 = vpop.eup %5138  ;;  %1431 = vadd.xlane.f32.xlu0 %v1430_v10 }
 0x338   : > { %v1427_v15 = vmul.f32 %v5139_v14, %v1409_v3 }
 0x33a   : > { %v1433_v16 = vsel %vm1278_vm1, %v1427_v15, 0.0 }
 0x33b   : > { %1434 = vadd.xlane.f32.xlu1 %v1433_v16 }
 0x3c0   : > { %v1432_v19 = vpop.xlane.xlu0 %1431 }
 0x3c1   : > { %v1436_v20 = vmul.f32 0.03125, %v1432_v19  ;;  %v4471_v19 = vld [vmem:[%s5416_s12] ss:$0 sm:$0xff] }
 0x3c3   : > { %v1438_v21 = vsub.f32 %v1426_v9, %v1436_v20 }
 0x3c4   : > { %v1435_v22 = vpop.xlane.xlu1 %1434 }
 0x3c5   : > { %v1437_v27 = vmul.f32 0.03125, %v1435_v22  ;;  %v1440_v26 = vmul.f32 %v1438_v21, %v1438_v21 }
 0x3c7   : > { %v1439_v29 = vsub.f32 %v1427_v15, %v1437_v27  ;;  %v1442_v30 = vsel %vm1278_vm1, %v1440_v26, 0.0 }
 0x3c8   : > { %1443 = vadd.xlane.f32.xlu0 %v1442_v30 }
 0x3c9   : > { %v1441_v28 = vmul.f32 %v1439_v29, %v1439_v29 }
 0x3cb   : > { %v1445_v31 = vsel %vm1278_vm1, %v1441_v28, 0.0 }
 0x3cc   : > { %1446 = vadd.xlane.f32.xlu1 %v1445_v31 }
 0x451   : > { %v1444_v32 = vpop.xlane.xlu0 %1443 }
 0x452   : > { %v1448_v33 = vmul.f32 0.03125, %v1444_v32 }
 0x454   : > { %v1450_v11 = vadd.f32 1e-05, %v1448_v33 }
 0x455   : > { %v1447_v34 = vpop.xlane.xlu1 %1446 }
 0x456   : > { %5140 = vrsqrt.f32 %v1450_v11  ;;  %v1449_v35 = vmul.f32 0.03125, %v1447_v34 }
 0x458   : > { %v1451_v12 = vadd.f32 1e-05, %v1449_v35  ;;  %v4473_v35 = vld [vmem:[%s5401_s24] ss:$0 sm:$0xff] }
 0x45a   : > { %5142 = vrsqrt.f32 %v1451_v12 }
 0x463   : > { %v5141_v36 = vpop.eup %5140 }
 0x464   : > { %v1454_v39 = vmul.f32 %v5141_v36, %v1438_v21 }
 0x466   : > { %v1462_v40 = vmul.f32 %v4469_v37, %v1454_v39 }
 0x467   : > { %v5143_v41 = vpop.eup %5142 }
 0x468   : > { %v1455_v43 = vmul.f32 %v5143_v41, %v1439_v29  ;;  %v1470_v13 = vadd.f32 %v4470_v17, %v1462_v40  ;;  %v4472_v29 = vld [vmem:[%s5421_s20] ss:$0 sm:$0xff] }
 0x46a   : > { %v1463_v44 = vmul.f32 %v4469_v37, %v1455_v43  ;;  %v1472_v45 = vadd.f32 %v1470_v13, %v5621_v38 }
 0x46c   : > { %v1471_v48 = vadd.f32 %v4470_v17, %v1463_v44  ;;  %v1478_v18 = vrot.slane %v1472_v45, 7 }
 0x46e   : > { %v5645_v49 = vsel %vm1477_vm3, %v1474_v47, %v1478_v18  ;;  %v1473_v50 = vadd.f32 %v1471_v48, %v5625_v42 }
 0x46f   : > { %v1487_v52 = vsel %vm1278_vm1, %v5645_v49, 0.0 }
 0x470   : > { %1488 = vadd.xlane.f32.xlu0 %v1487_v52  ;;  %v5650_v53 = vrot.slane %v1473_v50, 7 }
 0x472   : > { %v5654_v54 = vsel %vm1477_vm3, %v1478_v18, %v5650_v53  ;;  %v1494_v38 = vsel %vm1493_vm4, %v5650_v53, 0.0 }
 0x473   : > { %v1490_v55 = vsel %vm1278_vm1, %v5654_v54, 0.0 }
 0x474   : > { %1491 = vadd.xlane.f32.xlu1 %v1490_v55  ;;  %1495 = vadd.xlane.f32.xlu0 %v1494_v38 }
 0x4f9   : > { %v1489_v42 = vpop.xlane.xlu0 %1488 }
 0x4fa   : > { %v1497_v57 = vmul.f32 0.03125, %v1489_v42 }
 0x4fc   : > { %v1500_v23 = vsub.f32 %v5645_v49, %v1497_v57 }
 0x4fd   : > { %v1492_v58 = vpop.xlane.xlu1 %1491  ;;  %v1496_v59 = vpop.xlane.xlu0 %1495 }
 0x4fe   : > { %v1498_v60 = vmul.f32 0.03125, %v1492_v58  ;;  %v1499_v61 = vmul.f32 0.03125, %v1496_v59  ;;  %v1503_v62 = vmul.f32 %v1500_v23, %v1500_v23 }
 0x500   : > { %v1501_v56 = vsub.f32 %v5654_v54, %v1498_v60  ;;  %v1502_v63 = vsub.f32 %v5650_v53, %v1499_v61  ;;  %v1506_v0 = vsel %vm1278_vm1, %v1503_v62, 0.0 }
 0x501   : > { %1507 = vadd.xlane.f32.xlu1 %v1506_v0 }
 0x502   : > { %v1504_v1 = vmul.f32 %v1501_v56, %v1501_v56  ;;  %v1505_v2 = vmul.f32 %v1502_v63, %v1502_v63 }
 0x504   : > { %v1509_v25 = vsel %vm1278_vm1, %v1504_v1, 0.0  ;;  %v1512_v3 = vsel %vm1493_vm4, %v1505_v2, 0.0 }
 0x505   : > { %1510 = vadd.xlane.f32.xlu0 %v1509_v25  ;;  %1513 = vadd.xlane.f32.xlu1 %v1512_v3 }
 0x58a   : > { %v1508_v24 = vpop.xlane.xlu1 %1507 }
 0x58b   : > { %v1515_v6 = vmul.f32 0.03125, %v1508_v24 }
 0x58d   : > { %v1518_v7 = vadd.f32 1e-05, %v1515_v6 }
 0x58e   : > { %v1514_v8 = vpop.xlane.xlu1 %1513  ;;  %v1511_v51 = vpop.xlane.xlu0 %1510 }
 0x58f   : > { %5144 = vrsqrt.f32 %v1518_v7  ;;  %v1517_v46 = vmul.f32 0.03125, %v1514_v8  ;;  %v1516_v9 = vmul.f32 0.03125, %v1511_v51 }
 0x591   : > { %v1520_v10 = vadd.f32 1e-05, %v1517_v46  ;;  %v1519_v14 = vadd.f32 1e-05, %v1516_v9 }
 0x593   : > { %5146 = vrsqrt.f32 %v1520_v10 }
 0x594   : > { %5148 = vrsqrt.f32 %v1519_v14 }
 0x59c   : > { %v5145_v15 = vpop.eup %5144 }
 0x59d   : > { %v1524_v16 = vmul.f32 %v5145_v15, %v1500_v23 }
 0x59f   : > { %v1533_v26 = vmul.f32 %v4471_v19, %v1524_v16 }
 0x5a0   : > { %v5147_v20 = vpop.eup %5146 }
 0x5a1   : > { %v5149_v21 = vpop.eup %5148  ;;  %v1526_v22 = vmul.f32 %v5147_v20, %v1502_v63  ;;  %v1542_v32 = vadd.f32 %v4472_v29, %v1533_v26 }
 0x5a2   : > { %v1525_v27 = vmul.f32 %v5149_v21, %v1501_v56 }
 0x5a3   : > { %v1535_v30 = vmul.f32 %v4471_v19, %v1526_v22 }
 0x5a4   : > { %v1534_v28 = vmul.f32 %v4471_v19, %v1525_v27 }
 0x5a5   : > { %v1544_v31 = vadd.f32 %v4472_v29, %v1535_v30 }
 0x5a6   : > { %v1543_v33 = vadd.f32 %v4472_v29, %v1534_v28 }
 0x5a7   : > { %v1546_v11 = vpack.c.bf16 %v1544_v31, %v1544_v31 }
 0x5a8   : > { %v1545_v34 = vpack.c.bf16 %v1543_v33, %v1542_v32 }
 0x5aa   : > { %4714 = vmatprep.mubr.msk.bf16.mxu0 %vm1278_vm1, %v1545_v34 }
 0x5ab   : > { %4715 = vmatmul.mubr.msk.bf16.vlgmr.msra.gmra.mxu0 %vm1278_vm1, %v1546_v11 }
 0x66b   : > { %v4716_v12 = vpop.f32.mrf.mxu0 }
 0x66c   : > { %v1619_v36 = vadd.f32 %v4716_v12, %v4473_v35 }
 0x66d   : > { %v1610_v37 = vpop.f32.mrf.mxu0 }
 0x66e   : > { %1672 = vrot.lane.b32.xlu0 %v1619_v36, %s5332_s23  ;;  %v1611_v17 = vadd.f32 %v4473_v35, %v1610_v37  ;;  %v5677_v48 = vpack.c.bf16 %v1619_v36, %v1619_v36  ;;  %v1626_v50 = vmul.f32 0.35355338, %v1619_v36 }
 0x66f   : > { %v4717_v39 = vpop.f32.mrf.mxu0 }
 0x670   : > { %v1624_v43 = vmul.f32 0.35355338, %v1611_v17  ;;  %v1658_v9 = vpack.c.bf16 %v1626_v50, %v1626_v50 }
 0x671   : > { %v1613_v40 = vpop.f32.mrf.mxu0 }
 0x672   : > { %v1614_v41 = vadd.f32 %v4473_v35, %v1613_v40 }
 0x674   : > { %v1625_v13 = vmul.f32 0.35355338, %v1614_v41  ;;  %v5039_v44 = vpack.i.bf16 %v1614_v41, %v1611_v17  ;;  %v5682_v18 = vpack.c.bf16 %v1614_v41, %v1611_v17 }
 0x676   : > { %5040 = vrot.lane.b32.xlu0 %v5039_v44, %s5333_s26  ;;  %5035 = vrot.lane.b32.xlu1 %v5039_v44, %s5332_s23  ;;  %v1657_v45 = vpack.c.bf16 %v1625_v13, %v1624_v43  ;;  %v5054_v47 = vpack.i.bf16 %v1625_v13, %v1624_v43 }
 0x678   : > { %4722 = vmatprep.mubr.msk.bf16.mxu0 %vm1709_vm5, %v1657_v45 }
 0x67a   : > { %1707 = vrot.lane.b32.xlu0 %v5677_v48, %s5334_s28  ;;  %1681 = vrot.lane.b32.xlu1 %v1619_v36, %s5333_s26 }
 0x67e   : > { %1690 = vrot.lane.b32.xlu1 %v1619_v36, %s5335_s1  ;;  %1705 = vrot.lane.b32.xlu0 %v5682_v18, %s5334_s28 }
 0x682   : > { %5045 = vrot.lane.b32.xlu1 %v5039_v44, %s5335_s1  ;;  %5050 = vrot.lane.b32.xlu0 %v5054_v47, %s5332_s23 }
 0x686   : > { %1634 = vrot.lane.b32.xlu0 %v1626_v50, %s5332_s23 }
 0x6e0   : > { %v1673_v52 = vpop.permute.xlu0 %1672 }
 0x6e1   : > { %v5690_v38 = vpack.c.bf16 %v1673_v52, %v1673_v52 }
 0x6e3   : > { %1774 = vrot.lane.b32.xlu1 %v5690_v38, %s5334_s28 }
 0x6e8   : > { %v5041_v55 = vpop.permute.xlu0 %5040  ;;  %v5036_v42 = vpop.permute.xlu1 %5035 }
 0x6e9   : > { %v5043_v57 = vunpack.i.h.bf16 %v5041_v55  ;;  %v5042_v23 = vunpack.i.l.bf16 %v5041_v55  ;;  %v5038_v58 = vunpack.i.h.bf16 %v5036_v42  ;;  %v5037_v59 = vunpack.i.l.bf16 %v5036_v42 }
 0x6eb   : > { %v5694_v60 = vpack.c.bf16 %v5038_v58, %v5037_v59  ;;  %v5696_v61 = vpack.c.bf16 %v5043_v57, %v5042_v23 }
 0x6ec   : > { %v1708_v62 = vpop.permute.xlu0 %1707  ;;  %v1682_v56 = vpop.permute.xlu1 %1681 }
 0x6ed   : > { %4958 = vmatprep.subr.msk.bf16.mxu0 %vm1709_vm5, %v1708_v62  ;;  %1772 = vrot.lane.b32.xlu1 %v5694_v60, %s5334_s28  ;;  %v1720_v63 = vsel %vm1709_vm5, %v1708_v62, 0  ;;  %v5704_v0 = vpack.c.bf16 %v1682_v56, %v1682_v56 }
 0x6ee   : > { %1838 = vrot.lane.b32.xlu0 %v5696_v61, %s5334_s28  ;;  %4719 = vmatpush3.bf16.xpose.msra.mxu0 %v1720_v63 }
 0x6f0   : > { %v1691_v1 = vpop.permute.xlu1 %1690  ;;  %v1706_v2 = vpop.permute.xlu0 %1705 }
 0x6f1   : > { %1840 = vrot.lane.b32.xlu1 %v5704_v0, %s5334_s28  ;;  %4959 = vmatprep.subr.msk.bf16.mxu0 %vm1709_vm5, %v1706_v2  ;;  %v5710_v25 = vpack.c.bf16 %v1691_v1, %v1691_v1  ;;  %v1717_v5 = vsel %vm1709_vm5, %v1706_v2, 0 }
 0x6f2   : > { %5055 = vrot.lane.b32.xlu0 %v5054_v47, %s5333_s26 }
 0x6f4   : > { %v5046_v3 = vpop.permute.xlu1 %5045  ;;  %v5051_v4 = vpop.permute.xlu0 %5050 }
 0x6f5   : > { %v5048_v24 = vunpack.i.h.bf16 %v5046_v3  ;;  %v5047_v6 = vunpack.i.l.bf16 %v5046_v3  ;;  %1906 = vrot.lane.b32.xlu1 %v5710_v25, %s5334_s28  ;;  %v5053_v7 = vunpack.i.h.bf16 %v5051_v4  ;;  %v5052_v8 = vunpack.i.l.bf16 %v5051_v4 }
 0x6f6   : > { %5060 = vrot.lane.b32.xlu0 %v5054_v47, %s5335_s1  ;;  %4721 = vmatpush3.bf16.xpose.msra.mxu0 %v1717_v5 }
 0x6f7   : > { %v5716_v51 = vpack.c.bf16 %v5048_v24, %v5047_v6  ;;  %v1659_v46 = vpack.c.bf16 %v5053_v7, %v5052_v8 }
 0x6f8   : > { %v1635_v15 = vpop.permute.xlu0 %1634 }
 0x6f9   : > { %1904 = vrot.lane.b32.xlu1 %v5716_v51, %s5334_s28  ;;  %4730 = vmatprep.mubr.msk.bf16.mxu1 %vm1709_vm5, %v1659_v46  ;;  %v1660_v30 = vpack.c.bf16 %v1635_v15, %v1635_v15 }
 0x6fd   : > { %1643 = vrot.lane.b32.xlu1 %v1626_v50, %s5333_s26  ;;  %4723 = vmatmul.mubr.msk.bf16.vlgmr.msra.gmra.mxu0 %vm1709_vm5, %v1658_v9 }
 0x701   : > { %1652 = vrot.lane.b32.xlu1 %v1626_v50, %s5335_s1 }
 0x755   : > { %v1775_v10 = vpop.permute.xlu1 %1774 }
 0x756   : > { %4960 = vmatprep.subr.msk.bf16.mxu1 %vm1709_vm5, %v1775_v10  ;;  %v1786_v14 = vsel %vm1709_vm5, %v1775_v10, 0 }
 0x757   : > { %4727 = vmatpush3.bf16.xpose.msra.mxu1 %v1786_v14 }
 0x75f   : > { %v1773_v16 = vpop.permute.xlu1 %1772 }
 0x760   : > { %v1839_v19 = vpop.permute.xlu0 %1838  ;;  %4961 = vmatprep.subr.msk.bf16.mxu1 %vm1709_vm5, %v1773_v16  ;;  %v1783_v20 = vsel %vm1709_vm5, %v1773_v16, 0 }
 0x761   : > { %4729 = vmatpush3.bf16.xpose.msra.mxu1 %v1783_v20  ;;  %v1849_v36 = vsel %vm1709_vm5, %v1839_v19, 0 }
 0x763   : > { %v1841_v21 = vpop.permute.xlu1 %1840 }
 0x764   : > { %v5056_v22 = vpop.permute.xlu0 %5055  ;;  %4962 = vmatprep.subr.msk.bf16.mxu0 %vm1709_vm5, %v1841_v21  ;;  %v1852_v27 = vsel %vm1709_vm5, %v1841_v21, 0 }
 0x765   : > { %v5058_v26 = vunpack.i.h.bf16 %v5056_v22  ;;  %v5057_v29 = vunpack.i.l.bf16 %v5056_v22  ;;  %4735 = vmatpush3.bf16.xpose.msra.mxu0 %v1852_v27 }
 0x766   : > { %4963 = vmatprep.subr.msk.bf16.mxu0 %vm1709_vm5, %v1839_v19 }
 0x767   : > { %v1661_v28 = vpack.c.bf16 %v5058_v26, %v5057_v29  ;;  %v1907_v31 = vpop.permute.xlu1 %1906 }
 0x768   : > { %v5061_v32 = vpop.permute.xlu0 %5060  ;;  %4731 = vmatmul.mubr.msk.bf16.vlgmr.msra.gmra.mxu1 %vm1709_vm5, %v1660_v30  ;;  %4964 = vmatprep.subr.msk.bf16.mxu1 %vm1709_vm5, %v1907_v31  ;;  %v1918_v33 = vsel %vm1709_vm5, %v1907_v31, 0 }
 0x769   : > { %v5063_v11 = vunpack.i.h.bf16 %v5061_v32  ;;  %v5062_v34 = vunpack.i.l.bf16 %v5061_v32  ;;  %4738 = vmatprep.mubr.msk.bf16.mxu0 %vm1709_vm5, %v1661_v28  ;;  %4743 = vmatpush3.bf16.xpose.msra.mxu1 %v1918_v33 }
 0x76b   : > { %v1663_v35 = vpack.c.bf16 %v5063_v11, %v5062_v34  ;;  %v1905_v12 = vpop.permute.xlu1 %1904 }
 0x76c   : > { %4965 = vmatprep.subr.msk.bf16.mxu1 %vm1709_vm5, %v1905_v12  ;;  %v1915_v39 = vsel %vm1709_vm5, %v1905_v12, 0 }
 0x76d   : > { %4746 = vmatprep.mubr.msk.bf16.mxu1 %vm1709_vm5, %v1663_v35  ;;  %4737 = vmatpush3.bf16.xpose.msra.mxu0 %v1849_v36 }
 0x76f   : > { %v1644_v37 = vpop.permute.xlu1 %1643 }
 0x770   : > { %v1662_v17 = vpack.c.bf16 %v1644_v37, %v1644_v37 }
 0x771   : > { %4745 = vmatpush3.bf16.xpose.msra.mxu1 %v1915_v39 }
 0x773   : > { %v1653_v40 = vpop.permute.xlu1 %1652 }
 0x774   : > { %4739 = vmatmul.mubr.msk.bf16.vlgmr.msra.gmra.mxu0 %vm1709_vm5, %v1662_v17  ;;  %v1664_v41 = vpack.c.bf16 %v1653_v40, %v1653_v40 }
 0x778   : > { %4747 = vmatmul.mubr.msk.bf16.vlgmr.msra.gmra.mxu1 %vm1709_vm5, %v1664_v41 }
 0x7bd   : > { %v4724_v43 = vpop.f32.mrf.mxu0 }
 0x7be   : > { %v1976_v13 = vsel %vm1975_vm6, %v4724_v43, -inf }
 0x7bf   : > { %1977 = vmax.xlane.f32.xlu0 %v1976_v13  ;;  %v1756_v44 = vpop.f32.mrf.mxu0 }
 0x7c0   : > { %v1969_v47 = vsel %vm1968_vm7, %v1756_v44, -inf }
 0x7c1   : > { %v4725_v45 = vpop.f32.mrf.mxu0 }
 0x7c3   : > { %1970 = vmax.xlane.f32.xlu0 %v1969_v47  ;;  %v1759_v50 = vpop.f32.mrf.mxu0 }
 0x7c4   : > { %v1972_v52 = vsel %vm1968_vm7, %v1759_v50, -inf }
 0x7c5   : > { %1973 = vmax.xlane.f32.xlu1 %v1972_v52 }
 0x828   : > { %v4732_v55 = vpop.f32.mrf.mxu1 }
 0x829   : > { %v1985_v42 = vsel %vm1975_vm6, %v4732_v55, -inf }
 0x82a   : > { %v1822_v57 = vpop.f32.mrf.mxu1  ;;  %1986 = vmax.xlane.f32.xlu1 %v1985_v42 }
 0x82b   : > { %v1979_v23 = vsel %vm1968_vm7, %v1822_v57, -inf }
 0x82c   : > { %v4733_v58 = vpop.f32.mrf.mxu1  ;;  %1980 = vmax.xlane.f32.xlu0 %v1979_v23  ;;  %v5337_v23 = vmov 0  }
 0x82d   : > { %v5809_v58 = vsel %vm1477_vm3, 65535, %v5337_v23 }
 0x82e   : > { %v5748_v62 = vpop.f32.mrf.mxu1 }
 0x82f   : > { %v1982_v5 = vsel %vm1968_vm7, %v5748_v62, -inf }
 0x834   : > { %v5746_v59 = vpop.f32.mrf.mxu0 }
 0x835   : > { %v1994_v7 = vsel %vm1975_vm6, %v5746_v59, -inf }
 0x836   : > { %v5750_v56 = vpop.f32.mrf.mxu0 }
 0x837   : > { %v1988_v63 = vsel %vm1968_vm7, %v5750_v56, -inf }
 0x838   : > { %v5754_v1 = vpop.f32.mrf.mxu1  ;;  %1989 = vmax.xlane.f32.xlu0 %v1988_v63  ;;  %v4741_v2 = vpop.f32.mrf.mxu0 }
 0x839   : > { %v2003_v10 = vsel %vm1975_vm6, %v5754_v1, -inf }
 0x83a   : > { %v1891_v3 = vpop.f32.mrf.mxu0  ;;  %v5756_v4 = vpop.f32.mrf.mxu1 }
 0x83b   : > { %v1991_v24 = vsel %vm1968_vm7, %v1891_v3, -inf  ;;  %v1997_v8 = vsel %vm1968_vm7, %v5756_v4, -inf }
 0x83c   : > { %v4749_v6 = vpop.f32.mrf.mxu1  ;;  %1983 = vmax.xlane.f32.xlu0 %v1982_v5  ;;  %1992 = vmax.xlane.f32.xlu1 %v1991_v24 }
 0x83e   : > { %v5765_v46 = vpop.f32.mrf.mxu1 }
 0x83f   : > { %v2000_v9 = vsel %vm1968_vm7, %v5765_v46, -inf }
 0x840   : > { %1995 = vmax.xlane.f32.xlu0 %v1994_v7  ;;  %1998 = vmax.xlane.f32.xlu1 %v1997_v8 }
 0x844   : > { %2001 = vmax.xlane.f32.xlu0 %v2000_v9  ;;  %2004 = vmax.xlane.f32.xlu1 %v2003_v10 }
 0x848   : > { %v1978_v14 = vpop.xlane.xlu0 %1977 }
 0x849   : > { %v2008_v15 = vsub.f32 %v4724_v43, %v1978_v14 }
 0x84b   : > { %v2022_v19 = vmul.f32 1.442695, %v2008_v15 }
 0x84c   : > { %v1971_v16 = vpop.xlane.xlu0 %1970 }
 0x84d   : > { %5150 = vpow2.f32 %v2022_v19 }
 0x84e   : > { %v1974_v20 = vpop.xlane.xlu1 %1973 }
 0x84f   : > { %v2007_v21 = vsub.f32 %v1759_v50, %v1974_v20 }
 0x855   : > { %2176 = vrot.lane.b32.xlu1 %v5690_v38, %s6250_s2  ;;  %v2006_v38 = vsub.f32 %v1756_v44, %v1971_v16 }
 0x859   : > { %2110 = vrot.lane.b32.xlu1 %v5682_v18, %s6250_s2  ;;  %v2018_v18 = vmul.f32 1.442695, %v2006_v38 }
 0x85a   : > { %2112 = vrot.lane.b32.xlu0 %v5677_v48, %s6250_s2  ;;  %v2020_v48 = vmul.f32 1.442695, %v2007_v21  ;;  %v5783_v22 = vpop.eup %5150 }
 0x85b   : > { %5152 = vpow2.f32 %v2018_v18 }
 0x85c   : > { %5154 = vpow2.f32 %v2020_v48 }
 0x85d   : > { %2174 = vrot.lane.b32.xlu1 %v5694_v60, %s6250_s2  ;;  %v2048_v60 = vsel %vm1975_vm6, %v5783_v22, 0.0 }
 0x85e   : > { %2238 = vrot.lane.b32.xlu0 %v5704_v0, %s6250_s2 }
 0x861   : > { %2300 = vrot.lane.b32.xlu1 %v5710_v25, %s6250_s2 }
 0x868   : > { %v5787_v0 = vpop.eup %5152 }
 0x869   : > { %v2042_v25 = vsel %vm1968_vm7, %v5787_v0, 0.0  ;;  %v5791_v27 = vpop.eup %5154 }
 0x86a   : > { %v2045_v26 = vsel %vm1968_vm7, %v5791_v27, 0.0 }
 0x87d   : > { %2049 = vadd.xlane.f32.xlu0 %v2048_v60 }
 0x881   : > { %2043 = vadd.xlane.f32.xlu0 %v2042_v25 }
 0x885   : > { %2046 = vadd.xlane.f32.xlu1 %v2045_v26 }
 0x8b3   : > { %v1987_v29 = vpop.xlane.xlu1 %1986 }
 0x8b4   : > { %v2011_v30 = vsub.f32 %v4732_v55, %v1987_v29 }
 0x8b5   : > { %v1981_v28 = vpop.xlane.xlu0 %1980 }
 0x8b6   : > { %v2028_v31 = vmul.f32 1.442695, %v2011_v30  ;;  %v2009_v32 = vsub.f32 %v1822_v57, %v1981_v28 }
 0x8b8   : > { %5156 = vpow2.f32 %v2028_v31  ;;  %v2024_v33 = vmul.f32 1.442695, %v2009_v32 }
 0x8ba   : > { %5158 = vpow2.f32 %v2024_v33 }
 0x8c1   : > { %v1990_v11 = vpop.xlane.xlu0 %1989 }
 0x8c2   : > { %v2012_v17 = vsub.f32 %v5750_v56, %v1990_v11 }
 0x8c4   : > { %v2030_v45 = vmul.f32 1.442695, %v2012_v17 }
 0x8c5   : > { %v5795_v34 = vpop.eup %5156  ;;  %v1984_v35 = vpop.xlane.xlu0 %1983 }
 0x8c6   : > { %v1993_v12 = vpop.xlane.xlu1 %1992  ;;  %v2057_v37 = vsel %vm1975_vm6, %v5795_v34, 0.0  ;;  %v2010_v47 = vsub.f32 %v5748_v62, %v1984_v35 }
 0x8c7   : > { %v2013_v36 = vsub.f32 %v1891_v3, %v1993_v12  ;;  %v5799_v39 = vpop.eup %5158  ;;  %2058 = vadd.xlane.f32.xlu1 %v2057_v37 }
 0x8c8   : > { %v2051_v44 = vsel %vm1968_vm7, %v5799_v39, 0.0 }
 0x8c9   : > { %v2032_v40 = vmul.f32 1.442695, %v2013_v36  ;;  %v1996_v41 = vpop.xlane.xlu0 %1995 }
 0x8ca   : > { %v1999_v43 = vpop.xlane.xlu1 %1998  ;;  %v2014_v13 = vsub.f32 %v5746_v59, %v1996_v41  ;;  %v2026_v59 = vmul.f32 1.442695, %v2010_v47 }
 0x8cb   : > { %5160 = vpow2.f32 %v2032_v40  ;;  %2052 = vadd.xlane.f32.xlu1 %v2051_v44  ;;  %v2015_v52 = vsub.f32 %v5756_v4, %v1999_v43 }
 0x8cc   : > { %v2034_v50 = vmul.f32 1.442695, %v2014_v13 }
 0x8cd   : > { %v2002_v55 = vpop.xlane.xlu0 %2001  ;;  %v2036_v2 = vmul.f32 1.442695, %v2015_v52 }
 0x8ce   : > { %v2005_v42 = vpop.xlane.xlu1 %2004  ;;  %5162 = vpow2.f32 %v2034_v50  ;;  %v2016_v56 = vsub.f32 %v5765_v46, %v2002_v55  ;;  %v2368_v50 = vld [vmem:[%s6269_s7] sm:$0xf] }
 0x8cf   : > { %v2017_v57 = vsub.f32 %v5754_v1, %v2005_v42  ;;  %5164 = vpow2.f32 %v2030_v45 }
 0x8d0   : > { %v2038_v24 = vmul.f32 1.442695, %v2016_v56 }
 0x8d1   : > { %v2040_v63 = vmul.f32 1.442695, %v2017_v57  ;;  %v2113_v3 = vpop.permute.xlu0 %2112 }
 0x8d2   : > { %v2177_v62 = vpop.permute.xlu1 %2176  ;;  %v2124_v5 = vand.u32 %v5809_v58, %v2113_v3 }
 0x8d3   : > { %v2186_v4 = vand.u32 %v2177_v62, %v5809_v58  ;;  %5166 = vpow2.f32 %v2040_v63  ;;  %v2379_v62 = vsel %vm1264_vm0, %v2368_v50, 0 }
 0x8d4   : > { %5168 = vpow2.f32 %v2026_v59  ;;  %4750 = vmatprep.subr.bf16.mxu0 %v2124_v5 }
 0x8d5   : > { %4758 = vmatprep.subr.bf16.mxu1 %v2186_v4  ;;  %5170 = vpow2.f32 %v2036_v2  ;;  %4751 = vmatpush3.bf16.msra.mxu0 %v2124_v5  ;;  %v2239_v6 = vpop.permute.xlu0 %2238 }
 0x8d6   : > { %4759 = vmatpush3.bf16.msra.mxu1 %v2186_v4  ;;  %v2111_v1 = vpop.permute.xlu1 %2110  ;;  %5172 = vpow2.f32 %v2038_v24  ;;  %v2248_v8 = vand.u32 %v2239_v6, %v5809_v58 }
 0x8d7   : > { %4752 = vmatprep.subr.bf16.mxu0 %v2111_v1 }
 0x8d8   : > { %v5814_v7 = vpop.eup %5160 }
 0x8d9   : > { %v2063_v46 = vsel %vm1968_vm7, %v5814_v7, 0.0  ;;  %4753 = vmatpush3.bf16.msra.mxu0 %v2111_v1 }
 0x8da   : > { %v2175_v9 = vpop.permute.xlu1 %2174  ;;  %2064 = vadd.xlane.f32.xlu1 %v2063_v46  ;;  %4766 = vmatprep.subr.bf16.mxu0 %v2248_v8 }
 0x8db   : > { %4760 = vmatprep.subr.bf16.mxu1 %v2175_v9  ;;  %v5819_v10 = vpop.eup %5162 }
 0x8dc   : > { %4761 = vmatpush3.bf16.msra.mxu1 %v2175_v9  ;;  %v2066_v14 = vsel %vm1975_vm6, %v5819_v10, 0.0  ;;  %v5823_v15 = vpop.eup %5164 }
 0x8dd   : > { %2067 = vadd.xlane.f32.xlu0 %v2066_v14  ;;  %v2060_v20 = vsel %vm1968_vm7, %v5823_v15, 0.0 }
 0x8de   : > { %v2301_v16 = vpop.permute.xlu1 %2300 }
 0x8df   : > { %v5826_v19 = vand.u32 %v2301_v16, %v5809_v58  ;;  %v2370_v16 = vld [vmem:[%s6269_s7 + $0x8] sm:$0xf] }
 0x8e0   : > { %v5828_v38 = vpop.eup %5166 }
 0x8e1   : > { %4774 = vmatprep.subr.bf16.mxu1 %v5826_v19  ;;  %v5833_v18 = vpop.eup %5168  ;;  %2061 = vadd.xlane.f32.xlu0 %v2060_v20  ;;  %v2075_v21 = vsel %vm1975_vm6, %v5828_v38, 0.0 }
 0x8e2   : > { %v5837_v48 = vpop.eup %5170  ;;  %2076 = vadd.xlane.f32.xlu1 %v2075_v21  ;;  %v2054_v60 = vsel %vm1968_vm7, %v5833_v18, 0.0 }
 0x8e3   : > { %v5841_v25 = vpop.eup %5172  ;;  %v2069_v26 = vsel %vm1968_vm7, %v5837_v48, 0.0 }
 0x8e4   : > { %v2072_v29 = vsel %vm1968_vm7, %v5841_v25, 0.0 }
 0x8e5   : > { %2055 = vadd.xlane.f32.xlu0 %v2054_v60 }
 0x8e6   : > { %2070 = vadd.xlane.f32.xlu1 %v2069_v26  ;;  %v2493_v26 = vsel %vm1264_vm0, %v2370_v16, 0 }
 0x8e9   : > { %2073 = vadd.xlane.f32.xlu0 %v2072_v29 }
 0x8f7   : > { %2298 = vrot.lane.b32.xlu1 %v5716_v51, %s6250_s2 }
 0x8ff   : > { %2236 = vrot.lane.b32.xlu0 %v5696_v61, %s6250_s2  ;;  %s6280_s2 = sld [smem:[#allocation11_spill]] }
 0x906   : > { %v2050_v30 = vpop.xlane.xlu0 %2049 }
 0x907   : > { %5174 = vrcp.f32 %v2050_v30 }
 0x90a   : > { %v2044_v28 = vpop.xlane.xlu0 %2043 }
 0x90b   : > { %5176 = vrcp.f32 %v2044_v28 }
 0x90e   : > { %v2047_v31 = vpop.xlane.xlu1 %2046 }
 0x90f   : > { %5178 = vrcp.f32 %v2047_v31 }
 0x914   : > { %v5175_v32 = vpop.eup %5174 }
 0x915   : > { %v2092_v35 = vmul.f32 %v5175_v32, %v5783_v22 }
 0x917   : > { %v2103_v51 = vpack.c.bf16 %v2092_v35, %v2092_v35 }
 0x918   : > { %v5177_v33 = vpop.eup %5176 }
 0x919   : > { %v2090_v12 = vmul.f32 %v5177_v33, %v5787_v0 }
 0x91c   : > { %v5179_v11 = vpop.eup %5178 }
 0x91d   : > { %v2091_v36 = vmul.f32 %v5179_v11, %v5791_v27 }
 0x91f   : > { %v2102_v37 = vpack.c.bf16 %v2091_v36, %v2090_v12 }
 0x921   : > { %4754 = vmatprep.mubr.msk.bf16.mxu0 %vm1968_vm7, %v2102_v37 }
 0x922   : > { %4755 = vmatmul.mubr.msk.bf16.vlgmr.msra.gmra.mxu0 %vm1968_vm7, %v2103_v51 }
 0x923   : > { %4767 = vmatpush3.bf16.msra.mxu0 %v2248_v8 }
 0x950   : > { %v2059_v61 = vpop.xlane.xlu1 %2058 }
 0x954   : > { %v2053_v17 = vpop.xlane.xlu1 %2052 }
 0x963   : > { %v2065_v40 = vpop.xlane.xlu1 %2064 }
 0x966   : > { %v2068_v41 = vpop.xlane.xlu0 %2067 }
 0x967   : > { %5180 = vrcp.f32 %v2068_v41 }
 0x968   : > { %5182 = vrcp.f32 %v2065_v40 }
 0x96a   : > { %v2062_v43 = vpop.xlane.xlu0 %2061 }
 0x96b   : > { %5184 = vrcp.f32 %v2062_v43  ;;  %v2077_v22 = vpop.xlane.xlu1 %2076 }
 0x96c   : > { %5186 = vrcp.f32 %v2059_v61 }
 0x96d   : > { %5188 = vrcp.f32 %v2053_v17 }
 0x96e   : > { %v2056_v0 = vpop.xlane.xlu0 %2055 }
 0x96f   : > { %5190 = vrcp.f32 %v2056_v0  ;;  %v2071_v27 = vpop.xlane.xlu1 %2070 }
 0x970   : > { %5192 = vrcp.f32 %v2071_v27 }
 0x972   : > { %v2074_v13 = vpop.xlane.xlu0 %2073 }
 0x973   : > { %5194 = vrcp.f32 %v2074_v13 }
 0x974   : > { %5196 = vrcp.f32 %v2077_v22  ;;  %v5181_v44 = vpop.eup %5180 }
 0x975   : > { %v5183_v45 = vpop.eup %5182  ;;  %v2098_v55 = vmul.f32 %v5181_v44, %v5819_v10 }
 0x976   : > { %v2237_v47 = vpop.permute.xlu0 %2236  ;;  %v2097_v23 = vmul.f32 %v5183_v45, %v5814_v7 }
 0x977   : > { %4768 = vmatprep.subr.bf16.mxu0 %v2237_v47  ;;  %v2107_v2 = vpack.c.bf16 %v2098_v55, %v2098_v55 }
 0x978   : > { %v5185_v52 = vpop.eup %5184  ;;  %4769 = vmatpush3.bf16.msra.mxu0 %v2237_v47 }
 0x979   : > { %v5187_v42 = vpop.eup %5186  ;;  %v2096_v57 = vmul.f32 %v5185_v52, %v5823_v15  ;;  %4966 = vmatprep.subr.msk.bf16.mxu0 %vm1264_vm0, %v2368_v50  ;;  %v2369_v15 = vld [vmem:[%s6269_s7 + $0x4] sm:$0xf] }
 0x97a   : > { %v5189_v59 = vpop.eup %5188  ;;  %v2095_v3 = vmul.f32 %v5187_v42, %v5795_v34  ;;  %v2436_v20 = vsel %vm1264_vm0, %v2369_v15, 0 }
 0x97b   : > { %v2106_v56 = vpack.c.bf16 %v2097_v23, %v2096_v57  ;;  %v2093_v5 = vmul.f32 %v5189_v59, %v5799_v39  ;;  %v2299_v39 = vpop.permute.xlu1 %2298 }
 0x97c   : > { %v5191_v63 = vpop.eup %5190  ;;  %v2105_v7 = vpack.c.bf16 %v2095_v3, %v2095_v3 }
 0x97d   : > { %4770 = vmatprep.mubr.msk.bf16.mxu0 %vm1968_vm7, %v2106_v56  ;;  %v2094_v4 = vmul.f32 %v5191_v63, %v5833_v18  ;;  %v5193_v24 = vpop.eup %5192 }
 0x97e   : > { %4771 = vmatmul.mubr.msk.bf16.vlgmr.msra.gmra.mxu0 %vm1968_vm7, %v2107_v2  ;;  %v2099_v34 = vmul.f32 %v5193_v24, %v5837_v48 }
 0x97f   : > { %v2104_v1 = vpack.c.bf16 %v2094_v4, %v2093_v5  ;;  %4783 = vmatpush3.bf16.msra.mxu0 %v2379_v62 }
 0x980   : > { %v5195_v6 = vpop.eup %5194  ;;  %4968 = vmatprep.subr.msk.bf16.mxu0 %vm1264_vm0, %v2370_v16 }
 0x981   : > { %v5197_v8 = vpop.eup %5196  ;;  %4762 = vmatprep.mubr.msk.bf16.mxu1 %vm1968_vm7, %v2104_v1  ;;  %v2100_v46 = vmul.f32 %v5195_v6, %v5841_v25 }
 0x982   : > { %4763 = vmatmul.mubr.msk.bf16.vlgmr.msra.gmra.mxu1 %vm1968_vm7, %v2105_v7  ;;  %v2101_v10 = vmul.f32 %v5197_v8, %v5828_v38 }
 0x983   : > { %4775 = vmatpush3.bf16.msra.mxu1 %v5826_v19  ;;  %v2108_v9 = vpack.c.bf16 %v2100_v46, %v2099_v34  ;;  %v2371_v19 = vld [vmem:[%s6269_s7 + $0xc] sm:$0xf] }
 0x984   : > { %4776 = vmatprep.subr.bf16.mxu1 %v2299_v39  ;;  %v2109_v14 = vpack.c.bf16 %v2101_v10, %v2101_v10  ;;  %v2550_v17 = vsel %vm1264_vm0, %v2371_v19, 0 }
 0x985   : > { %4778 = vmatprep.mubr.msk.bf16.mxu1 %vm1968_vm7, %v2108_v9 }
 0x987   : > { %4777 = vmatpush3.bf16.msra.mxu1 %v2299_v39 }
 0x988   : > { %4967 = vmatprep.subr.msk.bf16.mxu1 %vm1264_vm0, %v2369_v15 }
 0x98a   : > { %4779 = vmatmul.mubr.msk.bf16.vlgmr.msra.gmra.mxu1 %vm1968_vm7, %v2109_v14 }
 0x98b   : > { %4789 = vmatpush3.bf16.msra.mxu1 %v2436_v20 }
 0x98c   : > { %4969 = vmatprep.subr.msk.bf16.mxu1 %vm1264_vm0, %v2371_v19 }
 0x9e2   : > { %v4756_v18 = vpop.f32.mrf.mxu0 }
 0x9e3   : > { %v2361_v25 = vpack.c.bf16 %v4756_v18, %v4756_v18 }
 0x9e4   : > { %v2160_v38 = vpop.f32.mrf.mxu0 }
 0x9e6   : > { %v4757_v21 = vpop.f32.mrf.mxu0 }
 0x9e8   : > { %v2163_v48 = vpop.f32.mrf.mxu0 }
 0x9e9   : > { %v2360_v60 = vpack.c.bf16 %v2163_v48, %v2160_v38 }
 0x9eb   : > { %4784 = vmatprep.mubr.msk.bf16.mxu0 %vm1709_vm5, %v2360_v60  ;;  %v4502_v60 = vld [vmem:[%s6270_s10] ss:$0 sm:$0xff]  ;;  %s6275_s10 = sld [smem:[#allocation7_spill]] }
 0x9ec   : > { %4785 = vmatmul.mubr.msk.bf16.vlgmr.msra.gmra.mxu0 %vm1709_vm5, %v2361_v25 }
 0x9ed   : > { %4795 = vmatpush3.bf16.msra.mxu0 %v2493_v26 }
 0xa3e   : > { %v4772_v29 = vpop.f32.mrf.mxu0 }
 0xa3f   : > { %v2365_v35 = vpack.c.bf16 %v4772_v29, %v4772_v29 }
 0xa40   : > { %v2284_v30 = vpop.f32.mrf.mxu0 }
 0xa42   : > { %v4764_v28 = vpop.f32.mrf.mxu1  ;;  %v4773_v31 = vpop.f32.mrf.mxu0 }
 0xa43   : > { %v2363_v51 = vpack.c.bf16 %v4764_v28, %v4764_v28 }
 0xa44   : > { %v2222_v32 = vpop.f32.mrf.mxu1  ;;  %v2287_v33 = vpop.f32.mrf.mxu0 }
 0xa45   : > { %v2364_v11 = vpack.c.bf16 %v2287_v33, %v2284_v30 }
 0xa46   : > { %v4765_v12 = vpop.f32.mrf.mxu1 }
 0xa47   : > { %4796 = vmatprep.mubr.msk.bf16.mxu0 %vm1709_vm5, %v2364_v11 }
 0xa48   : > { %v2225_v36 = vpop.f32.mrf.mxu1  ;;  %4797 = vmatmul.mubr.msk.bf16.vlgmr.msra.gmra.mxu0 %vm1709_vm5, %v2365_v35 }
 0xa49   : > { %v2362_v37 = vpack.c.bf16 %v2225_v36, %v2222_v32 }
 0xa4a   : > { %v4780_v61 = vpop.f32.mrf.mxu1 }
 0xa4b   : > { %4790 = vmatprep.mubr.msk.bf16.mxu1 %vm1709_vm5, %v2362_v37  ;;  %v2367_v0 = vpack.c.bf16 %v4780_v61, %v4780_v61 }
 0xa4c   : > { %v2346_v40 = vpop.f32.mrf.mxu1  ;;  %4791 = vmatmul.mubr.msk.bf16.vlgmr.msra.gmra.mxu1 %vm1709_vm5, %v2363_v51 }
 0xa4d   : > { %4801 = vmatpush3.bf16.msra.mxu1 %v2550_v17 }
 0xa4e   : > { %v4781_v41 = vpop.f32.mrf.mxu1 }
 0xa50   : > { %v2349_v43 = vpop.f32.mrf.mxu1 }
 0xa51   : > { %v2366_v22 = vpack.c.bf16 %v2349_v43, %v2346_v40 }
 0xa53   : > { %4802 = vmatprep.mubr.msk.bf16.mxu1 %vm1709_vm5, %v2366_v22 }
 0xa54   : > { %4803 = vmatmul.mubr.msk.bf16.vlgmr.msra.gmra.mxu1 %vm1709_vm5, %v2367_v0  ;;  %v5098_v0 = vld [vmem:[%s6271_s11 + $0x8] sm:$0xff]  }
 0xa55   : > { %4806 = vmatprep.subr.bf16.mxu0 %v5098_v0 }
 0xa56   : > { %4807 = vmatpush3.bf16.msra.mxu0 %v5098_v0 }
 0xaac   : > { %v4786_v27 = vpop.f32.mrf.mxu0 }
 0xaad   : > { %v2614_v23 = vsel %vm1493_vm4, %v4786_v27, 0.0  ;;  %v5099_v27 = vld [vmem:[%s6271_s11] sm:$0xff]  }
 0xaae   : > { %v2415_v13 = vpop.f32.mrf.mxu0  ;;  %4808 = vmatprep.subr.bf16.mxu0 %v5099_v27 }
 0xaaf   : > { %v2600_v2 = vsel %vm1278_vm1, %v2415_v13, 0.0  ;;  %4809 = vmatpush3.bf16.msra.mxu0 %v5099_v27 }
 0xab0   : > { %v4787_v44 = vpop.f32.mrf.mxu0 }
 0xab2   : > { %v2418_v45 = vpop.f32.mrf.mxu0 }
 0xab3   : > { %v2607_v6 = vsel %vm1278_vm1, %v2418_v45, 0.0 }
 0xb08   : > { %v4798_v47 = vpop.f32.mrf.mxu0 }
 0xb09   : > { %v2617_v5 = vsel %vm1493_vm4, %v4798_v47, 0.0 }
 0xb0a   : > { %v2529_v50 = vpop.f32.mrf.mxu0 }
 0xb0b   : > { %v2603_v7 = vsel %vm1278_vm1, %v2529_v50, 0.0 }
 0xb0c   : > { %v4792_v52 = vpop.f32.mrf.mxu1  ;;  %v4799_v55 = vpop.f32.mrf.mxu0 }
 0xb0d   : > { %v2615_v42 = vsel %vm1493_vm4, %v4792_v52, 0.0 }
 0xb0e   : > { %v2472_v57 = vpop.f32.mrf.mxu1  ;;  %v2616_v56 = vadd.f32 %v2615_v42, %v2614_v23  ;;  %v2532_v34 = vpop.f32.mrf.mxu0 }
 0xb0f   : > { %v2601_v59 = vsel %vm1278_vm1, %v2472_v57, 0.0  ;;  %v2610_v20 = vsel %vm1278_vm1, %v2532_v34, 0.0 }
 0xb10   : > { %v4793_v63 = vpop.f32.mrf.mxu1  ;;  %v2602_v3 = vadd.f32 %v2601_v59, %v2600_v2  ;;  %v2618_v1 = vadd.f32 %v2617_v5, %v2616_v56  ;;  %v4503_v56 = vld [vmem:[%s6272_s0] ss:$0 sm:$0xff]  ;;  %s6276_s0 = sld [smem:[#allocation9_spill]] }
 0xb12   : > { %v2475_v62 = vpop.f32.mrf.mxu1  ;;  %v2604_v10 = vadd.f32 %v2603_v7, %v2602_v3 }
 0xb13   : > { %v2608_v4 = vsel %vm1278_vm1, %v2475_v62, 0.0 }
 0xb14   : > { %v4804_v24 = vpop.f32.mrf.mxu1  ;;  %v2609_v46 = vadd.f32 %v2608_v4, %v2607_v6  ;;  %v4504_v4 = vld [vmem:[%s6273_s18] ss:$0 sm:$0xff]  ;;  %s6277_s18 = sld [smem:[#allocation10_spill]] }
 0xb15   : > { %v2619_v8 = vsel %vm1493_vm4, %v4804_v24, 0.0 }
 0xb16   : > { %v2620_v39 = vadd.f32 %v2619_v8, %v2618_v1  ;;  %v2586_v9 = vpop.f32.mrf.mxu1  ;;  %v2611_v21 = vadd.f32 %v2610_v20, %v2609_v46  ;;  %v5106_v20 = vld [vmem:[%s6274_s22 + $0x8] sm:$0xff]  }
 0xb17   : > { %v2605_v14 = vsel %vm1278_vm1, %v2586_v9, 0.0  ;;  %v5101_v9 = vld [vmem:[%s6274_s22 + $0x30] sm:$0xff]  }
 0xb18   : > { %v2606_v15 = vadd.f32 %v2605_v14, %v2604_v10  ;;  %v4805_v16 = vpop.f32.mrf.mxu1  ;;  %v2623_v19 = vadd.f32 %v2620_v39, %v5650_v53  ;;  %v5100_v39 = vld [vmem:[%s6274_s22 + $0x38] sm:$0xff]   ;;  %v5102_v10 = vld [vmem:[%s6274_s22 + $0x28] sm:$0xff]   ;;  %v5103_v14 = vld [vmem:[%s6274_s22 + $0x20] sm:$0xff]  }
 0xb19   : > { %4814 = vmatprep.subr.bf16.mxu1 %v5100_v39  ;;  %v5105_v16 = vld [vmem:[%s6274_s22 + $0x10] sm:$0xff]  }
 0xb1a   : > { %v2621_v18 = vadd.f32 %v2606_v15, %v5645_v49  ;;  %v2589_v38 = vpop.f32.mrf.mxu1  ;;  %v5912_v28 = vadd.f32 %v4502_v60, %v2623_v19  ;;  %4815 = vmatpush3.bf16.msra.mxu1 %v5100_v39  ;;  %v5104_v15 = vld [vmem:[%s6274_s22 + $0x18] sm:$0xff]   ;;  %v5107_v19 = vld [vmem:[%s6274_s22] sm:$0xff]  }
 0xb1b   : > { %v2612_v48 = vsel %vm1278_vm1, %v2589_v38, 0.0  ;;  %4816 = vmatprep.subr.bf16.mxu1 %v5101_v9 }
 0xb1c   : > { %v2613_v25 = vadd.f32 %v2612_v48, %v2611_v21  ;;  %v5907_v26 = vadd.f32 %v4502_v60, %v2621_v18  ;;  %v2642_v49 = vsel %vm1493_vm4, %v5912_v28, 0.0  ;;  %v4505_v18 = vld [vmem:[%s6275_s10] ss:$0 sm:$0xff]  ;;  %s6278_s10 = sld [smem:[#allocation14_spill]] }
 0xb1e   : > { %v2622_v29 = vadd.f32 %v2613_v25, %v5654_v54  ;;  %v2636_v30 = vsel %vm1278_vm1, %v5907_v26, 0.0  ;;  %4817 = vmatpush3.bf16.msra.mxu1 %v5101_v9 }
 0xb1f   : > { %2637 = vadd.xlane.f32.xlu0 %v2636_v30  ;;  %4818 = vmatprep.subr.bf16.mxu1 %v5102_v10 }
 0xb20   : > { %v5914_v31 = vadd.f32 %v4502_v60, %v2622_v29 }
 0xb22   : > { %v2639_v53 = vsel %vm1278_vm1, %v5914_v31, 0.0  ;;  %4819 = vmatpush3.bf16.msra.mxu1 %v5102_v10  ;;  %v5108_v10 = vld [vmem:[%s6277_s18 + $0x8] sm:$0xff]  }
 0xb23   : > { %2643 = vadd.xlane.f32.xlu0 %v2642_v49  ;;  %2640 = vadd.xlane.f32.xlu1 %v2639_v53 }
 0xb24   : > { %4820 = vmatprep.subr.bf16.mxu1 %v5103_v14  ;;  %4834 = vmatprep.subr.bf16.mxu0 %v5108_v10 }
 0xb26   : > { %4821 = vmatpush3.bf16.msra.mxu1 %v5103_v14  ;;  %v5109_v14 = vld [vmem:[%s6277_s18] sm:$0xff]  }
 0xb27   : > { %4822 = vmatprep.subr.bf16.mxu1 %v5104_v15 }
 0xb2a   : > { %4823 = vmatpush3.bf16.msra.mxu1 %v5104_v15 }
 0xb2b   : > { %4824 = vmatprep.subr.bf16.mxu1 %v5105_v16 }
 0xb2e   : > { %4825 = vmatpush3.bf16.msra.mxu1 %v5105_v16 }
 0xb2f   : > { %4826 = vmatprep.subr.bf16.mxu1 %v5106_v20 }
 0xb32   : > { %4827 = vmatpush3.bf16.msra.mxu1 %v5106_v20 }
 0xb33   : > { %4828 = vmatprep.subr.bf16.mxu1 %v5107_v19 }
 0xb36   : > { %4829 = vmatpush3.bf16.msra.mxu1 %v5107_v19 }
 0xba8   : > { %v2638_v32 = vpop.xlane.xlu0 %2637 }
 0xba9   : > { %v2645_v33 = vmul.f32 0.03125, %v2638_v32 }
 0xbab   : > { %v2648_v54 = vsub.f32 %v5907_v26, %v2645_v33 }
 0xbac   : > { %v2644_v11 = vpop.xlane.xlu0 %2643  ;;  %v2641_v35 = vpop.xlane.xlu1 %2640 }
 0xbad   : > { %v2647_v12 = vmul.f32 0.03125, %v2644_v11  ;;  %v2646_v36 = vmul.f32 0.03125, %v2641_v35  ;;  %v2651_v37 = vmul.f32 %v2648_v54, %v2648_v54 }
 0xbaf   : > { %v2650_v51 = vsub.f32 %v5912_v28, %v2647_v12  ;;  %v2649_v61 = vsub.f32 %v5914_v31, %v2646_v36  ;;  %v2654_v17 = vsel %vm1278_vm1, %v2651_v37, 0.0 }
 0xbb0   : > { %2655 = vadd.xlane.f32.xlu0 %v2654_v17 }
 0xbb1   : > { %v2653_v40 = vmul.f32 %v2650_v51, %v2650_v51  ;;  %v2652_v41 = vmul.f32 %v2649_v61, %v2649_v61 }
 0xbb3   : > { %v2660_v43 = vsel %vm1493_vm4, %v2653_v40, 0.0  ;;  %v2657_v22 = vsel %vm1278_vm1, %v2652_v41, 0.0 }
 0xbb4   : > { %2661 = vadd.xlane.f32.xlu1 %v2660_v43  ;;  %2658 = vadd.xlane.f32.xlu0 %v2657_v22 }
 0xc39   : > { %v2656_v13 = vpop.xlane.xlu0 %2655 }
 0xc3a   : > { %v2663_v44 = vmul.f32 0.03125, %v2656_v13 }
 0xc3c   : > { %v2666_v45 = vadd.f32 1e-05, %v2663_v44 }
 0xc3d   : > { %v2659_v47 = vpop.xlane.xlu0 %2658  ;;  %v2662_v50 = vpop.xlane.xlu1 %2661 }
 0xc3e   : > { %5198 = vrsqrt.f32 %v2666_v45  ;;  %v2664_v52 = vmul.f32 0.03125, %v2659_v47  ;;  %v2665_v55 = vmul.f32 0.03125, %v2662_v50  ;;  %v4513_v45 = vld [vmem:[%s6276_s0] ss:$0 sm:$0xff]  ;;  %s6279_s0 = sld [smem:[#allocation15_spill]] }
 0xc40   : > { %v2667_v42 = vadd.f32 1e-05, %v2664_v52  ;;  %v2668_v57 = vadd.f32 1e-05, %v2665_v55 }
 0xc42   : > { %5200 = vrsqrt.f32 %v2667_v42 }
 0xc43   : > { %5202 = vrsqrt.f32 %v2668_v57 }
 0xc4b   : > { %v5199_v23 = vpop.eup %5198 }
 0xc4c   : > { %v2672_v59 = vmul.f32 %v5199_v23, %v2648_v54 }
 0xc4e   : > { %v2681_v62 = vmul.f32 %v4503_v56, %v2672_v59 }
 0xc4f   : > { %v5201_v63 = vpop.eup %5200 }
 0xc50   : > { %v5203_v2 = vpop.eup %5202  ;;  %v2673_v3 = vmul.f32 %v5201_v63, %v2649_v61  ;;  %v2690_v6 = vadd.f32 %v4504_v4, %v2681_v62 }
 0xc51   : > { %v2674_v5 = vmul.f32 %v5203_v2, %v2650_v51 }
 0xc52   : > { %v2682_v24 = vmul.f32 %v4503_v56, %v2673_v3 }
 0xc53   : > { %v2683_v1 = vmul.f32 %v4503_v56, %v2674_v5 }
 0xc54   : > { %v2691_v7 = vadd.f32 %v4504_v4, %v2682_v24 }
 0xc55   : > { %v2692_v8 = vadd.f32 %v4504_v4, %v2683_v1 }
 0xc56   : > { %v2693_v34 = vpack.c.bf16 %v2691_v7, %v2690_v6 }
 0xc57   : > { %v2694_v46 = vpack.c.bf16 %v2692_v8, %v2692_v8 }
 0xc58   : > { %4810 = vmatprep.mubr.msk.bf16.mxu0 %vm1278_vm1, %v2693_v34 }
 0xc59   : > { %4811 = vmatmul.mubr.msk.bf16.vlgmr.msra.gmra.mxu0 %vm1278_vm1, %v2694_v46 }
 0xc5a   : > { %4835 = vmatpush3.bf16.msra.mxu0 %v5108_v10 }
 0xc5b   : > { %4836 = vmatprep.subr.bf16.mxu0 %v5109_v14 }
 0xc5e   : > { %4837 = vmatpush3.bf16.msra.mxu0 %v5109_v14 }
 0xd19   : > { %v4812_v38 = vpop.f32.mrf.mxu0 }
 0xd1a   : > { %v2767_v21 = vadd.f32 %v4812_v38, %v4505_v18 }
 0xd1b   : > { %v2758_v48 = vpop.f32.mrf.mxu0 }
 0xd1c   : > { %v4512_v60 = vmul.f32 -1.702, %v2767_v21  ;;  %v2759_v25 = vadd.f32 %v4505_v18, %v2758_v48 }
 0xd1d   : > { %v4813_v29 = vpop.f32.mrf.mxu0 }
 0xd1e   : > { %v2782_v30 = vmul.f32 1.442695, %v4512_v60  ;;  %v4510_v49 = vmul.f32 -1.702, %v2759_v25 }
 0xd1f   : > { %v2761_v53 = vpop.f32.mrf.mxu0 }
 0xd20   : > { %5204 = vpow2.f32 %v2782_v30  ;;  %v2778_v32 = vmul.f32 1.442695, %v4510_v49  ;;  %v2762_v33 = vadd.f32 %v4505_v18, %v2761_v53  ;;  %v4522_v30 = vld [vmem:[%s6278_s10] ss:$0 sm:$0xff]  ;;  %s6286_s10 = sld [smem:[#allocation17_spill]] }
 0xd22   : > { %5206 = vpow2.f32 %v2778_v32  ;;  %v4511_v54 = vmul.f32 -1.702, %v2762_v33 }
 0xd24   : > { %v2780_v11 = vmul.f32 1.442695, %v4511_v54 }
 0xd26   : > { %5208 = vpow2.f32 %v2780_v11  ;;  %v4523_v11 = vld [vmem:[%s6279_s0] ss:$0 sm:$0xff]  ;;  %s4983_s0 = smul.u32 24, %s6288_s16 }
 0xd2d   : > { %v5205_v35 = vpop.eup %5204 }
 0xd2e   : > { %v2786_v36 = vadd.f32 1.0, %v5205_v35 }
 0xd2f   : > { %v5207_v12 = vpop.eup %5206 }
 0xd30   : > { %v2784_v37 = vadd.f32 1.0, %v5207_v12  ;;  %5210 = vrcp.f32 %v2786_v36 }
 0xd32   : > { %5212 = vrcp.f32 %v2784_v37 }
 0xd33   : > { %v5209_v51 = vpop.eup %5208 }
 0xd34   : > { %v2785_v61 = vadd.f32 1.0, %v5209_v51 }
 0xd36   : > { %5214 = vrcp.f32 %v2785_v61 }
 0xd3d   : > { %v5211_v17 = vpop.eup %5210 }
 0xd3e   : > { %v2795_v43 = vmul.f32 %v5211_v17, %v2767_v21 }
 0xd3f   : > { %v5213_v40 = vpop.eup %5212 }
 0xd40   : > { %v2793_v22 = vmul.f32 %v5213_v40, %v2759_v25  ;;  %v2797_v13 = vpack.c.bf16 %v2795_v43, %v2795_v43  ;;  %v4524_v40 = vld [vmem:[%s6280_s2] ss:$0 sm:$0xff]  ;;  %s6285_s2 = sld [smem:[#allocation16_spill]] }
 0xd43   : > { %v5215_v41 = vpop.eup %5214 }
 0xd44   : > { %v2794_v0 = vmul.f32 %v5215_v41, %v2762_v33 }
 0xd46   : > { %v2796_v27 = vpack.c.bf16 %v2794_v0, %v2793_v22 }
 0xd48   : > { %4830 = vmatprep.mubr.bf16.mxu1 %v2796_v27 }
 0xd49   : > { %4831 = vmatmul.mubr.bf16.vlgmr.msra.gmra.mxu1 %v2797_v13 }
 0xe09   : > { %v4832_v44 = vpop.f32.mrf.mxu1 }
 0xe0a   : > { %v2912_v50 = vadd.f32 %v4832_v44, %v4513_v45 }
 0xe0b   : > { %v2903_v47 = vpop.f32.mrf.mxu1 }
 0xe0c   : > { %v2904_v52 = vadd.f32 %v4513_v45, %v2903_v47  ;;  %v5946_v23 = vadd.f32 %v2912_v50, %v5912_v28 }
 0xe0d   : > { %v4833_v55 = vpop.f32.mrf.mxu1 }
 0xe0e   : > { %v5943_v42 = vadd.f32 %v2904_v52, %v5907_v26  ;;  %v2928_v3 = vsel %vm1493_vm4, %v5946_v23, 0.0 }
 0xe0f   : > { %v2906_v57 = vpop.f32.mrf.mxu1 }
 0xe10   : > { %v2907_v59 = vadd.f32 %v4513_v45, %v2906_v57  ;;  %v2922_v56 = vsel %vm1278_vm1, %v5943_v42, 0.0 }
 0xe11   : > { %2923 = vadd.xlane.f32.xlu0 %v2922_v56 }
 0xe12   : > { %v5951_v63 = vadd.f32 %v2907_v59, %v5914_v31 }
 0xe14   : > { %v2925_v2 = vsel %vm1278_vm1, %v5951_v63, 0.0 }
 0xe15   : > { %2926 = vadd.xlane.f32.xlu1 %v2925_v2  ;;  %2929 = vadd.xlane.f32.xlu0 %v2928_v3 }
 0xe9a   : > { %v2924_v26 = vpop.xlane.xlu0 %2923 }
 0xe9b   : > { %v2931_v62 = vmul.f32 0.03125, %v2924_v26 }
 0xe9d   : > { %v2934_v28 = vsub.f32 %v5943_v42, %v2931_v62 }
 0xe9e   : > { %v2927_v5 = vpop.xlane.xlu1 %2926  ;;  %v2930_v4 = vpop.xlane.xlu0 %2929 }
 0xe9f   : > { %v2932_v24 = vmul.f32 0.03125, %v2927_v5  ;;  %v2933_v1 = vmul.f32 0.03125, %v2930_v4  ;;  %v2937_v31 = vmul.f32 %v2934_v28, %v2934_v28 }
 0xea1   : > { %v2935_v6 = vsub.f32 %v5951_v63, %v2932_v24  ;;  %v2936_v7 = vsub.f32 %v5946_v23, %v2933_v1  ;;  %v2940_v8 = vsel %vm1278_vm1, %v2937_v31, 0.0 }
 0xea2   : > { %2941 = vadd.xlane.f32.xlu1 %v2940_v8 }
 0xea3   : > { %v2938_v34 = vmul.f32 %v2935_v6, %v2935_v6  ;;  %v2939_v46 = vmul.f32 %v2936_v7, %v2936_v7 }
 0xea5   : > { %v2943_v39 = vsel %vm1278_vm1, %v2938_v34, 0.0  ;;  %v2946_v9 = vsel %vm1493_vm4, %v2939_v46, 0.0 }
 0xea6   : > { %2944 = vadd.xlane.f32.xlu0 %v2943_v39  ;;  %2947 = vadd.xlane.f32.xlu1 %v2946_v9 }
 0xf2b   : > { %v2942_v15 = vpop.xlane.xlu1 %2941 }
 0xf2c   : > { %v2949_v16 = vmul.f32 0.03125, %v2942_v15 }
 0xf2e   : > { %v2952_v20 = vadd.f32 1e-05, %v2949_v16 }
 0xf2f   : > { %v2948_v19 = vpop.xlane.xlu1 %2947  ;;  %v2945_v18 = vpop.xlane.xlu0 %2944 }
 0xf30   : > { %5216 = vrsqrt.f32 %v2952_v20  ;;  %v2951_v38 = vmul.f32 0.03125, %v2948_v19  ;;  %v2950_v21 = vmul.f32 0.03125, %v2945_v18 }
 0xf32   : > { %v2954_v48 = vadd.f32 1e-05, %v2951_v38  ;;  %v2953_v60 = vadd.f32 1e-05, %v2950_v21 }
 0xf34   : > { %5218 = vrsqrt.f32 %v2954_v48 }
 0xf35   : > { %5220 = vrsqrt.f32 %v2953_v60 }
 0xf3d   : > { %v5217_v25 = vpop.eup %5216 }
 0xf3e   : > { %v2958_v29 = vmul.f32 %v5217_v25, %v2934_v28 }
 0xf40   : > { %v2967_v54 = vmul.f32 %v4522_v30, %v2958_v29 }
 0xf41   : > { %v5219_v49 = vpop.eup %5218 }
 0xf42   : > { %v5221_v53 = vpop.eup %5220  ;;  %v2960_v32 = vmul.f32 %v5219_v49, %v2936_v7  ;;  %v2976_v37 = vadd.f32 %v4523_v11, %v2967_v54 }
 0xf43   : > { %v2959_v33 = vmul.f32 %v5221_v53, %v2935_v6 }
 0xf44   : > { %v2969_v35 = vmul.f32 %v4522_v30, %v2960_v32 }
 0xf45   : > { %v2968_v12 = vmul.f32 %v4522_v30, %v2959_v33 }
 0xf46   : > { %v2978_v36 = vadd.f32 %v4523_v11, %v2969_v35 }
 0xf47   : > { %v2977_v51 = vadd.f32 %v4523_v11, %v2968_v12 }
 0xf48   : > { %v2980_v61 = vpack.c.bf16 %v2978_v36, %v2978_v36 }
 0xf49   : > { %v2979_v17 = vpack.c.bf16 %v2977_v51, %v2976_v37 }
 0xf4b   : > { %4838 = vmatprep.mubr.msk.bf16.mxu0 %vm1278_vm1, %v2979_v17 }
 0xf4c   : > { %4839 = vmatmul.mubr.msk.bf16.vlgmr.msra.gmra.mxu0 %vm1278_vm1, %v2980_v61 }
0x100c   : > { %v4840_v41 = vpop.f32.mrf.mxu0 }
0x100d   : > { %v3053_v43 = vadd.f32 %v4840_v41, %v4524_v40 }
0x100e   : > { %v3044_v22 = vpop.f32.mrf.mxu0 }
0x100f   : > { %3106 = vrot.lane.b32.xlu0 %v3053_v43, %s5332_s23  ;;  %v3045_v27 = vadd.f32 %v4524_v40, %v3044_v22  ;;  %v5974_v57 = vpack.c.bf16 %v3053_v43, %v3053_v43  ;;  %v3060_v62 = vmul.f32 0.35355338, %v3053_v43 }
0x1010   : > { %v4841_v0 = vpop.f32.mrf.mxu0 }
0x1011   : > { %v3058_v45 = vmul.f32 0.35355338, %v3045_v27  ;;  %v3092_v19 = vpack.c.bf16 %v3060_v62, %v3060_v62 }
0x1012   : > { %v3047_v13 = vpop.f32.mrf.mxu0 }
0x1013   : > { %v3048_v44 = vadd.f32 %v4524_v40, %v3047_v13 }
0x1015   : > { %v3059_v47 = vmul.f32 0.35355338, %v3048_v44  ;;  %v5069_v50 = vpack.i.bf16 %v3048_v44, %v3045_v27  ;;  %v5981_v59 = vpack.c.bf16 %v3048_v44, %v3045_v27 }
0x1017   : > { %5070 = vrot.lane.b32.xlu0 %v5069_v50, %s5333_s26  ;;  %5065 = vrot.lane.b32.xlu1 %v5069_v50, %s5332_s23  ;;  %v3091_v52 = vpack.c.bf16 %v3059_v47, %v3058_v45  ;;  %v5079_v55 = vpack.i.bf16 %v3059_v47, %v3058_v45 }
0x1019   : > { %4846 = vmatprep.mubr.msk.bf16.mxu0 %vm1709_vm5, %v3091_v52 }
0x101b   : > { %3141 = vrot.lane.b32.xlu0 %v5974_v57, %s5334_s28  ;;  %3115 = vrot.lane.b32.xlu1 %v3053_v43, %s5333_s26 }
0x101f   : > { %3124 = vrot.lane.b32.xlu1 %v3053_v43, %s5335_s1 }
0x1023   : > { %5075 = vrot.lane.b32.xlu1 %v5069_v50, %s5335_s1 }
0x1027   : > { %3139 = vrot.lane.b32.xlu1 %v5981_v59, %s5334_s28 }
0x1081   : > { %v3107_v56 = vpop.permute.xlu0 %3106 }
0x1082   : > { %v5985_v2 = vpack.c.bf16 %v3107_v56, %v3107_v56 }
0x1084   : > { %3207 = vrot.lane.b32.xlu0 %v5985_v2, %s5334_s28 }
0x1088   : > { %5080 = vrot.lane.b32.xlu0 %v5079_v55, %s5332_s23 }
0x1089   : > { %v5071_v3 = vpop.permute.xlu0 %5070  ;;  %v5066_v26 = vpop.permute.xlu1 %5065 }
0x108a   : > { %v5073_v28 = vunpack.i.h.bf16 %v5071_v3  ;;  %v5072_v5 = vunpack.i.l.bf16 %v5071_v3  ;;  %v5068_v4 = vunpack.i.h.bf16 %v5066_v26  ;;  %v5067_v24 = vunpack.i.l.bf16 %v5066_v26 }
0x108c   : > { %v5990_v1 = vpack.c.bf16 %v5068_v4, %v5067_v24  ;;  %3068 = vrot.lane.b32.xlu0 %v3060_v62, %s5332_s23  ;;  %v5993_v7 = vpack.c.bf16 %v5073_v28, %v5072_v5  ;;  %s6281_s23 = smov 64  }
0x108d   : > { %v3142_v31 = vpop.permute.xlu0 %3141  ;;  %v3116_v6 = vpop.permute.xlu1 %3115 }
0x108e   : > { %v3153_v8 = vsel %vm1709_vm5, %v3142_v31, 0  ;;  %4970 = vmatprep.subr.msk.bf16.mxu0 %vm1709_vm5, %v3142_v31  ;;  %3205 = vrot.lane.b32.xlu1 %v5990_v1, %s5334_s28  ;;  %v5999_v34 = vpack.c.bf16 %v3116_v6, %v3116_v6 }
0x108f   : > { %4843 = vmatpush3.bf16.xpose.msra.mxu0 %v3153_v8 }
0x1090   : > { %3271 = vrot.lane.b32.xlu0 %v5993_v7, %s5334_s28 }
0x1091   : > { %v3125_v46 = vpop.permute.xlu1 %3124 }
0x1092   : > { %3273 = vrot.lane.b32.xlu1 %v5999_v34, %s5334_s28  ;;  %v6005_v39 = vpack.c.bf16 %v3125_v46, %v3125_v46 }
0x1094   : > { %5085 = vrot.lane.b32.xlu0 %v5079_v55, %s5333_s26 }
0x1095   : > { %v5076_v9 = vpop.permute.xlu1 %5075 }
0x1096   : > { %v5078_v10 = vunpack.i.h.bf16 %v5076_v9  ;;  %v5077_v14 = vunpack.i.l.bf16 %v5076_v9  ;;  %3339 = vrot.lane.b32.xlu1 %v6005_v39, %s5334_s28 }
0x1098   : > { %v6010_v15 = vpack.c.bf16 %v5078_v10, %v5077_v14  ;;  %5090 = vrot.lane.b32.xlu0 %v5079_v55, %s5335_s1 }
0x1099   : > { %v3140_v16 = vpop.permute.xlu1 %3139 }
0x109a   : > { %v3150_v20 = vsel %vm1709_vm5, %v3140_v16, 0  ;;  %3337 = vrot.lane.b32.xlu1 %v6010_v15, %s5334_s28  ;;  %4971 = vmatprep.subr.msk.bf16.mxu0 %vm1709_vm5, %v3140_v16  ;;  %s6283_s28 = sld [smem:[#allocation13_spill]] }
0x109b   : > { %4845 = vmatpush3.bf16.xpose.msra.mxu0 %v3150_v20 }
0x109e   : > { %3077 = vrot.lane.b32.xlu1 %v3060_v62, %s5333_s26  ;;  %s6282_s26 = sld [smem:[#allocation12_spill]] }
0x10a2   : > { %3086 = vrot.lane.b32.xlu1 %v3060_v62, %s5335_s1  ;;  %4847 = vmatmul.mubr.msk.bf16.vlgmr.msra.gmra.mxu0 %vm1709_vm5, %v3092_v19  ;;  %s6284_s1 = sld [smem:[#allocation18_spill]] }
0x10f6   : > { %v3208_v18 = vpop.permute.xlu0 %3207 }
0x10f7   : > { %v3219_v38 = vsel %vm1709_vm5, %v3208_v18, 0  ;;  %4972 = vmatprep.subr.msk.bf16.mxu0 %vm1709_vm5, %v3208_v18 }
0x10f8   : > { %4851 = vmatpush3.bf16.xpose.msra.mxu0 %v3219_v38 }
0x10fa   : > { %v5081_v21 = vpop.permute.xlu0 %5080 }
0x10fb   : > { %v5083_v48 = vunpack.i.h.bf16 %v5081_v21  ;;  %v5082_v60 = vunpack.i.l.bf16 %v5081_v21 }
0x10fd   : > { %v3093_v25 = vpack.c.bf16 %v5083_v48, %v5082_v60 }
0x10fe   : > { %v3069_v29 = vpop.permute.xlu0 %3068 }
0x10ff   : > { %4854 = vmatprep.mubr.msk.bf16.mxu0 %vm1709_vm5, %v3093_v25  ;;  %v3094_v11 = vpack.c.bf16 %v3069_v29, %v3069_v29 }
0x1100   : > { %v3206_v30 = vpop.permute.xlu1 %3205 }
0x1101   : > { %v3216_v49 = vsel %vm1709_vm5, %v3206_v30, 0  ;;  %4973 = vmatprep.subr.msk.bf16.mxu0 %vm1709_vm5, %v3206_v30 }
0x1102   : > { %v3272_v53 = vpop.permute.xlu0 %3271  ;;  %4853 = vmatpush3.bf16.xpose.msra.mxu0 %v3216_v49 }
0x1103   : > { %v3282_v43 = vsel %vm1709_vm5, %v3272_v53, 0 }
0x1104   : > { %v3274_v32 = vpop.permute.xlu1 %3273 }
0x1105   : > { %v3285_v33 = vsel %vm1709_vm5, %v3274_v32, 0  ;;  %4974 = vmatprep.subr.msk.bf16.mxu1 %vm1709_vm5, %v3274_v32 }
0x1106   : > { %4859 = vmatpush3.bf16.xpose.msra.mxu1 %v3285_v33  ;;  %v5086_v54 = vpop.permute.xlu0 %5085 }
0x1107   : > { %v5088_v35 = vunpack.i.h.bf16 %v5086_v54  ;;  %v5087_v12 = vunpack.i.l.bf16 %v5086_v54  ;;  %4975 = vmatprep.subr.msk.bf16.mxu1 %vm1709_vm5, %v3272_v53 }
0x1108   : > { %v3340_v36 = vpop.permute.xlu1 %3339 }
0x1109   : > { %v3095_v37 = vpack.c.bf16 %v5088_v35, %v5087_v12  ;;  %v3351_v51 = vsel %vm1709_vm5, %v3340_v36, 0  ;;  %4855 = vmatmul.mubr.msk.bf16.vlgmr.msra.gmra.mxu0 %vm1709_vm5, %v3094_v11  ;;  %4976 = vmatprep.subr.msk.bf16.mxu0 %vm1709_vm5, %v3340_v36 }
0x110a   : > { %v5091_v61 = vpop.permute.xlu0 %5090  ;;  %4867 = vmatpush3.bf16.xpose.msra.mxu0 %v3351_v51 }
0x110b   : > { %v5093_v17 = vunpack.i.h.bf16 %v5091_v61  ;;  %v5092_v40 = vunpack.i.l.bf16 %v5091_v61  ;;  %4862 = vmatprep.mubr.msk.bf16.mxu1 %vm1709_vm5, %v3095_v37 }
0x110c   : > { %v3338_v41 = vpop.permute.xlu1 %3337 }
0x110d   : > { %v3097_v22 = vpack.c.bf16 %v5093_v17, %v5092_v40  ;;  %4977 = vmatprep.subr.msk.bf16.mxu0 %vm1709_vm5, %v3338_v41  ;;  %v3348_v27 = vsel %vm1709_vm5, %v3338_v41, 0 }
0x110e   : > { %4861 = vmatpush3.bf16.xpose.msra.mxu1 %v3282_v43 }
0x110f   : > { %4870 = vmatprep.mubr.msk.bf16.mxu0 %vm1709_vm5, %v3097_v22 }
0x1110   : > { %v3078_v0 = vpop.permute.xlu1 %3077 }
0x1111   : > { %v3096_v13 = vpack.c.bf16 %v3078_v0, %v3078_v0 }
0x1112   : > { %4869 = vmatpush3.bf16.xpose.msra.mxu0 %v3348_v27 }
0x1114   : > { %v3087_v44 = vpop.permute.xlu1 %3086 }
0x1115   : > { %4863 = vmatmul.mubr.msk.bf16.vlgmr.msra.gmra.mxu1 %vm1709_vm5, %v3096_v13  ;;  %v3098_v45 = vpack.c.bf16 %v3087_v44, %v3087_v44 }
0x1119   : > { %4871 = vmatmul.mubr.msk.bf16.vlgmr.msra.gmra.mxu0 %vm1709_vm5, %v3098_v45 }
0x1162   : > { %v4848_v47 = vpop.f32.mrf.mxu0 }
0x1163   : > { %v3407_v50 = vsel %vm1975_vm6, %v4848_v47, -inf }
0x1164   : > { %3408 = vmax.xlane.f32.xlu0 %v3407_v50  ;;  %v3189_v52 = vpop.f32.mrf.mxu0 }
0x1165   : > { %v3401_v56 = vsel %vm1968_vm7, %v3189_v52, -inf }
0x1166   : > { %v4849_v55 = vpop.f32.mrf.mxu0 }
0x1168   : > { %3402 = vmax.xlane.f32.xlu0 %v3401_v56  ;;  %v3192_v3 = vpop.f32.mrf.mxu0 }
0x1169   : > { %v3404_v26 = vsel %vm1968_vm7, %v3192_v3, -inf }
0x116a   : > { %3405 = vmax.xlane.f32.xlu1 %v3404_v26 }
0x11c9   : > { %v4856_v62 = vpop.f32.mrf.mxu0 }
0x11ca   : > { %v3416_v28 = vsel %vm1975_vm6, %v4856_v62, -inf }
0x11cb   : > { %3417 = vmax.xlane.f32.xlu1 %v3416_v28  ;;  %v3255_v5 = vpop.f32.mrf.mxu0 }
0x11cc   : > { %v3410_v4 = vsel %vm1968_vm7, %v3255_v5, -inf }
0x11cd   : > { %3411 = vmax.xlane.f32.xlu0 %v3410_v4  ;;  %v4857_v24 = vpop.f32.mrf.mxu0 }
0x11cf   : > { %v6045_v6 = vpop.f32.mrf.mxu0 }
0x11d0   : > { %v3413_v19 = vsel %vm1968_vm7, %v6045_v6, -inf }
0x11d5   : > { %v6043_v31 = vpop.f32.mrf.mxu1 }
0x11d6   : > { %v3425_v38 = vsel %vm1975_vm6, %v6043_v31, -inf }
0x11d7   : > { %v6047_v8 = vpop.f32.mrf.mxu1 }
0x11d8   : > { %v3419_v46 = vsel %vm1968_vm7, %v6047_v8, -inf }
0x11d9   : > { %v4865_v9 = vpop.f32.mrf.mxu1  ;;  %3420 = vmax.xlane.f32.xlu0 %v3419_v46  ;;  %v6051_v10 = vpop.f32.mrf.mxu0 }
0x11da   : > { %v3434_v60 = vsel %vm1975_vm6, %v6051_v10, -inf }
0x11db   : > { %v3324_v14 = vpop.f32.mrf.mxu1  ;;  %v6053_v16 = vpop.f32.mrf.mxu0 }
0x11dc   : > { %v3422_v20 = vsel %vm1968_vm7, %v3324_v14, -inf  ;;  %v3428_v21 = vsel %vm1968_vm7, %v6053_v16, -inf }
0x11dd   : > { %3423 = vmax.xlane.f32.xlu1 %v3422_v20  ;;  %3414 = vmax.xlane.f32.xlu0 %v3413_v19  ;;  %v4873_v18 = vpop.f32.mrf.mxu0 }
0x11df   : > { %v6062_v48 = vpop.f32.mrf.mxu0 }
0x11e0   : > { %v3431_v25 = vsel %vm1968_vm7, %v6062_v48, -inf }
0x11e1   : > { %3426 = vmax.xlane.f32.xlu0 %v3425_v38  ;;  %3429 = vmax.xlane.f32.xlu1 %v3428_v21 }
0x11e5   : > { %3435 = vmax.xlane.f32.xlu1 %v3434_v60  ;;  %3432 = vmax.xlane.f32.xlu0 %v3431_v25 }
0x11ed   : > { %v3409_v29 = vpop.xlane.xlu0 %3408 }
0x11ee   : > { %v3439_v30 = vsub.f32 %v4848_v47, %v3409_v29 }
0x11f0   : > { %v3453_v53 = vmul.f32 1.442695, %v3439_v30 }
0x11f1   : > { %v3403_v49 = vpop.xlane.xlu0 %3402 }
0x11f2   : > { %5222 = vpow2.f32 %v3453_v53 }
0x11f3   : > { %v3406_v32 = vpop.xlane.xlu1 %3405 }
0x11f4   : > { %v3438_v33 = vsub.f32 %v3192_v3, %v3406_v32 }
0x11f6   : > { %3541 = vrot.lane.b32.xlu1 %v5981_v59, %s6281_s23  ;;  %v3437_v59 = vsub.f32 %v3189_v52, %v3403_v49 }
0x11fa   : > { %3605 = vrot.lane.b32.xlu1 %v5985_v2, %s6281_s23  ;;  %v3449_v2 = vmul.f32 1.442695, %v3437_v59 }
0x11fb   : > { %3543 = vrot.lane.b32.xlu0 %v5974_v57, %s6281_s23  ;;  %v3451_v57 = vmul.f32 1.442695, %v3438_v33 }
0x11fc   : > { %5224 = vpow2.f32 %v3449_v2 }
0x11fd   : > { %5226 = vpow2.f32 %v3451_v57 }
0x11fe   : > { %3603 = vrot.lane.b32.xlu1 %v5990_v1, %s6281_s23 }
0x11ff   : > { %3667 = vrot.lane.b32.xlu0 %v5999_v34, %s6281_s23  ;;  %v6080_v54 = vpop.eup %5222 }
0x1200   : > { %v3479_v1 = vsel %vm1975_vm6, %v6080_v54, 0.0 }
0x1202   : > { %3729 = vrot.lane.b32.xlu1 %v6005_v39, %s6281_s23 }
0x1209   : > { %v6084_v34 = vpop.eup %5224 }
0x120a   : > { %v3473_v39 = vsel %vm1968_vm7, %v6084_v34, 0.0  ;;  %v6088_v11 = vpop.eup %5226 }
0x120b   : > { %v3476_v35 = vsel %vm1968_vm7, %v6088_v11, 0.0 }
0x121e   : > { %3480 = vadd.xlane.f32.xlu0 %v3479_v1 }
0x1222   : > { %3474 = vadd.xlane.f32.xlu0 %v3473_v39 }
0x1226   : > { %3477 = vadd.xlane.f32.xlu1 %v3476_v35 }
0x1254   : > { %v3418_v12 = vpop.xlane.xlu1 %3417 }
0x1255   : > { %v3442_v36 = vsub.f32 %v4856_v62, %v3418_v12 }
0x1256   : > { %v3412_v37 = vpop.xlane.xlu0 %3411 }
0x1257   : > { %v3459_v51 = vmul.f32 1.442695, %v3442_v36  ;;  %v3440_v61 = vsub.f32 %v3255_v5, %v3412_v37 }
0x1259   : > { %5228 = vpow2.f32 %v3459_v51  ;;  %v3455_v17 = vmul.f32 1.442695, %v3440_v61 }
0x125b   : > { %5230 = vpow2.f32 %v3455_v17 }
0x1262   : > { %v3421_v40 = vpop.xlane.xlu0 %3420 }
0x1263   : > { %v3443_v44 = vsub.f32 %v6047_v8, %v3421_v40 }
0x1265   : > { %v3461_v3 = vmul.f32 1.442695, %v3443_v44 }
0x1266   : > { %v6092_v41 = vpop.eup %5228  ;;  %v3424_v43 = vpop.xlane.xlu1 %3423 }
0x1267   : > { %v3415_v22 = vpop.xlane.xlu0 %3414  ;;  %v3444_v0 = vsub.f32 %v3324_v14, %v3424_v43  ;;  %v3488_v27 = vsel %vm1975_vm6, %v6092_v41, 0.0 }
0x1268   : > { %v6096_v13 = vpop.eup %5230  ;;  %3489 = vadd.xlane.f32.xlu1 %v3488_v27  ;;  %v3441_v56 = vsub.f32 %v6045_v6, %v3415_v22 }
0x1269   : > { %v3463_v45 = vmul.f32 1.442695, %v3444_v0  ;;  %v3482_v55 = vsel %vm1968_vm7, %v6096_v13, 0.0 }
0x126a   : > { %v3430_v50 = vpop.xlane.xlu1 %3429  ;;  %v3457_v24 = vmul.f32 1.442695, %v3441_v56 }
0x126b   : > { %v3427_v47 = vpop.xlane.xlu0 %3426  ;;  %5232 = vpow2.f32 %v3463_v45  ;;  %v3446_v62 = vsub.f32 %v6053_v16, %v3430_v50 }
0x126c   : > { %v3445_v52 = vsub.f32 %v6043_v31, %v3427_v47  ;;  %3483 = vadd.xlane.f32.xlu1 %v3482_v55  ;;  %v3797_v55 = vld [vmem:[%s6282_s26] sm:$0xf] }
0x126d   : > { %v3467_v8 = vmul.f32 1.442695, %v3446_v62 }
0x126e   : > { %v3465_v26 = vmul.f32 1.442695, %v3445_v52  ;;  %v3436_v28 = vpop.xlane.xlu1 %3435 }
0x126f   : > { %v3433_v5 = vpop.xlane.xlu0 %3432  ;;  %v3448_v4 = vsub.f32 %v6051_v10, %v3436_v28 }
0x1270   : > { %5234 = vpow2.f32 %v3465_v26  ;;  %v3447_v31 = vsub.f32 %v6062_v48, %v3433_v5 }
0x1271   : > { %5236 = vpow2.f32 %v3461_v3  ;;  %v3471_v46 = vmul.f32 1.442695, %v3448_v4 }
0x1272   : > { %v3542_v9 = vpop.permute.xlu1 %3541  ;;  %v3469_v20 = vmul.f32 1.442695, %v3447_v31 }
0x1273   : > { %v3544_v14 = vpop.permute.xlu0 %3543  ;;  %5238 = vpow2.f32 %v3471_v46 }
0x1274   : > { %v3553_v6 = vand.u32 %v3544_v14, %v5809_v58  ;;  %5240 = vpow2.f32 %v3457_v24 }
0x1275   : > { %5242 = vpow2.f32 %v3467_v8 }
0x1276   : > { %4874 = vmatprep.subr.bf16.mxu1 %v3553_v6  ;;  %v3606_v16 = vpop.permute.xlu1 %3605  ;;  %5244 = vpow2.f32 %v3469_v20 }
0x1277   : > { %4875 = vmatpush3.bf16.msra.mxu1 %v3553_v6  ;;  %v3668_v19 = vpop.permute.xlu0 %3667  ;;  %v3615_v38 = vand.u32 %v3606_v16, %v5809_v58 }
0x1278   : > { %v3677_v10 = vand.u32 %v3668_v19, %v5809_v58  ;;  %4876 = vmatprep.subr.bf16.mxu1 %v3542_v9  ;;  %v6108_v18 = vpop.eup %5232 }
0x1279   : > { %v3494_v21 = vsel %vm1968_vm7, %v6108_v18, 0.0 }
0x127a   : > { %4890 = vmatprep.subr.bf16.mxu0 %v3677_v10  ;;  %3495 = vadd.xlane.f32.xlu1 %v3494_v21  ;;  %v3604_v1 = vpop.permute.xlu1 %3603 }
0x127b   : > { %4877 = vmatpush3.bf16.msra.mxu1 %v3542_v9  ;;  %4891 = vmatpush3.bf16.msra.mxu0 %v3677_v10  ;;  %v3808_v9 = vsel %vm1264_vm0, %v3797_v55, 0 }
0x127c   : > { %4882 = vmatprep.subr.bf16.mxu1 %v3615_v38 }
0x127d   : > { %v6113_v48 = vpop.eup %5234 }
0x127e   : > { %v3497_v60 = vsel %vm1975_vm6, %v6113_v48, 0.0  ;;  %v6117_v25 = vpop.eup %5236  ;;  %v3730_v35 = vpop.permute.xlu1 %3729 }
0x127f   : > { %3498 = vadd.xlane.f32.xlu0 %v3497_v60  ;;  %v3491_v53 = vsel %vm1968_vm7, %v6117_v25, 0.0 }
0x1280   : > { %v6119_v29 = vpop.eup %5238 }
0x1281   : > { %v6121_v30 = vpop.eup %5240  ;;  %v3506_v49 = vsel %vm1975_vm6, %v6119_v29, 0.0 }
0x1282   : > { %v6127_v59 = vpop.eup %5242  ;;  %3507 = vadd.xlane.f32.xlu1 %v3506_v49  ;;  %v3485_v2 = vsel %vm1968_vm7, %v6121_v30, 0.0 }
0x1283   : > { %3492 = vadd.xlane.f32.xlu0 %v3491_v53  ;;  %v3500_v32 = vsel %vm1968_vm7, %v6127_v59, 0.0  ;;  %v6133_v33 = vpop.eup %5244  ;;  %v3800_v53 = vld [vmem:[%s6282_s26 + $0xc] sm:$0xf] }
0x1284   : > { %v3503_v57 = vsel %vm1968_vm7, %v6133_v33, 0.0 }
0x1286   : > { %3501 = vadd.xlane.f32.xlu1 %v3500_v32 }
0x1287   : > { %3486 = vadd.xlane.f32.xlu0 %v3485_v2 }
0x128b   : > { %3504 = vadd.xlane.f32.xlu0 %v3503_v57 }
0x1297   : > { %3727 = vrot.lane.b32.xlu1 %v6010_v15, %s6281_s23 }
0x12a1   : > { %3665 = vrot.lane.b32.xlu0 %v5993_v7, %s6281_s23  ;;  %v3739_v7 = vand.u32 %v3730_v35, %v5809_v58  ;;  %s1056_s23 = scalar_lea.vmem %s5516_s6, %s4983_s0 }
0x12a7   : > { %v3481_v39 = vpop.xlane.xlu0 %3480 }
0x12a8   : > { %5246 = vrcp.f32 %v3481_v39 }
0x12ab   : > { %v3475_v12 = vpop.xlane.xlu0 %3474 }
0x12ac   : > { %5248 = vrcp.f32 %v3475_v12 }
0x12af   : > { %v3478_v36 = vpop.xlane.xlu1 %3477 }
0x12b0   : > { %5250 = vrcp.f32 %v3478_v36 }
0x12b5   : > { %v5247_v37 = vpop.eup %5246 }
0x12b6   : > { %v3523_v17 = vmul.f32 %v5247_v37, %v6080_v54 }
0x12b8   : > { %v3534_v22 = vpack.c.bf16 %v3523_v17, %v3523_v17 }
0x12b9   : > { %v5249_v51 = vpop.eup %5248 }
0x12ba   : > { %v3521_v40 = vmul.f32 %v5249_v51, %v6084_v34 }
0x12bd   : > { %v5251_v61 = vpop.eup %5250 }
0x12be   : > { %v3522_v15 = vmul.f32 %v5251_v61, %v6088_v11 }
0x12c0   : > { %v3533_v43 = vpack.c.bf16 %v3522_v15, %v3521_v40 }
0x12c2   : > { %4878 = vmatprep.mubr.msk.bf16.mxu1 %vm1968_vm7, %v3533_v43 }
0x12c3   : > { %4879 = vmatmul.mubr.msk.bf16.vlgmr.msra.gmra.mxu1 %vm1968_vm7, %v3534_v22 }
0x12c4   : > { %4883 = vmatpush3.bf16.msra.mxu1 %v3615_v38 }
0x12c5   : > { %4884 = vmatprep.subr.bf16.mxu1 %v3604_v1 }
0x12c8   : > { %4885 = vmatpush3.bf16.msra.mxu1 %v3604_v1 }
0x12c9   : > { %4898 = vmatprep.subr.bf16.mxu1 %v3739_v7 }
0x12f1   : > { %v3490_v0 = vpop.xlane.xlu1 %3489 }
0x12f5   : > { %v3484_v27 = vpop.xlane.xlu1 %3483 }
0x1303   : > { %v3496_v44 = vpop.xlane.xlu1 %3495 }
0x1308   : > { %v3499_v54 = vpop.xlane.xlu0 %3498 }
0x1309   : > { %5252 = vrcp.f32 %v3499_v54 }
0x130a   : > { %5254 = vrcp.f32 %v3496_v44 }
0x130b   : > { %v3508_v34 = vpop.xlane.xlu1 %3507 }
0x130c   : > { %v3493_v11 = vpop.xlane.xlu0 %3492 }
0x130d   : > { %5256 = vrcp.f32 %v3493_v11 }
0x130e   : > { %5258 = vrcp.f32 %v3490_v0  ;;  %v3979_v0 = vsel %vm1264_vm0, %v3800_v53, 0 }
0x130f   : > { %5260 = vrcp.f32 %v3484_v27  ;;  %v3502_v45 = vpop.xlane.xlu1 %3501 }
0x1310   : > { %v3487_v47 = vpop.xlane.xlu0 %3486 }
0x1311   : > { %5262 = vrcp.f32 %v3487_v47 }
0x1312   : > { %5264 = vrcp.f32 %v3502_v45 }
0x1313   : > { %v3728_v21 = vpop.permute.xlu1 %3727 }
0x1314   : > { %v3505_v50 = vpop.xlane.xlu0 %3504 }
0x1315   : > { %5266 = vrcp.f32 %v3505_v50 }
0x1316   : > { %5268 = vrcp.f32 %v3508_v34  ;;  %v5253_v58 = vpop.eup %5252 }
0x1317   : > { %v5255_v56 = vpop.eup %5254  ;;  %v3529_v26 = vmul.f32 %v5253_v58, %v6113_v48 }
0x1318   : > { %v3666_v52 = vpop.permute.xlu0 %3665  ;;  %v3528_v5 = vmul.f32 %v5255_v56, %v6108_v18 }
0x1319   : > { %4892 = vmatprep.subr.bf16.mxu0 %v3666_v52  ;;  %v3538_v46 = vpack.c.bf16 %v3529_v26, %v3529_v26 }
0x131a   : > { %4893 = vmatpush3.bf16.msra.mxu0 %v3666_v52  ;;  %v5257_v3 = vpop.eup %5256 }
0x131b   : > { %4978 = vmatprep.subr.msk.bf16.mxu0 %vm1264_vm0, %v3797_v55  ;;  %v5259_v62 = vpop.eup %5258  ;;  %v3527_v28 = vmul.f32 %v5257_v3, %v6117_v25  ;;  %v3798_v25 = vld [vmem:[%s6282_s26 + $0x4] sm:$0xf] }
0x131c   : > { %v5261_v4 = vpop.eup %5260  ;;  %v3526_v31 = vmul.f32 %v5259_v62, %v6092_v41  ;;  %v3865_v49 = vsel %vm1264_vm0, %v3798_v25, 0 }
0x131d   : > { %v3537_v24 = vpack.c.bf16 %v3528_v5, %v3527_v28  ;;  %v3524_v6 = vmul.f32 %v5261_v4, %v6096_v13 }
0x131e   : > { %v5263_v8 = vpop.eup %5262  ;;  %v3536_v10 = vpack.c.bf16 %v3526_v31, %v3526_v31 }
0x131f   : > { %v5265_v14 = vpop.eup %5264  ;;  %4894 = vmatprep.mubr.msk.bf16.mxu0 %vm1968_vm7, %v3537_v24  ;;  %v3525_v20 = vmul.f32 %v5263_v8, %v6121_v30  ;;  %v3799_v30 = vld [vmem:[%s6282_s26 + $0x8] sm:$0xf] }
0x1320   : > { %4895 = vmatmul.mubr.msk.bf16.vlgmr.msra.gmra.mxu0 %vm1968_vm7, %v3538_v46  ;;  %v3530_v18 = vmul.f32 %v5265_v14, %v6127_v59  ;;  %v3922_v1 = vsel %vm1264_vm0, %v3799_v30, 0 }
0x1321   : > { %v3535_v19 = vpack.c.bf16 %v3525_v20, %v3524_v6  ;;  %4907 = vmatpush3.bf16.msra.mxu0 %v3808_v9 }
0x1322   : > { %v5267_v16 = vpop.eup %5266  ;;  %4980 = vmatprep.subr.msk.bf16.mxu0 %vm1264_vm0, %v3799_v30 }
0x1323   : > { %v3531_v41 = vmul.f32 %v5267_v16, %v6133_v33  ;;  %v5269_v38 = vpop.eup %5268  ;;  %4886 = vmatprep.mubr.msk.bf16.mxu1 %vm1968_vm7, %v3535_v19 }
0x1324   : > { %4887 = vmatmul.mubr.msk.bf16.vlgmr.msra.gmra.mxu1 %vm1968_vm7, %v3536_v10  ;;  %v3532_v48 = vmul.f32 %v5269_v38, %v6119_v29 }
0x1325   : > { %v3539_v13 = vpack.c.bf16 %v3531_v41, %v3530_v18  ;;  %4899 = vmatpush3.bf16.msra.mxu1 %v3739_v7 }
0x1326   : > { %4900 = vmatprep.subr.bf16.mxu1 %v3728_v21  ;;  %v3540_v60 = vpack.c.bf16 %v3532_v48, %v3532_v48 }
0x1327   : > { %4902 = vmatprep.mubr.msk.bf16.mxu1 %vm1968_vm7, %v3539_v13 }
0x1329   : > { %4901 = vmatpush3.bf16.msra.mxu1 %v3728_v21 }
0x132a   : > { %4979 = vmatprep.subr.msk.bf16.mxu1 %vm1264_vm0, %v3798_v25 }
0x132c   : > { %4903 = vmatmul.mubr.msk.bf16.vlgmr.msra.gmra.mxu1 %vm1968_vm7, %v3540_v60 }
0x132d   : > { %4913 = vmatpush3.bf16.msra.mxu1 %v3865_v49 }
0x132e   : > { %4981 = vmatprep.subr.msk.bf16.mxu1 %vm1264_vm0, %v3800_v53 }
0x1383   : > { %v4880_v59 = vpop.f32.mrf.mxu1 }
0x1384   : > { %v3790_v57 = vpack.c.bf16 %v4880_v59, %v4880_v59 }
0x1385   : > { %v3589_v32 = vpop.f32.mrf.mxu1 }
0x1387   : > { %v4881_v2 = vpop.f32.mrf.mxu1 }
0x1388   : > { %v4553_v2 = vld [vmem:[%s6283_s28] ss:$0 sm:$0xff] }
0x1389   : > { %v3592_v29 = vpop.f32.mrf.mxu1 }
0x138a   : > { %v3789_v33 = vpack.c.bf16 %v3592_v29, %v3589_v32 }
0x138c   : > { %4908 = vmatprep.mubr.msk.bf16.mxu0 %vm1709_vm5, %v3789_v33 }
0x138d   : > { %4909 = vmatmul.mubr.msk.bf16.vlgmr.msra.gmra.mxu0 %vm1709_vm5, %v3790_v57 }
0x138e   : > { %4919 = vmatpush3.bf16.msra.mxu0 %v3922_v1 }
0x13e0   : > { %v4896_v39 = vpop.f32.mrf.mxu0 }
0x13e1   : > { %v3794_v17 = vpack.c.bf16 %v4896_v39, %v4896_v39 }
0x13e2   : > { %v3713_v35 = vpop.f32.mrf.mxu0 }
0x13e4   : > { %v4888_v12 = vpop.f32.mrf.mxu1  ;;  %v4897_v36 = vpop.f32.mrf.mxu0 }
0x13e5   : > { %v3792_v22 = vpack.c.bf16 %v4888_v12, %v4888_v12 }
0x13e6   : > { %v3651_v37 = vpop.f32.mrf.mxu1  ;;  %v3716_v51 = vpop.f32.mrf.mxu0 }
0x13e7   : > { %v3793_v61 = vpack.c.bf16 %v3716_v51, %v3713_v35 }
0x13e8   : > { %v4889_v40 = vpop.f32.mrf.mxu1 }
0x13e9   : > { %4920 = vmatprep.mubr.msk.bf16.mxu0 %vm1709_vm5, %v3793_v61 }
0x13ea   : > { %v3654_v15 = vpop.f32.mrf.mxu1  ;;  %4921 = vmatmul.mubr.msk.bf16.vlgmr.msra.gmra.mxu0 %vm1709_vm5, %v3794_v17 }
0x13eb   : > { %v3791_v43 = vpack.c.bf16 %v3654_v15, %v3651_v37 }
0x13ec   : > { %v4904_v7 = vpop.f32.mrf.mxu1 }
0x13ed   : > { %4914 = vmatprep.mubr.msk.bf16.mxu1 %vm1709_vm5, %v3791_v43  ;;  %v3796_v11 = vpack.c.bf16 %v4904_v7, %v4904_v7 }
0x13ee   : > { %v3775_v27 = vpop.f32.mrf.mxu1  ;;  %4915 = vmatmul.mubr.msk.bf16.vlgmr.msra.gmra.mxu1 %vm1709_vm5, %v3792_v22 }
0x13ef   : > { %4925 = vmatpush3.bf16.msra.mxu1 %v3979_v0 }
0x13f0   : > { %v4905_v44 = vpop.f32.mrf.mxu1 }
0x13f2   : > { %v3778_v54 = vpop.f32.mrf.mxu1 }
0x13f3   : > { %v3795_v34 = vpack.c.bf16 %v3778_v54, %v3775_v27 }
0x13f5   : > { %4926 = vmatprep.mubr.msk.bf16.mxu1 %vm1709_vm5, %v3795_v34  ;;  %v5110_v34 = vld [vmem:[%s6284_s1 + $0x8] sm:$0xff]  }
0x13f6   : > { %4927 = vmatmul.mubr.msk.bf16.vlgmr.msra.gmra.mxu1 %vm1709_vm5, %v3796_v11  ;;  %v5111_v11 = vld [vmem:[%s6284_s1] sm:$0xff]   ;;  %4930 = vmatprep.subr.bf16.mxu0 %v5110_v34 }
0x13f7   : > { %4931 = vmatpush3.bf16.msra.mxu0 %v5110_v34 }
0x13f8   : > { %4932 = vmatprep.subr.bf16.mxu0 %v5111_v11 }
0x13fb   : > { %4933 = vmatpush3.bf16.msra.mxu0 %v5111_v11 }
0x144d   : > { %v4910_v45 = vpop.f32.mrf.mxu0 }
0x144e   : > { %v4043_v28 = vsel %vm1493_vm4, %v4910_v45, 0.0 }
0x144f   : > { %v3844_v47 = vpop.f32.mrf.mxu0 }
0x1450   : > { %v4029_v8 = vsel %vm1278_vm1, %v3844_v47, 0.0 }
0x1451   : > { %v4911_v50 = vpop.f32.mrf.mxu0 }
0x1453   : > { %v3847_v58 = vpop.f32.mrf.mxu0 }
0x1454   : > { %v4036_v16 = vsel %vm1278_vm1, %v3847_v58, 0.0 }
0x14aa   : > { %v4922_v52 = vpop.f32.mrf.mxu0 }
0x14ab   : > { %v4046_v9 = vsel %vm1493_vm4, %v4922_v52, 0.0 }
0x14ac   : > { %v3958_v55 = vpop.f32.mrf.mxu0 }
0x14ad   : > { %v4032_v19 = vsel %vm1278_vm1, %v3958_v55, 0.0 }
0x14ae   : > { %v4916_v56 = vpop.f32.mrf.mxu1  ;;  %v4923_v3 = vpop.f32.mrf.mxu0 }
0x14af   : > { %v4044_v26 = vsel %vm1493_vm4, %v4916_v56, 0.0 }
0x14b0   : > { %v3901_v62 = vpop.f32.mrf.mxu1  ;;  %v4045_v4 = vadd.f32 %v4044_v26, %v4043_v28  ;;  %v3961_v18 = vpop.f32.mrf.mxu0 }
0x14b1   : > { %v4030_v5 = vsel %vm1278_vm1, %v3901_v62, 0.0  ;;  %v4039_v30 = vsel %vm1278_vm1, %v3961_v18, 0.0 }
0x14b2   : > { %v4917_v24 = vpop.f32.mrf.mxu1  ;;  %v4031_v46 = vadd.f32 %v4030_v5, %v4029_v8  ;;  %v4047_v20 = vadd.f32 %v4046_v9, %v4045_v4  ;;  %v4554_v5 = vld [vmem:[%s6285_s2] ss:$0 sm:$0xff] }
0x14b3   : > { %v4555_v9 = vld [vmem:[%s6286_s10] ss:$0 sm:$0xff] }
0x14b4   : > { %v3904_v31 = vpop.f32.mrf.mxu1  ;;  %v4033_v21 = vadd.f32 %v4032_v19, %v4031_v46 }
0x14b5   : > { %v4037_v14 = vsel %vm1278_vm1, %v3904_v31, 0.0 }
0x14b6   : > { %v4928_v6 = vpop.f32.mrf.mxu1  ;;  %v4038_v41 = vadd.f32 %v4037_v14, %v4036_v16 }
0x14b7   : > { %v4048_v10 = vsel %vm1493_vm4, %v4928_v6, 0.0 }
0x14b8   : > { %v4049_v38 = vadd.f32 %v4048_v10, %v4047_v20  ;;  %v4015_v13 = vpop.f32.mrf.mxu1  ;;  %v4040_v32 = vadd.f32 %v4039_v30, %v4038_v41  ;;  %v5112_v41 = vld [vmem:[%s5506_s27 + $0x38] sm:$0xff]   ;;  %v5119_v30 = vld [vmem:[%s5506_s27] sm:$0xff]  }
0x14b9   : > { %v4034_v48 = vsel %vm1278_vm1, %v4015_v13, 0.0  ;;  %4938 = vmatprep.subr.bf16.mxu1 %v5112_v41  ;;  %v5114_v13 = vld [vmem:[%s5506_s27 + $0x28] sm:$0xff]  }
0x14ba   : > { %v4035_v60 = vadd.f32 %v4034_v48, %v4033_v21  ;;  %v4929_v25 = vpop.f32.mrf.mxu1  ;;  %v4052_v49 = vadd.f32 %v4049_v38, %v5946_v23  ;;  %4939 = vmatpush3.bf16.msra.mxu1 %v5112_v41  ;;  %v5113_v38 = vld [vmem:[%s5506_s27 + $0x30] sm:$0xff]   ;;  %v5115_v21 = vld [vmem:[%s5506_s27 + $0x20] sm:$0xff]   ;;  %v5116_v48 = vld [vmem:[%s5506_s27 + $0x18] sm:$0xff]  }
0x14bb   : > { %4940 = vmatprep.subr.bf16.mxu1 %v5113_v38  ;;  %v5118_v25 = vld [vmem:[%s5506_s27 + $0x8] sm:$0xff]  }
0x14bc   : > { %v4050_v53 = vadd.f32 %v4035_v60, %v5943_v42  ;;  %v4018_v59 = vpop.f32.mrf.mxu1  ;;  %v6199_v1 = vadd.f32 %v4553_v2, %v4052_v49  ;;  %v5117_v60 = vld [vmem:[%s5506_s27 + $0x10] sm:$0xff]   ;;  %v4556_v49 = vld [vmem:[%s5501_s30] ss:$0 sm:$0xff] }
0x14bd   : > { %v4041_v29 = vsel %vm1278_vm1, %v4018_v59, 0.0 }
0x14be   : > { %v6197_v33 = vadd.f32 %v4553_v2, %v4050_v53  ;;  %v4042_v57 = vadd.f32 %v4041_v29, %v4040_v32  ;;  %v4071_v42 = vsel %vm1493_vm4, %v6199_v1, 0.0  ;;  %4941 = vmatpush3.bf16.msra.mxu1 %v5113_v38 }
0x14bf   : > { %4942 = vmatprep.subr.bf16.mxu1 %v5114_v13 }
0x14c0   : > { %v4051_v39 = vadd.f32 %v4042_v57, %v5951_v63  ;;  %v4065_v35 = vsel %vm1278_vm1, %v6197_v33, 0.0 }
0x14c1   : > { %4066 = vadd.xlane.f32.xlu0 %v4065_v35 }
0x14c2   : > { %v6204_v12 = vadd.f32 %v4553_v2, %v4051_v39  ;;  %4943 = vmatpush3.bf16.msra.mxu1 %v5114_v13 }
0x14c3   : > { %4944 = vmatprep.subr.bf16.mxu1 %v5115_v21 }
0x14c4   : > { %v4068_v23 = vsel %vm1278_vm1, %v6204_v12, 0.0 }
0x14c5   : > { %4072 = vadd.xlane.f32.xlu0 %v4071_v42  ;;  %4069 = vadd.xlane.f32.xlu1 %v4068_v23 }
0x14c6   : > { %4945 = vmatpush3.bf16.msra.mxu1 %v5115_v21 }
0x14c7   : > { %4946 = vmatprep.subr.bf16.mxu1 %v5116_v48 }
0x14ca   : > { %4947 = vmatpush3.bf16.msra.mxu1 %v5116_v48 }
0x14cb   : > { %4948 = vmatprep.subr.bf16.mxu1 %v5117_v60 }
0x14ce   : > { %4949 = vmatpush3.bf16.msra.mxu1 %v5117_v60 }
0x14cf   : > { %4950 = vmatprep.subr.bf16.mxu1 %v5118_v25 }
0x14d2   : > { %4951 = vmatpush3.bf16.msra.mxu1 %v5118_v25 }
0x14d3   : > { %4952 = vmatprep.subr.bf16.mxu1 %v5119_v30 }
0x14d6   : > { %4953 = vmatpush3.bf16.msra.mxu1 %v5119_v30 }
0x154a   : > { %v4067_v36 = vpop.xlane.xlu0 %4066 }
0x154b   : > { %v4074_v37 = vmul.f32 0.03125, %v4067_v36 }
0x154d   : > { %v4077_v51 = vsub.f32 %v6197_v33, %v4074_v37 }
0x154e   : > { %v4073_v63 = vpop.xlane.xlu0 %4072  ;;  %v4070_v61 = vpop.xlane.xlu1 %4069 }
0x154f   : > { %v4076_v17 = vmul.f32 0.03125, %v4073_v63  ;;  %v4075_v40 = vmul.f32 0.03125, %v4070_v61  ;;  %v4080_v15 = vmul.f32 %v4077_v51, %v4077_v51 }
0x1551   : > { %v4079_v43 = vsub.f32 %v6199_v1, %v4076_v17  ;;  %v4078_v22 = vsub.f32 %v6204_v12, %v4075_v40  ;;  %v4083_v7 = vsel %vm1278_vm1, %v4080_v15, 0.0 }
0x1552   : > { %4084 = vadd.xlane.f32.xlu0 %v4083_v7 }
0x1553   : > { %v4082_v0 = vmul.f32 %v4079_v43, %v4079_v43  ;;  %v4081_v27 = vmul.f32 %v4078_v22, %v4078_v22 }
0x1555   : > { %v4089_v44 = vsel %vm1493_vm4, %v4082_v0, 0.0  ;;  %v4086_v54 = vsel %vm1278_vm1, %v4081_v27, 0.0 }
0x1556   : > { %4090 = vadd.xlane.f32.xlu1 %v4089_v44  ;;  %4087 = vadd.xlane.f32.xlu0 %v4086_v54 }
0x15db   : > { %v4085_v45 = vpop.xlane.xlu0 %4084 }
0x15dc   : > { %v4092_v47 = vmul.f32 0.03125, %v4085_v45  ;;  %v4564_v45 = vld [vmem:[%s5511_s4] ss:$0 sm:$0xff] }
0x15de   : > { %v4095_v50 = vadd.f32 1e-05, %v4092_v47 }
0x15df   : > { %v4088_v58 = vpop.xlane.xlu0 %4087  ;;  %v4091_v52 = vpop.xlane.xlu1 %4090 }
0x15e0   : > { %5270 = vrsqrt.f32 %v4095_v50  ;;  %v4093_v55 = vmul.f32 0.03125, %v4088_v58  ;;  %v4094_v56 = vmul.f32 0.03125, %v4091_v52 }
0x15e2   : > { %v4096_v3 = vadd.f32 1e-05, %v4093_v55  ;;  %v4097_v26 = vadd.f32 1e-05, %v4094_v56 }
0x15e4   : > { %5272 = vrsqrt.f32 %v4096_v3 }
0x15e5   : > { %5274 = vrsqrt.f32 %v4097_v26 }
0x15ed   : > { %v5271_v62 = vpop.eup %5270 }
0x15ee   : > { %v4101_v28 = vmul.f32 %v5271_v62, %v4077_v51 }
0x15f0   : > { %v4110_v46 = vmul.f32 %v4554_v5, %v4101_v28 }
0x15f1   : > { %v5273_v4 = vpop.eup %5272 }
0x15f2   : > { %v5275_v24 = vpop.eup %5274  ;;  %v4102_v8 = vmul.f32 %v5273_v4, %v4078_v22  ;;  %v4119_v20 = vadd.f32 %v4555_v9, %v4110_v46 }
0x15f3   : > { %v4103_v31 = vmul.f32 %v5275_v24, %v4079_v43 }
0x15f4   : > { %v4111_v14 = vmul.f32 %v4554_v5, %v4102_v8 }
0x15f5   : > { %v4112_v6 = vmul.f32 %v4554_v5, %v4103_v31 }
0x15f6   : > { %v4120_v16 = vadd.f32 %v4555_v9, %v4111_v14 }
0x15f7   : > { %v4121_v19 = vadd.f32 %v4555_v9, %v4112_v6 }
0x15f8   : > { %v4122_v10 = vpack.c.bf16 %v4120_v16, %v4119_v20 }
0x15f9   : > { %v4123_v18 = vpack.c.bf16 %v4121_v19, %v4121_v19 }
0x15fa   : > { %4934 = vmatprep.mubr.msk.bf16.mxu0 %vm1278_vm1, %v4122_v10 }
0x15fb   : > { %4935 = vmatmul.mubr.msk.bf16.vlgmr.msra.gmra.mxu0 %vm1278_vm1, %v4123_v18 }
0x16bb   : > { %v4936_v53 = vpop.f32.mrf.mxu0 }
0x16bc   : > { %v4196_v59 = vadd.f32 %v4936_v53, %v4556_v49 }
0x16bd   : > { %v4187_v32 = vpop.f32.mrf.mxu0 }
0x16be   : > { %v4563_v2 = vmul.f32 -1.702, %v4196_v59  ;;  %v4188_v29 = vadd.f32 %v4556_v49, %v4187_v32 }
0x16bf   : > { %v4937_v57 = vpop.f32.mrf.mxu0 }
0x16c0   : > { %v4211_v39 = vmul.f32 1.442695, %v4563_v2  ;;  %v4561_v35 = vmul.f32 -1.702, %v4188_v29 }
0x16c1   : > { %v4190_v42 = vpop.f32.mrf.mxu0 }
0x16c2   : > { %5276 = vpow2.f32 %v4211_v39  ;;  %v4207_v23 = vmul.f32 1.442695, %v4561_v35  ;;  %v4191_v36 = vadd.f32 %v4556_v49, %v4190_v42 }
0x16c4   : > { %5278 = vpow2.f32 %v4207_v23  ;;  %v4562_v37 = vmul.f32 -1.702, %v4191_v36 }
0x16c6   : > { %v4209_v51 = vmul.f32 1.442695, %v4562_v37 }
0x16c8   : > { %5280 = vpow2.f32 %v4209_v51 }
0x16cf   : > { %v5277_v63 = vpop.eup %5276 }
0x16d0   : > { %v4215_v17 = vadd.f32 1.0, %v5277_v63 }
0x16d1   : > { %v5279_v61 = vpop.eup %5278 }
0x16d2   : > { %v4213_v40 = vadd.f32 1.0, %v5279_v61  ;;  %5282 = vrcp.f32 %v4215_v17 }
0x16d4   : > { %5284 = vrcp.f32 %v4213_v40 }
0x16d5   : > { %v5281_v15 = vpop.eup %5280 }
0x16d6   : > { %v4214_v43 = vadd.f32 1.0, %v5281_v15 }
0x16d8   : > { %5286 = vrcp.f32 %v4214_v43 }
0x16df   : > { %v5283_v22 = vpop.eup %5282 }
0x16e0   : > { %v4224_v27 = vmul.f32 %v5283_v22, %v4196_v59 }
0x16e1   : > { %v5285_v7 = vpop.eup %5284 }
0x16e2   : > { %v4222_v44 = vmul.f32 %v5285_v7, %v4188_v29  ;;  %v4226_v11 = vpack.c.bf16 %v4224_v27, %v4224_v27 }
0x16e5   : > { %v5287_v0 = vpop.eup %5286 }
0x16e6   : > { %v4223_v54 = vmul.f32 %v5287_v0, %v4191_v36 }
0x16e8   : > { %v4225_v34 = vpack.c.bf16 %v4223_v54, %v4222_v44 }
0x16ea   : > { %4954 = vmatprep.mubr.bf16.mxu1 %v4225_v34 }
0x16eb   : > { %4955 = vmatmul.mubr.bf16.vlgmr.msra.gmra.mxu1 %v4226_v11 }
0x17ab   : > { %v4956_v47 = vpop.f32.mrf.mxu1 }
0x17ac   : > { %v4341_v50 = vadd.f32 %v4956_v47, %v4564_v45 }
0x17ad   : > { %v4332_v58 = vpop.f32.mrf.mxu1 }
0x17ae   : > { %v4348_v52 = vadd.f32 %v4341_v50, %v6199_v1  ;;  %v4333_v55 = vadd.f32 %v4564_v45, %v4332_v58 }
0x17af   : > { %v4957_v56 = vpop.f32.mrf.mxu1 }
0x17b0   : > { %4351 = vst.msk [vmem:[%s1056_s23 + $0x10] sm:$0x1] %vm1493_vm4, %v4348_v52  ;;  %v4346_v3 = vadd.f32 %v4333_v55, %v6197_v33 }
0x17b1   : > { %v4335_v26 = vpop.f32.mrf.mxu1 }
0x17b2   : > { %4349 = vst.msk [vmem:[%s1056_s23] sm:$0xff] %vm1278_vm1, %v4346_v3  ;;  %v4336_v62 = vadd.f32 %v4564_v45, %v4335_v26 }
0x17b4   : > { %v4347_v28 = vadd.f32 %v4336_v62, %v6204_v12 }
0x17b6   : > { %4350 = vst.msk [vmem:[%s1056_s23 + $0x8] sm:$0xff] %vm1278_vm1, %v4347_v28 }
0x17b7 PF: > { %s79_s15 = sadd.s32 1, %s5294_s15  }
0x17b8   : > { %p76_p4 = scmp.ge.s32.totalorder %s79_s15, 4  }
0x17ba   :  { %78 = sbr.rel (!%p76_p4) target bundleno = 53 (0x35), region = 223 }

</bundles_post_ra>
